<compile_context>
chip_gen: v7x
topology: tpu7x:2x2x1
jax: 0.10.0
libtpu: 0.0.40
codegen_flags: <defaults>
</compile_context>

<pallas_src>
from functools import partial

import jax
import jax.numpy as jnp
from jax.experimental import pallas as pl
from jax.experimental.pallas import tpu as pltpu


def _round_up(x, n):
    return (x + n - 1) // n * n


def _convblock_kernel(x_ref, w1_ref, b1_ref, w2_ref, b2_ref, out_ref, mid_ref,
                      *, width, wp8, m, base, tail):
    """Fused conv3x3 -> bias -> leaky -> conv3x3 -> bias -> leaky for one image.

    x_ref:   (NPAD, Cin)   bf16 zero-padded image, spatial flattened row-major with
                           WP8 (= W+2 rounded up to 8) columns per row, channels last.
    w1_ref:  (9, Cin, Cmid)  bf16 scale-folded taps, (kh, kw) row-major.
    b1_ref:  (1, Cmid)       f32.
    w2_ref:  (9, Cmid, Cout) bf16.
    b2_ref:  (1, Cout)       f32.
    out_ref: (M, Cout)     "offset-flat" rows r = h*WP8 + w ; cols w >= W are junk.
    mid_ref: (NMID, Cmid)  bf16 VMEM scratch holding the zero-padded intermediate.
    """
    neg = 0.2
    c_mid = w1_ref.shape[2]
    c_out = w2_ref.shape[2]
    span = 2 * wp8 + m

    # ---------------- conv1: bf16 MXU matmuls, f32 accumulation ----------------
    # One shifted copy per kw (kw=0 is a free aligned view), then all 9 tap slices
    # are static slices whose start (kh*WP8) is a multiple of 8 -> no per-tap relayout.
    x_all = x_ref[...]                                    # (NPAD, Cin) bf16
    acc = jnp.zeros((m, c_mid), jnp.float32)
    for kw in range(3):
        x_kw = x_all[kw:kw + span, :]                     # kw=1,2: one shift-copy each
        for kh in range(3):
            off = kh * wp8                                # static, multiple of 8
            acc = acc + jnp.dot(x_kw[off:off + m, :], w1_ref[kh * 3 + kw],
                                preferred_element_type=jnp.float32)
    acc = acc + b1_ref[...]
    acc = jnp.where(acc >= 0, acc, neg * acc)             # LeakyReLU(0.2), f32 VPU

    # zero the junk columns (w >= W) so they cannot leak into conv2's zero padding
    # (one (m,1) iota per image; cheap, cannot be hoisted above the grid step)
    col = jax.lax.broadcasted_iota(jnp.int32, (m, 1), 0) % wp8
    acc = jnp.where(col < width, acc, 0.0)

    # ------------- place intermediate into the zero-padded scratch -------------
    # Halo-only zeroing (data region is fully overwritten each step).  base, m and
    # tail are all multiples of 8 -> all three stores are sublane-aligned.
    mid_ref[pl.ds(0, base), :] = jnp.zeros((base, c_mid), mid_ref.dtype)
    mid_ref[pl.ds(base + m, tail), :] = jnp.zeros((tail, c_mid), mid_ref.dtype)
    mid_ref[pl.ds(base, m), :] = acc.astype(mid_ref.dtype)

    # ---------------- conv2 (reads bf16 intermediate) ----------------
    # Padded-intermediate flat index p lives at mid_ref[p + base - (WP8+1)], so the
    # 9 tap read starts are (base-WP8-1) + kh*WP8 + kw  (== 7 + kh*WP8 + kw).
    # kw=1 is directly 8-aligned; kw=0,2 go through one shifted copy each.
    mid_all = mid_ref[...]                                # (NMID, Cmid) bf16
    shift0 = base - wp8 - 1                               # == 7
    acc2 = jnp.zeros((m, c_out), jnp.float32)
    for kw in range(3):
        mid_kw = mid_all[shift0 + kw:shift0 + kw + span, :]
        for kh in range(3):
            off = kh * wp8                                # static, multiple of 8
            acc2 = acc2 + jnp.dot(mid_kw[off:off + m, :], w2_ref[kh * 3 + kw],
                                  preferred_element_type=jnp.float32)
    acc2 = acc2 + b2_ref[...]
    acc2 = jnp.where(acc2 >= 0, acc2, neg * acc2)         # LeakyReLU(0.2)
    out_ref[...] = acc2.astype(out_ref.dtype)


def convblock_forward(x, w1_taps, b1_row, w2_taps, b2_row):
    """x: (B, Cin, H, W) NCHW.  Returns (B, Cout, H, W) in x.dtype."""
    B, Cin, H, W = x.shape
    Cmid = w1_taps.shape[2]
    Cout = w2_taps.shape[2]

    WP8 = _round_up(W + 2, 8)          # padded row width, sublane aligned
    Hp = H + 2
    M = H * WP8                        # offset-flat output rows per image (mult of 8)
    NPAD = M + 2 * WP8 + 8             # padded flat input length
    BASE = WP8 + 8                     # aligned placement offset of the intermediate
    TAIL = WP8 + 8
    NMID = BASE + M + TAIL             # intermediate scratch length

    # glue: zero-pad spatially, channels -> lane dim, flatten, cast to bf16 (one
    # XLA fusion pass; halves the HBM slab vs f32).
    xp = jnp.pad(x, ((0, 0), (0, 0), (1, 1), (1, WP8 - W - 1)))     # (B,Cin,Hp,WP8)
    xp = xp.transpose(0, 2, 3, 1).reshape(B, Hp * WP8, Cin)         # (B, Hp*WP8, Cin)
    xp = jnp.pad(xp, ((0, 0), (0, NPAD - Hp * WP8), (0, 0)))        # (B, NPAD, Cin)
    xp = xp.astype(jnp.bfloat16)

    kernel = partial(_convblock_kernel, width=W, wp8=WP8, m=M, base=BASE, tail=TAIL)

    # explicit scoped-VMEM request: double-buffered blocks + scratch + live values
    est = (2 * NPAD * Cin * 2 + 2 * M * Cout * 4          # x / out blocks (x2 buffers)
           + NMID * Cmid * 2                               # mid scratch
           + 9 * (Cin * Cmid + Cmid * Cout) * 2            # weights
           + 3 * NPAD * Cin * 2 + 3 * NMID * Cmid * 2      # shifted copies
           + M * Cmid * 4 + M * Cout * 4)                  # f32 accumulators
    vmem_limit = int(min(max(2 * est, 32 << 20), 64 << 20))

    out = pl.pallas_call(
        kernel,
        out_shape=jax.ShapeDtypeStruct((B, M, Cout), x.dtype),
        grid=(B,),
        in_specs=[
            pl.BlockSpec((None, NPAD, Cin), lambda b: (b, 0, 0)),
            pl.BlockSpec((9, Cin, Cmid), lambda b: (0, 0, 0)),
            pl.BlockSpec((1, Cmid), lambda b: (0, 0)),
            pl.BlockSpec((9, Cmid, Cout), lambda b: (0, 0, 0)),
            pl.BlockSpec((1, Cout), lambda b: (0, 0)),
        ],
        out_specs=pl.BlockSpec((None, M, Cout), lambda b: (b, 0, 0)),
        scratch_shapes=[pltpu.VMEM((NMID, Cmid), jnp.bfloat16)],
        compiler_params=pltpu.CompilerParams(
            dimension_semantics=("parallel",),             # megacore-shard the batch
            vmem_limit_bytes=vmem_limit),
    )(xp, w1_taps, b1_row, w2_taps, b2_row)

    # drop the junk columns of the offset-flat layout and go back to NCHW
    out = out.reshape(B, H, WP8, Cout)[:, :, :W, :]
    return out.transpose(0, 3, 1, 2)


class ConvBlockPallas:
    """JAX/Pallas equivalent of ConvBlock(WSConv2d, WSConv2d, LeakyReLU(0.2))."""

    def __init__(self, in_channels, out_channels, key=None):
        self.in_channels = in_channels
        self.out_channels = out_channels
        if key is None:
            key = jax.random.PRNGKey(0)
        k1, k2 = jax.random.split(key)

        # WSConv2d #1 (matches PyTorch init: weight ~ N(0,1), bias = 0)
        self.w1 = jax.random.normal(k1, (out_channels, in_channels, 3, 3), jnp.float32)
        self.b1 = jnp.zeros((out_channels,), jnp.float32)
        self.scale1 = (2.0 / (in_channels * 9)) ** 0.5
        # WSConv2d #2
        self.w2 = jax.random.normal(k2, (out_channels, out_channels, 3, 3), jnp.float32)
        self.b2 = jnp.zeros((out_channels,), jnp.float32)
        self.scale2 = (2.0 / (out_channels * 9)) ** 0.5

        # pre-layout ONCE: fold WS scale into the weights, transpose to tap-major
        # (9, Cin, Cout) and cast to bf16 (MXU operand dtype); biases stay f32.
        self.w1_taps = (self.w1 * self.scale1).transpose(2, 3, 1, 0).reshape(
            9, in_channels, out_channels).astype(jnp.bfloat16)
        self.w2_taps = (self.w2 * self.scale2).transpose(2, 3, 1, 0).reshape(
            9, out_channels, out_channels).astype(jnp.bfloat16)
        self.b1_row = self.b1.reshape(1, out_channels)
        self.b2_row = self.b2.reshape(1, out_channels)

    def __call__(self, x):
        return convblock_forward(x, self.w1_taps, self.b1_row,
                                 self.w2_taps, self.b2_row)


if __name__ == "__main__":
    key = jax.random.PRNGKey(0)
    k_x, k_m = jax.random.split(key)

    B, Cin, H, W = 2, 4, 16, 16
    Cout = 32
    x = jax.random.normal(k_x, (B, Cin, H, W), dtype=jnp.float32)

    model = ConvBlockPallas(in_channels=Cin, out_channels=Cout, key=k_m)
    out = model(x)
    out = jax.block_until_ready(out)
    assert out.shape == (B, Cout, H, W)

    # ---- reference: exact ConvBlock math with f32 lax convolutions ----
    def ws_conv(v, w, b, scale):
        y = jax.lax.conv_general_dilated(
            v * scale, w, window_strides=(1, 1), padding=((1, 1), (1, 1)),
            dimension_numbers=("NCHW", "OIHW", "NCHW"))
        return y + b[None, :, None, None]

    def leaky(v):
        return jnp.where(v >= 0, v, 0.2 * v)

    ref = leaky(ws_conv(x, model.w1, model.b1, model.scale1))
    ref = leaky(ws_conv(ref, model.w2, model.b2, model.scale2))

    # bf16 MXU operands (x, weights, intermediate) -> ~1e-2 level relative error vs
    # the f32 reference, as anticipated in the review.
    abs_err = float(jnp.max(jnp.abs(out - ref)))
    rel_err = abs_err / (float(jnp.max(jnp.abs(ref))) + 1e-6)
    assert rel_err < 5e-2, f"max abs error {abs_err}, rel {rel_err}"
    print("KERNEL_OK")
</pallas_src>

<mosaic_0001>
module attributes {stable_mosaic.version = 11 : i64} {
  func.func @_convblock_kernel(%arg0: i32, %arg1: memref<1x440x4xbf16, #tpu.memory_space<vmem>>, %arg2: memref<9x4x32xbf16, #tpu.memory_space<vmem>>, %arg3: memref<1x32xf32, #tpu.memory_space<vmem>>, %arg4: memref<9x32x32xbf16, #tpu.memory_space<vmem>>, %arg5: memref<1x32xf32, #tpu.memory_space<vmem>>, %arg6: memref<1x384x32xf32, #tpu.memory_space<vmem>>, %arg7: memref<448x32xbf16, #tpu.memory_space<vmem>>) attributes {dimension_semantics = [#tpu.dimension_semantics<parallel>], iteration_bounds = array<i64: 2>, scalar_prefetch = 0 : i64, scratch_operands = 1 : i64, tpu.core_type = #tpu.core_type<tc>, window_params = [{transform_indices = @transform_0, window_bounds = array<i64: 1, 440, 4>}, {pipeline_mode = #tpu.pipeline_mode<synchronous>, transform_indices = @transform_1, window_bounds = array<i64: 9, 4, 32>}, {pipeline_mode = #tpu.pipeline_mode<synchronous>, transform_indices = @transform_2, window_bounds = array<i64: 1, 32>}, {pipeline_mode = #tpu.pipeline_mode<synchronous>, transform_indices = @transform_3, window_bounds = array<i64: 9, 32, 32>}, {pipeline_mode = #tpu.pipeline_mode<synchronous>, transform_indices = @transform_4, window_bounds = array<i64: 1, 32>}, {transform_indices = @transform_5, window_bounds = array<i64: 1, 384, 32>}]} {
    %c0 = arith.constant 0 : index
    %c0_0 = arith.constant 0 : index
    %c0_1 = arith.constant 0 : index
    %0 = vector.load %arg1[%c0, %c0_0, %c0_1] : memref<1x440x4xbf16, #tpu.memory_space<vmem>>, vector<1x440x4xbf16>
    %1 = vector.shape_cast %0 : vector<1x440x4xbf16> to vector<440x4xbf16>
    %cst = arith.constant 0.000000e+00 : f32
    %2 = vector.broadcast %cst : f32 to vector<384x32xf32>
    %3 = vector.extract_strided_slice %1 {offsets = [0, 0], sizes = [432, 4], strides = [1, 1]} : vector<440x4xbf16> to vector<432x4xbf16>
    %4 = vector.extract_strided_slice %3 {offsets = [0, 0], sizes = [384, 4], strides = [1, 1]} : vector<432x4xbf16> to vector<384x4xbf16>
    %c0_2 = arith.constant 0 : index
    %c0_3 = arith.constant 0 : index
    %c0_4 = arith.constant 0 : index
    %5 = vector.load %arg2[%c0_2, %c0_3, %c0_4] : memref<9x4x32xbf16, #tpu.memory_space<vmem>>, vector<1x4x32xbf16>
    %6 = vector.shape_cast %5 : vector<1x4x32xbf16> to vector<4x32xbf16>
    %cst_5 = arith.constant dense<0.000000e+00> : vector<384x32xf32>
    %7 = tpu.matmul %4, %6, %cst_5 {dimension_numbers = #tpu.dot_dimension_numbers<[1], [0], [0], [1], [0, 0, 1, 1], [], []>} : vector<384x4xbf16>, vector<4x32xbf16>, vector<384x32xf32> -> vector<384x32xf32>
    %8 = arith.addf %2, %7 : vector<384x32xf32>
    %9 = vector.extract_strided_slice %3 {offsets = [24, 0], sizes = [384, 4], strides = [1, 1]} : vector<432x4xbf16> to vector<384x4xbf16>
    %c3 = arith.constant 3 : index
    %c0_6 = arith.constant 0 : index
    %c0_7 = arith.constant 0 : index
    %10 = vector.load %arg2[%c3, %c0_6, %c0_7] : memref<9x4x32xbf16, #tpu.memory_space<vmem>>, vector<1x4x32xbf16>
    %11 = vector.shape_cast %10 : vector<1x4x32xbf16> to vector<4x32xbf16>
    %cst_8 = arith.constant dense<0.000000e+00> : vector<384x32xf32>
    %12 = tpu.matmul %9, %11, %cst_8 {dimension_numbers = #tpu.dot_dimension_numbers<[1], [0], [0], [1], [0, 0, 1, 1], [], []>} : vector<384x4xbf16>, vector<4x32xbf16>, vector<384x32xf32> -> vector<384x32xf32>
    %13 = arith.addf %8, %12 : vector<384x32xf32>
    %14 = vector.extract_strided_slice %3 {offsets = [48, 0], sizes = [384, 4], strides = [1, 1]} : vector<432x4xbf16> to vector<384x4xbf16>
    %c6 = arith.constant 6 : index
    %c0_9 = arith.constant 0 : index
    %c0_10 = arith.constant 0 : index
    %15 = vector.load %arg2[%c6, %c0_9, %c0_10] : memref<9x4x32xbf16, #tpu.memory_space<vmem>>, vector<1x4x32xbf16>
    %16 = vector.shape_cast %15 : vector<1x4x32xbf16> to vector<4x32xbf16>
    %cst_11 = arith.constant dense<0.000000e+00> : vector<384x32xf32>
    %17 = tpu.matmul %14, %16, %cst_11 {dimension_numbers = #tpu.dot_dimension_numbers<[1], [0], [0], [1], [0, 0, 1, 1], [], []>} : vector<384x4xbf16>, vector<4x32xbf16>, vector<384x32xf32> -> vector<384x32xf32>
    %18 = arith.addf %13, %17 : vector<384x32xf32>
    %19 = vector.extract_strided_slice %1 {offsets = [1, 0], sizes = [432, 4], strides = [1, 1]} : vector<440x4xbf16> to vector<432x4xbf16>
    %20 = vector.extract_strided_slice %19 {offsets = [0, 0], sizes = [384, 4], strides = [1, 1]} : vector<432x4xbf16> to vector<384x4xbf16>
    %c1 = arith.constant 1 : index
    %c0_12 = arith.constant 0 : index
    %c0_13 = arith.constant 0 : index
    %21 = vector.load %arg2[%c1, %c0_12, %c0_13] : memref<9x4x32xbf16, #tpu.memory_space<vmem>>, vector<1x4x32xbf16>
    %22 = vector.shape_cast %21 : vector<1x4x32xbf16> to vector<4x32xbf16>
    %cst_14 = arith.constant dense<0.000000e+00> : vector<384x32xf32>
    %23 = tpu.matmul %20, %22, %cst_14 {dimension_numbers = #tpu.dot_dimension_numbers<[1], [0], [0], [1], [0, 0, 1, 1], [], []>} : vector<384x4xbf16>, vector<4x32xbf16>, vector<384x32xf32> -> vector<384x32xf32>
    %24 = arith.addf %18, %23 : vector<384x32xf32>
    %25 = vector.extract_strided_slice %19 {offsets = [24, 0], sizes = [384, 4], strides = [1, 1]} : vector<432x4xbf16> to vector<384x4xbf16>
    %c4 = arith.constant 4 : index
    %c0_15 = arith.constant 0 : index
    %c0_16 = arith.constant 0 : index
    %26 = vector.load %arg2[%c4, %c0_15, %c0_16] : memref<9x4x32xbf16, #tpu.memory_space<vmem>>, vector<1x4x32xbf16>
    %27 = vector.shape_cast %26 : vector<1x4x32xbf16> to vector<4x32xbf16>
    %cst_17 = arith.constant dense<0.000000e+00> : vector<384x32xf32>
    %28 = tpu.matmul %25, %27, %cst_17 {dimension_numbers = #tpu.dot_dimension_numbers<[1], [0], [0], [1], [0, 0, 1, 1], [], []>} : vector<384x4xbf16>, vector<4x32xbf16>, vector<384x32xf32> -> vector<384x32xf32>
    %29 = arith.addf %24, %28 : vector<384x32xf32>
    %30 = vector.extract_strided_slice %19 {offsets = [48, 0], sizes = [384, 4], strides = [1, 1]} : vector<432x4xbf16> to vector<384x4xbf16>
    %c7 = arith.constant 7 : index
    %c0_18 = arith.constant 0 : index
    %c0_19 = arith.constant 0 : index
    %31 = vector.load %arg2[%c7, %c0_18, %c0_19] : memref<9x4x32xbf16, #tpu.memory_space<vmem>>, vector<1x4x32xbf16>
    %32 = vector.shape_cast %31 : vector<1x4x32xbf16> to vector<4x32xbf16>
    %cst_20 = arith.constant dense<0.000000e+00> : vector<384x32xf32>
    %33 = tpu.matmul %30, %32, %cst_20 {dimension_numbers = #tpu.dot_dimension_numbers<[1], [0], [0], [1], [0, 0, 1, 1], [], []>} : vector<384x4xbf16>, vector<4x32xbf16>, vector<384x32xf32> -> vector<384x32xf32>
    %34 = arith.addf %29, %33 : vector<384x32xf32>
    %35 = vector.extract_strided_slice %1 {offsets = [2, 0], sizes = [432, 4], strides = [1, 1]} : vector<440x4xbf16> to vector<432x4xbf16>
    %36 = vector.extract_strided_slice %35 {offsets = [0, 0], sizes = [384, 4], strides = [1, 1]} : vector<432x4xbf16> to vector<384x4xbf16>
    %c2 = arith.constant 2 : index
    %c0_21 = arith.constant 0 : index
    %c0_22 = arith.constant 0 : index
    %37 = vector.load %arg2[%c2, %c0_21, %c0_22] : memref<9x4x32xbf16, #tpu.memory_space<vmem>>, vector<1x4x32xbf16>
    %38 = vector.shape_cast %37 : vector<1x4x32xbf16> to vector<4x32xbf16>
    %cst_23 = arith.constant dense<0.000000e+00> : vector<384x32xf32>
    %39 = tpu.matmul %36, %38, %cst_23 {dimension_numbers = #tpu.dot_dimension_numbers<[1], [0], [0], [1], [0, 0, 1, 1], [], []>} : vector<384x4xbf16>, vector<4x32xbf16>, vector<384x32xf32> -> vector<384x32xf32>
    %40 = arith.addf %34, %39 : vector<384x32xf32>
    %41 = vector.extract_strided_slice %35 {offsets = [24, 0], sizes = [384, 4], strides = [1, 1]} : vector<432x4xbf16> to vector<384x4xbf16>
    %c5 = arith.constant 5 : index
    %c0_24 = arith.constant 0 : index
    %c0_25 = arith.constant 0 : index
    %42 = vector.load %arg2[%c5, %c0_24, %c0_25] : memref<9x4x32xbf16, #tpu.memory_space<vmem>>, vector<1x4x32xbf16>
    %43 = vector.shape_cast %42 : vector<1x4x32xbf16> to vector<4x32xbf16>
    %cst_26 = arith.constant dense<0.000000e+00> : vector<384x32xf32>
    %44 = tpu.matmul %41, %43, %cst_26 {dimension_numbers = #tpu.dot_dimension_numbers<[1], [0], [0], [1], [0, 0, 1, 1], [], []>} : vector<384x4xbf16>, vector<4x32xbf16>, vector<384x32xf32> -> vector<384x32xf32>
    %45 = arith.addf %40, %44 : vector<384x32xf32>
    %46 = vector.extract_strided_slice %35 {offsets = [48, 0], sizes = [384, 4], strides = [1, 1]} : vector<432x4xbf16> to vector<384x4xbf16>
    %c8 = arith.constant 8 : index
    %c0_27 = arith.constant 0 : index
    %c0_28 = arith.constant 0 : index
    %47 = vector.load %arg2[%c8, %c0_27, %c0_28] : memref<9x4x32xbf16, #tpu.memory_space<vmem>>, vector<1x4x32xbf16>
    %48 = vector.shape_cast %47 : vector<1x4x32xbf16> to vector<4x32xbf16>
    %cst_29 = arith.constant dense<0.000000e+00> : vector<384x32xf32>
    %49 = tpu.matmul %46, %48, %cst_29 {dimension_numbers = #tpu.dot_dimension_numbers<[1], [0], [0], [1], [0, 0, 1, 1], [], []>} : vector<384x4xbf16>, vector<4x32xbf16>, vector<384x32xf32> -> vector<384x32xf32>
    %50 = arith.addf %45, %49 : vector<384x32xf32>
    %c0_30 = arith.constant 0 : index
    %c0_31 = arith.constant 0 : index
    %51 = vector.load %arg3[%c0_30, %c0_31] : memref<1x32xf32, #tpu.memory_space<vmem>>, vector<1x32xf32>
    %52 = vector.broadcast %51 : vector<1x32xf32> to vector<384x32xf32>
    %53 = arith.addf %50, %52 : vector<384x32xf32>
    %cst_32 = arith.constant 0.000000e+00 : f32
    %54 = vector.broadcast %cst_32 : f32 to vector<384x32xf32>
    %55 = arith.cmpf oge, %53, %54 : vector<384x32xf32>
    %cst_33 = arith.constant 2.000000e-01 : f32
    %56 = vector.broadcast %cst_33 : f32 to vector<384x32xf32>
    %57 = arith.mulf %56, %53 : vector<384x32xf32>
    %58 = arith.select %55, %53, %57 : vector<384x32xi1>, vector<384x32xf32>
    %59 = tpu.iota {dimensions = array<i32: 0>} : vector<384x1xi32>
    %c24_i32 = arith.constant 24 : i32
    %c0_i32 = arith.constant 0 : i32
    %60 = arith.cmpi eq, %c24_i32, %c0_i32 : i32
    %c1_i32 = arith.constant 1 : i32
    %61 = arith.select %60, %c1_i32, %c24_i32 : i32
    %62 = vector.broadcast %61 : i32 to vector<384x1xi32>
    %63 = arith.remsi %59, %62 : vector<384x1xi32>
    %c0_i32_34 = arith.constant 0 : i32
    %64 = vector.broadcast %c0_i32_34 : i32 to vector<384x1xi32>
    %65 = arith.cmpi ne, %63, %64 : vector<384x1xi32>
    %c0_i32_35 = arith.constant 0 : i32
    %66 = vector.broadcast %c0_i32_35 : i32 to vector<384x1xi32>
    %67 = arith.cmpi slt, %63, %66 : vector<384x1xi32>
    %c0_i32_36 = arith.constant 0 : i32
    %68 = arith.cmpi slt, %61, %c0_i32_36 : i32
    %69 = vector.broadcast %68 : i1 to vector<384x1xi1>
    %70 = vector.broadcast %69 : vector<384x1xi1> to vector<384x1xi1>
    %71 = arith.xori %67, %70 : vector<384x1xi1>
    %72 = arith.andi %71, %65 : vector<384x1xi1>
    %73 = vector.broadcast %61 : i32 to vector<384x1xi32>
    %74 = arith.addi %63, %73 : vector<384x1xi32>
    %75 = arith.select %72, %74, %63 : vector<384x1xi1>, vector<384x1xi32>
    %c16_i32 = arith.constant 16 : i32
    %76 = vector.broadcast %c16_i32 : i32 to vector<384x1xi32>
    %77 = arith.cmpi slt, %75, %76 : vector<384x1xi32>
    %cst_37 = arith.constant 0.000000e+00 : f32
    %78 = vector.shape_cast %77 : vector<384x1xi1> to vector<384x1xi1>
    %79 = vector.broadcast %78 : vector<384x1xi1> to vector<384x32xi1>
    %80 = vector.broadcast %cst_37 : f32 to vector<384x32xf32>
    %81 = arith.select %79, %58, %80 : vector<384x32xi1>, vector<384x32xf32>
    %cst_38 = arith.constant 0.000000e+00 : bf16
    %82 = vector.broadcast %cst_38 : bf16 to vector<32x32xbf16>
    %c0_39 = arith.constant 0 : index
    %c0_40 = arith.constant 0 : index
    %83 = vector.load %arg7[%c0_39, %c0_40] : memref<448x32xbf16, #tpu.memory_space<vmem>>, vector<32x32xbf16>
    tpu.vector_store %arg7[%c0_39, %c0_40], %82 {strides = array<i32>} : memref<448x32xbf16, #tpu.memory_space<vmem>>, vector<32x32xbf16>,
    %cst_41 = arith.constant 0.000000e+00 : bf16
    %84 = vector.broadcast %cst_41 : bf16 to vector<32x32xbf16>
    %c416 = arith.constant 416 : index
    %c0_42 = arith.constant 0 : index
    %85 = vector.load %arg7[%c416, %c0_42] : memref<448x32xbf16, #tpu.memory_space<vmem>>, vector<32x32xbf16>
    tpu.vector_store %arg7[%c416, %c0_42], %84 {strides = array<i32>} : memref<448x32xbf16, #tpu.memory_space<vmem>>, vector<32x32xbf16>,
    %86 = arith.truncf %81 : vector<384x32xf32> to vector<384x32xbf16>
    %c32 = arith.constant 32 : index
    %c0_43 = arith.constant 0 : index
    %87 = vector.load %arg7[%c32, %c0_43] : memref<448x32xbf16, #tpu.memory_space<vmem>>, vector<384x32xbf16>
    tpu.vector_store %arg7[%c32, %c0_43], %86 {strides = array<i32>} : memref<448x32xbf16, #tpu.memory_space<vmem>>, vector<384x32xbf16>,
    %c0_44 = arith.constant 0 : index
    %c0_45 = arith.constant 0 : index
    %88 = vector.load %arg7[%c0_44, %c0_45] : memref<448x32xbf16, #tpu.memory_space<vmem>>, vector<448x32xbf16>
    %cst_46 = arith.constant 0.000000e+00 : f32
    %89 = vector.broadcast %cst_46 : f32 to vector<384x32xf32>
    %90 = vector.extract_strided_slice %88 {offsets = [7, 0], sizes = [432, 32], strides = [1, 1]} : vector<448x32xbf16> to vector<432x32xbf16>
    %91 = vector.extract_strided_slice %90 {offsets = [0, 0], sizes = [384, 32], strides = [1, 1]} : vector<432x32xbf16> to vector<384x32xbf16>
    %c0_47 = arith.constant 0 : index
    %c0_48 = arith.constant 0 : index
    %c0_49 = arith.constant 0 : index
    %92 = vector.load %arg4[%c0_47, %c0_48, %c0_49] : memref<9x32x32xbf16, #tpu.memory_space<vmem>>, vector<1x32x32xbf16>
    %93 = vector.shape_cast %92 : vector<1x32x32xbf16> to vector<32x32xbf16>
    %cst_50 = arith.constant dense<0.000000e+00> : vector<384x32xf32>
    %94 = tpu.matmul %91, %93, %cst_50 {dimension_numbers = #tpu.dot_dimension_numbers<[1], [0], [0], [1], [0, 0, 1, 1], [], []>} : vector<384x32xbf16>, vector<32x32xbf16>, vector<384x32xf32> -> vector<384x32xf32>
    %95 = arith.addf %89, %94 : vector<384x32xf32>
    %96 = vector.extract_strided_slice %90 {offsets = [24, 0], sizes = [384, 32], strides = [1, 1]} : vector<432x32xbf16> to vector<384x32xbf16>
    %c3_51 = arith.constant 3 : index
    %c0_52 = arith.constant 0 : index
    %c0_53 = arith.constant 0 : index
    %97 = vector.load %arg4[%c3_51, %c0_52, %c0_53] : memref<9x32x32xbf16, #tpu.memory_space<vmem>>, vector<1x32x32xbf16>
    %98 = vector.shape_cast %97 : vector<1x32x32xbf16> to vector<32x32xbf16>
    %cst_54 = arith.constant dense<0.000000e+00> : vector<384x32xf32>
    %99 = tpu.matmul %96, %98, %cst_54 {dimension_numbers = #tpu.dot_dimension_numbers<[1], [0], [0], [1], [0, 0, 1, 1], [], []>} : vector<384x32xbf16>, vector<32x32xbf16>, vector<384x32xf32> -> vector<384x32xf32>
    %100 = arith.addf %95, %99 : vector<384x32xf32>
    %101 = vector.extract_strided_slice %90 {offsets = [48, 0], sizes = [384, 32], strides = [1, 1]} : vector<432x32xbf16> to vector<384x32xbf16>
    %c6_55 = arith.constant 6 : index
    %c0_56 = arith.constant 0 : index
    %c0_57 = arith.constant 0 : index
    %102 = vector.load %arg4[%c6_55, %c0_56, %c0_57] : memref<9x32x32xbf16, #tpu.memory_space<vmem>>, vector<1x32x32xbf16>
    %103 = vector.shape_cast %102 : vector<1x32x32xbf16> to vector<32x32xbf16>
    %cst_58 = arith.constant dense<0.000000e+00> : vector<384x32xf32>
    %104 = tpu.matmul %101, %103, %cst_58 {dimension_numbers = #tpu.dot_dimension_numbers<[1], [0], [0], [1], [0, 0, 1, 1], [], []>} : vector<384x32xbf16>, vector<32x32xbf16>, vector<384x32xf32> -> vector<384x32xf32>
    %105 = arith.addf %100, %104 : vector<384x32xf32>
    %106 = vector.extract_strided_slice %88 {offsets = [8, 0], sizes = [432, 32], strides = [1, 1]} : vector<448x32xbf16> to vector<432x32xbf16>
    %107 = vector.extract_strided_slice %106 {offsets = [0, 0], sizes = [384, 32], strides = [1, 1]} : vector<432x32xbf16> to vector<384x32xbf16>
    %c1_59 = arith.constant 1 : index
    %c0_60 = arith.constant 0 : index
    %c0_61 = arith.constant 0 : index
    %108 = vector.load %arg4[%c1_59, %c0_60, %c0_61] : memref<9x32x32xbf16, #tpu.memory_space<vmem>>, vector<1x32x32xbf16>
    %109 = vector.shape_cast %108 : vector<1x32x32xbf16> to vector<32x32xbf16>
    %cst_62 = arith.constant dense<0.000000e+00> : vector<384x32xf32>
    %110 = tpu.matmul %107, %109, %cst_62 {dimension_numbers = #tpu.dot_dimension_numbers<[1], [0], [0], [1], [0, 0, 1, 1], [], []>} : vector<384x32xbf16>, vector<32x32xbf16>, vector<384x32xf32> -> vector<384x32xf32>
    %111 = arith.addf %105, %110 : vector<384x32xf32>
    %112 = vector.extract_strided_slice %106 {offsets = [24, 0], sizes = [384, 32], strides = [1, 1]} : vector<432x32xbf16> to vector<384x32xbf16>
    %c4_63 = arith.constant 4 : index
    %c0_64 = arith.constant 0 : index
    %c0_65 = arith.constant 0 : index
    %113 = vector.load %arg4[%c4_63, %c0_64, %c0_65] : memref<9x32x32xbf16, #tpu.memory_space<vmem>>, vector<1x32x32xbf16>
    %114 = vector.shape_cast %113 : vector<1x32x32xbf16> to vector<32x32xbf16>
    %cst_66 = arith.constant dense<0.000000e+00> : vector<384x32xf32>
    %115 = tpu.matmul %112, %114, %cst_66 {dimension_numbers = #tpu.dot_dimension_numbers<[1], [0], [0], [1], [0, 0, 1, 1], [], []>} : vector<384x32xbf16>, vector<32x32xbf16>, vector<384x32xf32> -> vector<384x32xf32>
    %116 = arith.addf %111, %115 : vector<384x32xf32>
    %117 = vector.extract_strided_slice %106 {offsets = [48, 0], sizes = [384, 32], strides = [1, 1]} : vector<432x32xbf16> to vector<384x32xbf16>
    %c7_67 = arith.constant 7 : index
    %c0_68 = arith.constant 0 : index
    %c0_69 = arith.constant 0 : index
    %118 = vector.load %arg4[%c7_67, %c0_68, %c0_69] : memref<9x32x32xbf16, #tpu.memory_space<vmem>>, vector<1x32x32xbf16>
    %119 = vector.shape_cast %118 : vector<1x32x32xbf16> to vector<32x32xbf16>
    %cst_70 = arith.constant dense<0.000000e+00> : vector<384x32xf32>
    %120 = tpu.matmul %117, %119, %cst_70 {dimension_numbers = #tpu.dot_dimension_numbers<[1], [0], [0], [1], [0, 0, 1, 1], [], []>} : vector<384x32xbf16>, vector<32x32xbf16>, vector<384x32xf32> -> vector<384x32xf32>
    %121 = arith.addf %116, %120 : vector<384x32xf32>
    %122 = vector.extract_strided_slice %88 {offsets = [9, 0], sizes = [432, 32], strides = [1, 1]} : vector<448x32xbf16> to vector<432x32xbf16>
    %123 = vector.extract_strided_slice %122 {offsets = [0, 0], sizes = [384, 32], strides = [1, 1]} : vector<432x32xbf16> to vector<384x32xbf16>
    %c2_71 = arith.constant 2 : index
    %c0_72 = arith.constant 0 : index
    %c0_73 = arith.constant 0 : index
    %124 = vector.load %arg4[%c2_71, %c0_72, %c0_73] : memref<9x32x32xbf16, #tpu.memory_space<vmem>>, vector<1x32x32xbf16>
    %125 = vector.shape_cast %124 : vector<1x32x32xbf16> to vector<32x32xbf16>
    %cst_74 = arith.constant dense<0.000000e+00> : vector<384x32xf32>
    %126 = tpu.matmul %123, %125, %cst_74 {dimension_numbers = #tpu.dot_dimension_numbers<[1], [0], [0], [1], [0, 0, 1, 1], [], []>} : vector<384x32xbf16>, vector<32x32xbf16>, vector<384x32xf32> -> vector<384x32xf32>
    %127 = arith.addf %121, %126 : vector<384x32xf32>
    %128 = vector.extract_strided_slice %122 {offsets = [24, 0], sizes = [384, 32], strides = [1, 1]} : vector<432x32xbf16> to vector<384x32xbf16>
    %c5_75 = arith.constant 5 : index
    %c0_76 = arith.constant 0 : index
    %c0_77 = arith.constant 0 : index
    %129 = vector.load %arg4[%c5_75, %c0_76, %c0_77] : memref<9x32x32xbf16, #tpu.memory_space<vmem>>, vector<1x32x32xbf16>
    %130 = vector.shape_cast %129 : vector<1x32x32xbf16> to vector<32x32xbf16>
    %cst_78 = arith.constant dense<0.000000e+00> : vector<384x32xf32>
    %131 = tpu.matmul %128, %130, %cst_78 {dimension_numbers = #tpu.dot_dimension_numbers<[1], [0], [0], [1], [0, 0, 1, 1], [], []>} : vector<384x32xbf16>, vector<32x32xbf16>, vector<384x32xf32> -> vector<384x32xf32>
    %132 = arith.addf %127, %131 : vector<384x32xf32>
    %133 = vector.extract_strided_slice %122 {offsets = [48, 0], sizes = [384, 32], strides = [1, 1]} : vector<432x32xbf16> to vector<384x32xbf16>
    %c8_79 = arith.constant 8 : index
    %c0_80 = arith.constant 0 : index
    %c0_81 = arith.constant 0 : index
    %134 = vector.load %arg4[%c8_79, %c0_80, %c0_81] : memref<9x32x32xbf16, #tpu.memory_space<vmem>>, vector<1x32x32xbf16>
    %135 = vector.shape_cast %134 : vector<1x32x32xbf16> to vector<32x32xbf16>
    %cst_82 = arith.constant dense<0.000000e+00> : vector<384x32xf32>
    %136 = tpu.matmul %133, %135, %cst_82 {dimension_numbers = #tpu.dot_dimension_numbers<[1], [0], [0], [1], [0, 0, 1, 1], [], []>} : vector<384x32xbf16>, vector<32x32xbf16>, vector<384x32xf32> -> vector<384x32xf32>
    %137 = arith.addf %132, %136 : vector<384x32xf32>
    %c0_83 = arith.constant 0 : index
    %c0_84 = arith.constant 0 : index
    %138 = vector.load %arg5[%c0_83, %c0_84] : memref<1x32xf32, #tpu.memory_space<vmem>>, vector<1x32xf32>
    %139 = vector.broadcast %138 : vector<1x32xf32> to vector<384x32xf32>
    %140 = arith.addf %137, %139 : vector<384x32xf32>
    %cst_85 = arith.constant 0.000000e+00 : f32
    %141 = vector.broadcast %cst_85 : f32 to vector<384x32xf32>
    %142 = arith.cmpf oge, %140, %141 : vector<384x32xf32>
    %cst_86 = arith.constant 2.000000e-01 : f32
    %143 = vector.broadcast %cst_86 : f32 to vector<384x32xf32>
    %144 = arith.mulf %143, %140 : vector<384x32xf32>
    %145 = arith.select %142, %140, %144 : vector<384x32xi1>, vector<384x32xf32>
    %c0_87 = arith.constant 0 : index
    %c0_88 = arith.constant 0 : index
    %c0_89 = arith.constant 0 : index
    %146 = vector.load %arg6[%c0_87, %c0_88, %c0_89] : memref<1x384x32xf32, #tpu.memory_space<vmem>>, vector<1x384x32xf32>
    %147 = vector.shape_cast %146 : vector<1x384x32xf32> to vector<384x32xf32>
    %148 = vector.shape_cast %145 : vector<384x32xf32> to vector<1x384x32xf32>
    tpu.vector_store %arg6[%c0_87, %c0_88, %c0_89], %148 {strides = array<i32>} : memref<1x384x32xf32, #tpu.memory_space<vmem>>, vector<1x384x32xf32>,
    return
  }
  func.func @transform_0(%arg0: i32) -> (i32, i32, i32) {
    %c0_i32 = arith.constant 0 : i32
    %c0_i32_0 = arith.constant 0 : i32
    %c0_i32_1 = arith.constant 0 : i32
    return %arg0, %c0_i32, %c0_i32_0 : i32, i32, i32
  }
  func.func @transform_1(%arg0: i32) -> (i32, i32, i32) {
    %c0_i32 = arith.constant 0 : i32
    %c0_i32_0 = arith.constant 0 : i32
    %c0_i32_1 = arith.constant 0 : i32
    %c0_i32_2 = arith.constant 0 : i32
    return %c0_i32, %c0_i32_0, %c0_i32_1 : i32, i32, i32
  }
  func.func @transform_2(%arg0: i32) -> (i32, i32) {
    %c0_i32 = arith.constant 0 : i32
    %c0_i32_0 = arith.constant 0 : i32
    %c0_i32_1 = arith.constant 0 : i32
    return %c0_i32, %c0_i32_0 : i32, i32
  }
  func.func @transform_3(%arg0: i32) -> (i32, i32, i32) {
    %c0_i32 = arith.constant 0 : i32
    %c0_i32_0 = arith.constant 0 : i32
    %c0_i32_1 = arith.constant 0 : i32
    %c0_i32_2 = arith.constant 0 : i32
    return %c0_i32, %c0_i32_0, %c0_i32_1 : i32, i32, i32
  }
  func.func @transform_4(%arg0: i32) -> (i32, i32) {
    %c0_i32 = arith.constant 0 : i32
    %c0_i32_0 = arith.constant 0 : i32
    %c0_i32_1 = arith.constant 0 : i32
    return %c0_i32, %c0_i32_0 : i32, i32
  }
  func.func @transform_5(%arg0: i32) -> (i32, i32, i32) {
    %c0_i32 = arith.constant 0 : i32
    %c0_i32_0 = arith.constant 0 : i32
    %c0_i32_1 = arith.constant 0 : i32
    return %arg0, %c0_i32, %c0_i32_0 : i32, i32, i32
  }
}

</mosaic_0001>

<bundles_post_ra>
// kernel: tpu_custom_call.1
= control target key start
LH: loop header
LB: loop body
LE: loop exit
PB: predicated region body
PF: predicated region fallthrough
CT: control target
= control target key end

     0   :  { %s11872_s18 = smov 0   ;;  %s16028_s0 = inlined_call_operand.vmem [shape: bf16[2,440,4], index: 0, kind: input, shape index: {}]   ;;  %s16029_s1 = inlined_call_operand.vmem [shape: bf16[9,4,32], index: 1, kind: input, shape index: {}]   ;;  %s16030_s2 = inlined_call_operand.vmem [shape: f32[1,32], index: 2, kind: input, shape index: {}]   ;;  %s16031_s3 = inlined_call_operand.vmem [shape: bf16[9,32,32], index: 3, kind: input, shape index: {}]   ;;  %s16032_s4 = inlined_call_operand.vmem [shape: f32[1,32], index: 4, kind: input, shape index: {}]   ;;  %s16033_s5 = inlined_call_operand.vmem [shape: f32[2,384,32], index: 5, kind: output, shape index: {}]  }
   0x1 LB: > { %s8929_s19 = sadd.s32 4294967295, %s11839_s18   ;;  %p8933_p0 = scmp.ge.s32.totalorder %s11839_s18, 1  ;;  %s11839_s18 = sphi %s11872_s18, %s15_s18  }
   0x2   : > { %p187_p1 = scmp.lt.s32.totalorder %s11839_s18, 3 }
   0x4   : > { %p188_p2 = pnand %p8933_p0, %p187_p1 }
   0x6   : > { %191 = sbr.rel (%p188_p2) target bundleno = 2148 (0x864), region = 40 }
   0xd   : > { %v8936_v0 = vld [vmem:[%s16029_s1 + $0x6] sm:$0x3]  ;;  %vm477_vm0 = vcmask 1041408   ;;  %p215_p3 = scmp.lt.s32.totalorder %s8929_s19, 1  ;;  %v281_v2 = vld [vmem:[%s16029_s1] sm:$0x3] }
   0xe   : > { %11629 = vmatprep.subr.msk.bf16.mxu0 %vm477_vm0, %v8936_v0  ;;  %v479_v1 = vsel %vm477_vm0, %v8936_v0, 0  ;;  %vm404_vm1 = vcmask 31744   ;;  %v809_v5 = vsel %vm477_vm0, %v281_v2, 0  ;;  %v11911_v10 = vld [vmem:[%s16029_s1 + $0xc] sm:$0x3]  ;;  %vm2700_vm3 = vcmask 1046528  }
   0xf   : > { %9944 = vmatpush3.bf16.msra.mxu0 %v479_v1  ;;  %s17374_s19 = smov (!%p215_p3, %s8929_s19), 1  ;;  %vm16070_vm2 = vsmask.f32 7424  ;;  %vm16071_vm4 = vcmask 261120  }
  0x10   : > { %11630 = vmatprep.subr.msk.bf16.mxu0 %vm477_vm0, %v281_v2  ;;  %s11638_s24 = smul.u32 220, %s17374_s19 }
  0x11   : > { %s11639_s15 = smul.u32 384, %s17374_s19 }
  0x12   : > { %s11895_s27 = scalar_lea.vmem %s16028_s0, %s11638_s24 }
  0x13   : > { %v11898_v3 = vld [vmem:[%s11895_s27 + $0xc] sm:$0xf]  ;;  %v230_v4 = vld [vmem:[%s11895_s27 + $0x10] sm:$0xf]  ;;  %v231_v7 = vld [vmem:[%s11895_s27 + $0x14] sm:$0xf]  ;;  %s15881_s20 = scalar_lea.vmem %s16033_s5, %s11639_s15 }
  0x14   : > { %v11903_v6 = vcombine.low %v11898_v3, %v230_v4  ;;  %v232_v8 = vld [vmem:[%s11895_s27 + $0x18] sm:$0xf]  ;;  %v233_v9 = vld [vmem:[%s11895_s27 + $0x1c] sm:$0xf]  ;;  %v234_v12 = vld [vmem:[%s11895_s27 + $0x20] sm:$0xf]  ;;  %v11920_v16 = vcombine.low %v230_v4, %v231_v7 }
  0x15   : > { %v11913_v11 = vcombine.low %v231_v7, %v232_v8  ;;  %v11916_v13 = vcombine.low %v232_v8, %v233_v9  ;;  %v235_v14 = vld [vmem:[%s11895_s27 + $0x24] sm:$0xf]  ;;  %v236_v15 = vld [vmem:[%s11895_s27 + $0x28] sm:$0xf]  ;;  %v11924_v17 = vcombine.low %v233_v9, %v234_v12  ;;  %v237_v19 = vld [vmem:[%s11895_s27 + $0x2c] sm:$0xf] }
  0x16   : > { %16330 = vst [vmem:[#allocation3_spill] sm:$0xff] %v11903_v6  ;;  %16333 = vst [vmem:[#allocation6_spill] sm:$0xff] %v11920_v16  ;;  %9945 = vmatprep.mubr.msk.bf16.mxu0 %vm404_vm1, %v11903_v6  ;;  %v11926_v18 = vcombine.low %v234_v12, %v235_v14  ;;  %v238_v20 = vld [vmem:[%s11895_s27 + $0x30] sm:$0xf]  ;;  %v239_v21 = vld [vmem:[%s11895_s27 + $0x34] sm:$0xf]  ;;  %v11933_v22 = vcombine.low %v236_v15, %v237_v19  ;;  %v11961_v40 = vcombine.low %v235_v14, %v236_v15 }
  0x17   : > { %16331 = vst [vmem:[#allocation4_spill] sm:$0xff] %v11913_v11  ;;  %16332 = vst [vmem:[#allocation5_spill] sm:$0xff] %v11916_v13  ;;  %9946 = vmatmul.mubr.msk.bf16.vlgmr.msra.gmra.mrb[0].mxu0 %vm404_vm1, %v11913_v11  ;;  %v240_v23 = vld [vmem:[%s11895_s27 + $0x38] sm:$0xf]  ;;  %v11936_v24 = vcombine.low %v238_v20, %v239_v21  ;;  %v241_v25 = vld [vmem:[%s11895_s27 + $0x3c] sm:$0xf]  ;;  %v11970_v46 = vcombine.low %v237_v19, %v238_v20 }
  0x18   : > { %16334 = vst [vmem:[#allocation7_spill] sm:$0xff] %v11924_v17  ;;  %16335 = vst [vmem:[#allocation8_spill] sm:$0xff] %v11926_v18  ;;  %v242_v26 = vld [vmem:[%s11895_s27 + $0x40] sm:$0xf]  ;;  %9994 = vmatpush3.bf16.msra.mxu0 %v809_v5  ;;  %9949 = vmatprep.mubr.msk.bf16.mxu0 %vm404_vm1, %v11924_v17  ;;  %v11942_v27 = vcombine.low %v240_v23, %v241_v25  ;;  %v243_v28 = vld [vmem:[%s11895_s27 + $0x44] sm:$0xf]  ;;  %v12015_v20 = vcombine.low %v239_v21, %v240_v23 }
  0x19   : > { %16336 = vst [vmem:[#allocation9_spill] sm:$0xff] %v11933_v22  ;;  %16337 = vst [vmem:[#allocation10_spill] sm:$0xff] %v11936_v24  ;;  %v244_v29 = vld [vmem:[%s11895_s27 + $0x48] sm:$0xf]  ;;  %v245_v30 = vld [vmem:[%s11895_s27 + $0x4c] sm:$0xf]  ;;  %v11947_v31 = vcombine.low %v242_v26, %v243_v28  ;;  %11631 = vmatprep.subr.msk.bf16.mxu0 %vm477_vm0, %v11911_v10 }
  0x1a   : > { %16338 = vst [vmem:[#allocation11_spill] sm:$0xff] %v11942_v27  ;;  %v246_v32 = vld [vmem:[%s11895_s27 + $0x50] sm:$0xf]  ;;  %v11950_v33 = vcombine.low %v244_v29, %v245_v30  ;;  %v247_v34 = vld [vmem:[%s11895_s27 + $0x54] sm:$0xf]  ;;  %16342 = vst [vmem:[#allocation15_spill] sm:$0xff] %v11961_v40  ;;  %v12025_v17 = vcombine.low %v243_v28, %v244_v29 }
  0x1b   : > { %16339 = vst [vmem:[#allocation12_spill] sm:$0xff] %v11947_v31  ;;  %v248_v35 = vld [vmem:[%s11895_s27 + $0x58] sm:$0xf]  ;;  %v11956_v36 = vcombine.low %v246_v32, %v247_v34  ;;  %v249_v37 = vld [vmem:[%s11895_s27 + $0x5c] sm:$0xf]  ;;  %16345 = vst [vmem:[#allocation18_spill] sm:$0xff] %v11970_v46  ;;  %v12027_v11 = vcombine.low %v245_v30, %v246_v32 }
  0x1c   : > { %16340 = vst [vmem:[#allocation13_spill] sm:$0xff] %v11950_v33  ;;  %v250_v38 = vld [vmem:[%s11895_s27 + $0x60] sm:$0xf]  ;;  %v251_v39 = vld [vmem:[%s11895_s27 + $0x64] sm:$0xf]  ;;  %v11963_v41 = vcombine.low %v248_v35, %v249_v37  ;;  %v12033_v21 = vcombine.low %v247_v34, %v248_v35 }
  0x1d   : > { %16341 = vst [vmem:[#allocation14_spill] sm:$0xff] %v11956_v36  ;;  %v252_v42 = vld [vmem:[%s11895_s27 + $0x68] sm:$0xf]  ;;  %v11966_v43 = vcombine.low %v250_v38, %v251_v39  ;;  %v253_v44 = vld [vmem:[%s11895_s27 + $0x6c] sm:$0xf]  ;;  %v12035_v23 = vcombine.low %v249_v37, %v250_v38 }
  0x1e   : > { %16343 = vst [vmem:[#allocation16_spill] sm:$0xff] %v11963_v41  ;;  %v254_v45 = vld [vmem:[%s11895_s27 + $0x70] sm:$0xf]  ;;  %v11972_v47 = vcombine.low %v252_v42, %v253_v44  ;;  %v255_v48 = vld [vmem:[%s11895_s27 + $0x74] sm:$0xf] }
  0x1f   : > { %16344 = vst [vmem:[#allocation17_spill] sm:$0xff] %v11966_v43  ;;  %v256_v49 = vld [vmem:[%s11895_s27 + $0x78] sm:$0xf]  ;;  %v257_v50 = vld [vmem:[%s11895_s27 + $0x7c] sm:$0xf]  ;;  %v11977_v51 = vcombine.low %v254_v45, %v255_v48  ;;  %9950 = vmatmul.mubr.msk.bf16.gmra.mrb[4].mxu0 %vm404_vm1, %v11961_v40 }
  0x20   : > { %16346 = vst [vmem:[#allocation19_spill] sm:$0xff] %v11972_v47  ;;  %v258_v52 = vld [vmem:[%s11895_s27 + $0x80] sm:$0xf]  ;;  %v11980_v53 = vcombine.low %v256_v49, %v257_v50  ;;  %v259_v54 = vld [vmem:[%s11895_s27 + $0x84] sm:$0xf]  ;;  %9953 = vmatprep.mubr.msk.bf16.mxu0 %vm404_vm1, %v11970_v46  ;;  %v12019_v46 = vcombine.low %v241_v25, %v242_v26  ;;  %v12041_v25 = vcombine.low %v251_v39, %v252_v42 }
  0x21   : > { %16347 = vst [vmem:[#allocation20_spill] sm:$0xff] %v11977_v51  ;;  %v260_v55 = vld [vmem:[%s11895_s27 + $0x88] sm:$0xf]  ;;  %v11984_v56 = vcombine.low %v258_v52, %v259_v54  ;;  %v261_v57 = vld [vmem:[%s11895_s27 + $0x8c] sm:$0xf]  ;;  %v12043_v26 = vcombine.low %v253_v44, %v254_v45  ;;  %v12049_v28 = vcombine.low %v255_v48, %v256_v49  ;;  %v12051_v29 = vcombine.low %v257_v50, %v258_v52  ;;  %v12098_v50 = vld [vmem:[%s11895_s27] sm:$0xff]  }
  0x22   : > { %16348 = vst [vmem:[#allocation21_spill] sm:$0xff] %v11980_v53  ;;  %v262_v58 = vld [vmem:[%s11895_s27 + $0x90] sm:$0xf]  ;;  %v263_v59 = vld [vmem:[%s11895_s27 + $0x94] sm:$0xf]  ;;  %v11991_v60 = vcombine.low %v260_v55, %v261_v57  ;;  %v12057_v30 = vcombine.low %v259_v54, %v260_v55  ;;  %16357 = vst [vmem:[#allocation30_spill] sm:$0xff] %v12098_v50 }
  0x23   : > { %16349 = vst [vmem:[#allocation22_spill] sm:$0xff] %v11984_v56  ;;  %v264_v61 = vld [vmem:[%s11895_s27 + $0x98] sm:$0xf]  ;;  %v11994_v62 = vcombine.low %v262_v58, %v263_v59  ;;  %v265_v63 = vld [vmem:[%s11895_s27 + $0x9c] sm:$0xf]  ;;  %v12059_v32 = vcombine.low %v261_v57, %v262_v58  ;;  %v1057_v55 = vsel %vm477_vm0, %v11911_v10, 0 }
  0x24   : > { %16350 = vst [vmem:[#allocation23_spill] sm:$0xff] %v11991_v60  ;;  %v266_v0 = vld [vmem:[%s11895_s27 + $0xa0] sm:$0xf]  ;;  %v12000_v1 = vcombine.low %v264_v61, %v265_v63  ;;  %v267_v2 = vld [vmem:[%s11895_s27 + $0xa4] sm:$0xf]  ;;  %v12065_v34 = vcombine.low %v263_v59, %v264_v61  ;;  %v1338_v59 = vshll.u32 %v12098_v50, 16 }
  0x25   : > { %16351 = vst [vmem:[#allocation24_spill] sm:$0xff] %v11994_v62  ;;  %v268_v4 = vld [vmem:[%s11895_s27 + $0xa8] sm:$0xf]  ;;  %v269_v5 = vld [vmem:[%s11895_s27 + $0xac] sm:$0xf]  ;;  %v12005_v7 = vcombine.low %v266_v0, %v267_v2  ;;  %v12067_v35 = vcombine.low %v265_v63, %v266_v0  ;;  %v1336_v0 = vshrl.u32 %v12098_v50, 16 }
  0x26   : > { %16352 = vst [vmem:[#allocation25_spill] sm:$0xff] %v12000_v1  ;;  %v270_v8 = vld [vmem:[%s11895_s27 + $0xb0] sm:$0xf]  ;;  %v12008_v9 = vcombine.low %v268_v4, %v269_v5  ;;  %v271_v12 = vld [vmem:[%s11895_s27 + $0xb4] sm:$0xf]  ;;  %v12073_v37 = vcombine.low %v267_v2, %v268_v4  ;;  %v1340_v2 = vrot.slane %v1338_v59, 1 }
  0x27   : > { %16353 = vst [vmem:[#allocation26_spill] sm:$0xff] %v12005_v7  ;;  %v272_v14 = vld [vmem:[%s11895_s27 + $0xb8] sm:$0xf]  ;;  %v12012_v15 = vcombine.low %v270_v8, %v271_v12  ;;  %v273_v19 = vld [vmem:[%s11895_s27 + $0xbc] sm:$0xf]  ;;  %9954 = vmatmul.mubr.msk.bf16.gmra.mrb[8].mxu0 %vm404_vm1, %v12015_v20  ;;  %v12075_v38 = vcombine.low %v269_v5, %v270_v8 }
  0x28   : > { %16354 = vst [vmem:[#allocation27_spill] sm:$0xff] %v12008_v9  ;;  %v12017_v40 = vcombine.low %v272_v14, %v273_v19  ;;  %9957 = vmatprep.mubr.msk.bf16.mxu0 %vm404_vm1, %v12019_v46  ;;  %v12082_v39 = vld [vmem:[%s11895_s27 + $0xc0] sm:$0xf]  ;;  %v12084_v42 = vcombine.low %v271_v12, %v272_v14  ;;  %v275_v45 = vld [vmem:[%s11895_s27 + $0xc4] sm:$0xf]  ;;  %v1341_v5 = vor.u32 %v1340_v2, %v1336_v0  ;;  %v12224_v12 = vld [vmem:[%s11895_s27 + $0xd0] sm:$0xff]  }
  0x29   : > { %16355 = vst [vmem:[#allocation28_spill] sm:$0xff] %v12012_v15  ;;  %v12087_v44 = vcombine.low %v273_v19, %v12082_v39  ;;  %v276_v48 = vld [vmem:[%s11895_s27 + $0xc8] sm:$0xf]  ;;  %v9061_v57 = vld [vmem:[%s16029_s1 + $0x2] sm:$0x3]  ;;  %v12212_v61 = vcombine.low %v12082_v39, %v275_v45  ;;  %v1349_v14 = vshll.u32 %v11920_v16, 16 }
  0x2a   : > { %16356 = vst [vmem:[#allocation29_spill] sm:$0xff] %v12017_v40  ;;  %v12095_v49 = vcombine.low %v275_v45, %v276_v48  ;;  %v228_v52 = vld [vmem:[%s11895_s27 + $0x8] sm:$0xf]  ;;  %v12208_v58 = vld [vmem:[%s11895_s27 + $0xcc] sm:$0xf]  ;;  %v1363_v0 = vshll.u32 %v11926_v18, 16 }
  0x2b   : > { %v12106_v54 = vcombine.low %v228_v52, %v11898_v3  ;;  %v1581_v3 = vsel %vm477_vm0, %v9061_v57, 0  ;;  %v9087_v10 = vld [vmem:[%s16029_s1 + $0x8] sm:$0x3]  ;;  %v12215_v63 = vcombine.low %v276_v48, %v12208_v58  ;;  %v1353_v48 = vshrl.u32 %v11920_v16, 16 }
  0x2c   : > { %v1356_v52 = vshll.u32 %v11916_v13, 16 }
  0x2d   : > { %16358 = vst [vmem:[#allocation31_spill] sm:$0xff] %v12106_v54  ;;  %v1342_v4 = vshll.u32 %v12106_v54, 16  ;;  %v1346_v19 = vshrl.u32 %v12106_v54, 16 }
  0x2e   : > { %v1358_v59 = vrot.slane %v1356_v52, 1 }
  0x2f   : > { %9958 = vmatmul.mubr.msk.bf16.gmra.mrb[12].mxu0 %vm404_vm1, %v12025_v17  ;;  %v1344_v8 = vrot.slane %v1342_v4, 1  ;;  %v1360_v4 = vshrl.u32 %v11916_v13, 16 }
  0x30   : > { %9961 = vmatprep.mubr.msk.bf16.mxu0 %vm404_vm1, %v12027_v11 }
  0x31   : > { %v1345_v45 = vsel %vm16070_vm2, %v1341_v5, %v1344_v8  ;;  %v2104_v5 = vsel %vm477_vm0, %v9087_v10, 0 }
  0x37   : > { %9962 = vmatmul.mubr.msk.bf16.gmra.mrb[16].mxu0 %vm404_vm1, %v12033_v21 }
  0x38   : > { %9965 = vmatprep.mubr.msk.bf16.mxu0 %vm404_vm1, %v12035_v23 }
  0x3f   : > { %9966 = vmatmul.mubr.msk.bf16.gmra.mrb[20].mxu0 %vm404_vm1, %v12041_v25 }
  0x40   : > { %9969 = vmatprep.mubr.msk.bf16.mxu0 %vm404_vm1, %v12043_v26 }
  0x47   : > { %9970 = vmatmul.mubr.msk.bf16.gmra.mrb[24].mxu0 %vm404_vm1, %v12049_v28 }
  0x48   : > { %9973 = vmatprep.mubr.msk.bf16.mxu0 %vm404_vm1, %v12051_v29 }
  0x4f   : > { %9974 = vmatmul.mubr.msk.bf16.gmra.mrb[28].mxu0 %vm404_vm1, %v12057_v30 }
  0x50   : > { %9977 = vmatprep.mubr.msk.bf16.mxu0 %vm404_vm1, %v12059_v32 }
  0x57   : > { %9978 = vmatmul.mubr.msk.bf16.gmra.mrb[32].mxu0 %vm404_vm1, %v12065_v34 }
  0x58   : > { %9981 = vmatprep.mubr.msk.bf16.mxu0 %vm404_vm1, %v12067_v35 }
  0x5f   : > { %9982 = vmatmul.mubr.msk.bf16.gmra.mrb[36].mxu0 %vm404_vm1, %v12073_v37 }
  0x60   : > { %9985 = vmatprep.mubr.msk.bf16.mxu0 %vm404_vm1, %v12075_v38 }
  0x67   : > { %9986 = vmatmul.mubr.msk.bf16.gmra.mrb[40].mxu0 %vm404_vm1, %v12084_v42 }
  0x68   : > { %9989 = vmatprep.mubr.msk.bf16.mxu0 %vm404_vm1, %v12087_v44 }
  0x6f   : > { %9990 = vmatmul.mubr.msk.bf16.gmra.mrb[44].mxu0 %vm404_vm1, %v12095_v49 }
  0x70   : > { %9995 = vmatprep.mubr.msk.bf16.mxu0 %vm404_vm1, %v12098_v50  ;;  %v1370_v50 = vshll.u32 %v11933_v22, 16 }
  0x77   : > { %9996 = vmatmul.mubr.msk.bf16.vlgmr.msra.gmra.mrb[0].mxu0 %vm404_vm1, %v12106_v54  ;;  %v1367_v54 = vshrl.u32 %v11926_v18, 16 }
  0x78   : > { %10044 = vmatpush3.bf16.msra.mxu0 %v1057_v55  ;;  %9999 = vmatprep.mubr.msk.bf16.mxu0 %vm404_vm1, %v11920_v16  ;;  %v1351_v55 = vrot.slane %v1349_v14, 1  ;;  %v1365_v14 = vrot.slane %v1363_v0, 1 }
  0x79   : > { %11632 = vmatprep.subr.msk.bf16.mxu0 %vm477_vm0, %v9061_v57  ;;  %v1348_v57 = vor.u32 %v1346_v19, %v1344_v8  ;;  %v12244_v8 = vld [vmem:[%s16029_s1 + $0xe] sm:$0x3]  ;;  %v1362_v19 = vor.u32 %v1360_v4, %v1358_v59 }
  0x7b   : > { %v1352_v2 = vsel %vm16070_vm2, %v1348_v57, %v1351_v55  ;;  %v12252_v52 = vsel %vm16070_vm2, %v1362_v19, %v1365_v14  ;;  %v1395_v19 = vshrl.u32 %v11947_v31, 16 }
  0x7f   : > { %10000 = vmatmul.mubr.msk.bf16.gmra.mrb[4].mxu0 %vm404_vm1, %v11916_v13 }
  0x80   : > { %10003 = vmatprep.mubr.msk.bf16.mxu0 %vm404_vm1, %v11926_v18 }
  0x87   : > { %10004 = vmatmul.mubr.msk.bf16.gmra.mrb[8].mxu0 %vm404_vm1, %v11933_v22 }
  0x88   : > { %10007 = vmatprep.mubr.msk.bf16.mxu0 %vm404_vm1, %v11936_v24 }
  0x8f   : > { %10008 = vmatmul.mubr.msk.bf16.gmra.mrb[12].mxu0 %vm404_vm1, %v11942_v27 }
  0x90   : > { %10011 = vmatprep.mubr.msk.bf16.mxu0 %vm404_vm1, %v11947_v31 }
  0x97   : > { %10012 = vmatmul.mubr.msk.bf16.gmra.mrb[16].mxu0 %vm404_vm1, %v11950_v33 }
  0x98   : > { %10015 = vmatprep.mubr.msk.bf16.mxu0 %vm404_vm1, %v11956_v36 }
  0x9f   : > { %10016 = vmatmul.mubr.msk.bf16.gmra.mrb[20].mxu0 %vm404_vm1, %v11963_v41 }
  0xa0   : > { %10019 = vmatprep.mubr.msk.bf16.mxu0 %vm404_vm1, %v11966_v43 }
  0xa7   : > { %10020 = vmatmul.mubr.msk.bf16.gmra.mrb[24].mxu0 %vm404_vm1, %v11972_v47 }
  0xa8   : > { %10023 = vmatprep.mubr.msk.bf16.mxu0 %vm404_vm1, %v11977_v51 }
  0xaf   : > { %10024 = vmatmul.mubr.msk.bf16.gmra.mrb[28].mxu0 %vm404_vm1, %v11980_v53 }
  0xb0   : > { %10027 = vmatprep.mubr.msk.bf16.mxu0 %vm404_vm1, %v11984_v56 }
  0xb7   : > { %10028 = vmatmul.mubr.msk.bf16.gmra.mrb[32].mxu0 %vm404_vm1, %v11991_v60 }
  0xb8   : > { %10031 = vmatprep.mubr.msk.bf16.mxu0 %vm404_vm1, %v11994_v62 }
  0xbf   : > { %10032 = vmatmul.mubr.msk.bf16.gmra.mrb[36].mxu0 %vm404_vm1, %v12000_v1 }
  0xc0   : > { %10035 = vmatprep.mubr.msk.bf16.mxu0 %vm404_vm1, %v12005_v7 }
  0xc7   : > { %10036 = vmatmul.mubr.msk.bf16.gmra.mrb[40].mxu0 %vm404_vm1, %v12008_v9 }
  0xc8   : > { %10039 = vmatprep.mubr.msk.bf16.mxu0 %vm404_vm1, %v12012_v15 }
  0xcf   : > { %10040 = vmatmul.mubr.msk.bf16.gmra.mrb[44].mxu0 %vm404_vm1, %v12017_v40 }
  0xd0   : > { %10045 = vmatprep.mubr.msk.bf16.mxu0 %vm404_vm1, %v11916_v13 }
  0xd7   : > { %10046 = vmatmul.mubr.msk.bf16.vlgmr.msra.gmra.mrb[0].mxu0 %vm404_vm1, %v11926_v18 }
  0xd8   : > { %10094 = vmatpush3.bf16.msra.mxu0 %v1581_v3  ;;  %10049 = vmatprep.mubr.msk.bf16.mxu0 %vm404_vm1, %v11933_v22  ;;  %v1355_v3 = vor.u32 %v1353_v48, %v1351_v55  ;;  %v1377_v48 = vshll.u32 %v11936_v24, 16  ;;  %v1374_v55 = vshrl.u32 %v11933_v22, 16  ;;  %v16362_v22 = vld [vmem:[#allocation15_spill] sm:$0xff] }
  0xd9   : > { %11633 = vmatprep.subr.msk.bf16.mxu0 %vm477_vm0, %v9087_v10  ;;  %v1372_v10 = vrot.slane %v1370_v50, 1  ;;  %v1879_v18 = vshll.u32 %v16362_v22, 16 }
  0xda   : > { %v1359_v16 = vsel %vm16070_vm2, %v1355_v3, %v1358_v59  ;;  %v1381_v3 = vshrl.u32 %v11936_v24, 16  ;;  %v1379_v50 = vrot.slane %v1377_v48, 1 }
  0xdc   : > { %v1383_v59 = vor.u32 %v1381_v3, %v1379_v50 }
  0xdf   : > { %10050 = vmatmul.mubr.msk.bf16.gmra.mrb[4].mxu0 %vm404_vm1, %v11936_v24 }
  0xe0   : > { %10053 = vmatprep.mubr.msk.bf16.mxu0 %vm404_vm1, %v11942_v27 }
  0xe7   : > { %10054 = vmatmul.mubr.msk.bf16.gmra.mrb[8].mxu0 %vm404_vm1, %v11947_v31 }
  0xe8   : > { %10057 = vmatprep.mubr.msk.bf16.mxu0 %vm404_vm1, %v11950_v33 }
  0xef   : > { %10058 = vmatmul.mubr.msk.bf16.gmra.mrb[12].mxu0 %vm404_vm1, %v11956_v36 }
  0xf0   : > { %10061 = vmatprep.mubr.msk.bf16.mxu0 %vm404_vm1, %v11963_v41 }
  0xf7   : > { %10062 = vmatmul.mubr.msk.bf16.gmra.mrb[16].mxu0 %vm404_vm1, %v11966_v43 }
  0xf8   : > { %10065 = vmatprep.mubr.msk.bf16.mxu0 %vm404_vm1, %v11972_v47 }
  0xff   : > { %10066 = vmatmul.mubr.msk.bf16.gmra.mrb[20].mxu0 %vm404_vm1, %v11977_v51 }
 0x100   : > { %10069 = vmatprep.mubr.msk.bf16.mxu0 %vm404_vm1, %v11980_v53 }
 0x107   : > { %10070 = vmatmul.mubr.msk.bf16.gmra.mrb[24].mxu0 %vm404_vm1, %v11984_v56 }
 0x108   : > { %10073 = vmatprep.mubr.msk.bf16.mxu0 %vm404_vm1, %v11991_v60 }
 0x10f   : > { %10074 = vmatmul.mubr.msk.bf16.gmra.mrb[28].mxu0 %vm404_vm1, %v11994_v62 }
 0x110   : > { %10077 = vmatprep.mubr.msk.bf16.mxu0 %vm404_vm1, %v12000_v1 }
 0x117   : > { %10078 = vmatmul.mubr.msk.bf16.gmra.mrb[32].mxu0 %vm404_vm1, %v12005_v7 }
 0x118   : > { %10081 = vmatprep.mubr.msk.bf16.mxu0 %vm404_vm1, %v12008_v9 }
 0x11f   : > { %10082 = vmatmul.mubr.msk.bf16.gmra.mrb[36].mxu0 %vm404_vm1, %v12012_v15 }
 0x120   : > { %10085 = vmatprep.mubr.msk.bf16.mxu0 %vm404_vm1, %v12017_v40 }
 0x127   : > { %10086 = vmatmul.mubr.msk.bf16.gmra.mrb[40].mxu0 %vm404_vm1, %v12212_v61 }
 0x128   : > { %10089 = vmatprep.mubr.msk.bf16.mxu0 %vm404_vm1, %v12215_v63 }
 0x12f   : > { %10090 = vmatmul.mubr.msk.bf16.gmra.mrb[44].mxu0 %vm404_vm1, %v12224_v12 }
 0x130   : > { %10095 = vmatprep.mubr.msk.bf16.mxu0 %vm404_vm1, %v1345_v45  ;;  %v1369_v45 = vor.u32 %v1367_v54, %v1365_v14  ;;  %v1376_v54 = vor.u32 %v1374_v55, %v1372_v10 }
 0x132   : > { %v12256_v57 = vsel %vm16070_vm2, %v1369_v45, %v1372_v10  ;;  %v12266_v4 = vsel %vm16070_vm2, %v1376_v54, %v1379_v50  ;;  %v1398_v45 = vshll.u32 %v11950_v33, 16  ;;  %v1402_v54 = vshrl.u32 %v11950_v33, 16 }
 0x133   : > { %v1423_v33 = vshrl.u32 %v11966_v43, 16 }
 0x134   : > { %v1400_v3 = vrot.slane %v1398_v45, 1 }
 0x137   : > { %10096 = vmatmul.mubr.msk.bf16.vlgmr.msra.gmra.mrb[0].mxu0 %vm404_vm1, %v1352_v2  ;;  %v1391_v2 = vshll.u32 %v11947_v31, 16  ;;  %v1409_v31 = vshrl.u32 %v11956_v36, 16 }
 0x138   : > { %10144 = vmatpush3.bf16.msra.mxu0 %v2104_v5  ;;  %10099 = vmatprep.mubr.msk.bf16.mxu0 %vm404_vm1, %v1359_v16  ;;  %v1384_v16 = vshll.u32 %v11942_v27, 16  ;;  %v1388_v5 = vshrl.u32 %v11942_v27, 16  ;;  %v16360_v27 = vld [vmem:[#allocation4_spill] sm:$0xff] }
 0x139   : > { %11634 = vmatprep.subr.msk.bf16.mxu0 %vm477_vm0, %v12244_v8  ;;  %v1393_v10 = vrot.slane %v1391_v2, 1  ;;  %v1412_v2 = vshll.u32 %v11963_v41, 16 }
 0x13a   : > { %v1386_v0 = vrot.slane %v1384_v16, 1  ;;  %v1405_v16 = vshll.u32 %v11956_v36, 16 }
 0x13b   : > { %v1397_v55 = vor.u32 %v1395_v19, %v1393_v10  ;;  %v1414_v45 = vrot.slane %v1412_v2, 1 }
 0x13c   : > { %v12270_v14 = vsel %vm16070_vm2, %v1383_v59, %v1386_v0  ;;  %v1390_v48 = vor.u32 %v1388_v5, %v1386_v0  ;;  %v1407_v0 = vrot.slane %v1405_v16, 1  ;;  %v1404_v5 = vor.u32 %v1402_v54, %v1400_v3 }
 0x13d   : > { %v12284_v59 = vsel %vm16070_vm2, %v1397_v55, %v1400_v3  ;;  %v1416_v55 = vshrl.u32 %v11963_v41, 16  ;;  %v1426_v16 = vshll.u32 %v11972_v47, 16  ;;  %v1437_v41 = vshrl.u32 %v11977_v51, 16 }
 0x13e   : > { %v12280_v50 = vsel %vm16070_vm2, %v1390_v48, %v1393_v10  ;;  %v1411_v19 = vor.u32 %v1409_v31, %v1407_v0  ;;  %v1419_v10 = vshll.u32 %v11966_v43, 16  ;;  %v12294_v48 = vsel %vm16070_vm2, %v1404_v5, %v1407_v0 }
 0x13f   : > { %10100 = vmatmul.mubr.msk.bf16.gmra.mrb[4].mxu0 %vm404_vm1, %v12252_v52  ;;  %v1418_v31 = vor.u32 %v1416_v55, %v1414_v45  ;;  %v1428_v2 = vrot.slane %v1426_v16, 1  ;;  %v1433_v0 = vshll.u32 %v11977_v51, 16 }
 0x140   : > { %10103 = vmatprep.mubr.msk.bf16.mxu0 %vm404_vm1, %v12256_v57  ;;  %v12298_v36 = vsel %vm16070_vm2, %v1411_v19, %v1414_v45  ;;  %v1421_v3 = vrot.slane %v1419_v10, 1  ;;  %v1430_v19 = vshrl.u32 %v11972_v47, 16  ;;  %v1440_v10 = vshll.u32 %v11980_v53, 16 }
 0x141   : > { %v1435_v45 = vrot.slane %v1433_v0, 1  ;;  %v1451_v47 = vshrl.u32 %v11984_v56, 16  ;;  %v1454_v0 = vshll.u32 %v11991_v60, 16 }
 0x142   : > { %v1425_v54 = vor.u32 %v1423_v33, %v1421_v3  ;;  %v12308_v5 = vsel %vm16070_vm2, %v1418_v31, %v1421_v3  ;;  %v1432_v33 = vor.u32 %v1430_v19, %v1428_v2  ;;  %v1442_v16 = vrot.slane %v1440_v10, 1 }
 0x143   : > { %v1439_v55 = vor.u32 %v1437_v41, %v1435_v45  ;;  %v1447_v3 = vshll.u32 %v11984_v56, 16  ;;  %v1456_v10 = vrot.slane %v1454_v0, 1 }
 0x144   : > { %v12312_v43 = vsel %vm16070_vm2, %v1425_v54, %v1428_v2  ;;  %v12322_v31 = vsel %vm16070_vm2, %v1432_v33, %v1435_v45  ;;  %v1444_v54 = vshrl.u32 %v11980_v53, 16  ;;  %v1461_v45 = vshll.u32 %v11994_v62, 16 }
 0x145   : > { %v12326_v51 = vsel %vm16070_vm2, %v1439_v55, %v1442_v16  ;;  %v1449_v2 = vrot.slane %v1447_v3, 1  ;;  %v1458_v55 = vshrl.u32 %v11991_v60, 16  ;;  %v1465_v53 = vshrl.u32 %v11994_v62, 16 }
 0x146   : > { %v1446_v41 = vor.u32 %v1444_v54, %v1442_v16  ;;  %v1468_v3 = vshll.u32 %v12000_v1, 16  ;;  %v1463_v16 = vrot.slane %v1461_v45, 1  ;;  %v1479_v60 = vshrl.u32 %v12005_v7, 16 }
 0x147   : > { %10104 = vmatmul.mubr.msk.bf16.gmra.mrb[8].mxu0 %vm404_vm1, %v12266_v4  ;;  %v1453_v19 = vor.u32 %v1451_v47, %v1449_v2  ;;  %v1460_v47 = vor.u32 %v1458_v55, %v1456_v10  ;;  %v1482_v45 = vshll.u32 %v12008_v9, 16 }
 0x148   : > { %10107 = vmatprep.mubr.msk.bf16.mxu0 %vm404_vm1, %v12270_v14  ;;  %v12336_v33 = vsel %vm16070_vm2, %v1446_v41, %v1449_v2  ;;  %v1467_v54 = vor.u32 %v1465_v53, %v1463_v16  ;;  %v1470_v0 = vrot.slane %v1468_v3, 1  ;;  %v1475_v2 = vshll.u32 %v12005_v7, 16 }
 0x149   : > { %v12340_v56 = vsel %vm16070_vm2, %v1453_v19, %v1456_v10  ;;  %v12350_v41 = vsel %vm16070_vm2, %v1460_v47, %v1463_v16  ;;  %v1472_v19 = vshrl.u32 %v12000_v1, 16  ;;  %v1484_v3 = vrot.slane %v1482_v45, 1 }
 0x14a   : > { %v12354_v62 = vsel %vm16070_vm2, %v1467_v54, %v1470_v0  ;;  %v1477_v10 = vrot.slane %v1475_v2, 1  ;;  %v1489_v16 = vshll.u32 %v12012_v15, 16  ;;  %v1486_v54 = vshrl.u32 %v12008_v9, 16 }
 0x14b   : > { %v1474_v53 = vor.u32 %v1472_v19, %v1470_v0  ;;  %v1493_v1 = vshrl.u32 %v12012_v15, 16  ;;  %v1496_v2 = vshll.u32 %v12017_v40, 16  ;;  %v12378_v19 = vcombine.low %v12082_v39, %v12082_v39 }
 0x14c   : > { %v1481_v55 = vor.u32 %v1479_v60, %v1477_v10  ;;  %v1491_v0 = vrot.slane %v1489_v16, 1  ;;  %v1488_v60 = vor.u32 %v1486_v54, %v1484_v3  ;;  %v1500_v15 = vshrl.u32 %v12017_v40, 16 }
 0x14d   : > { %v12364_v47 = vsel %vm16070_vm2, %v1474_v53, %v1477_v10  ;;  %16359 = vst [vmem:[#allocation32_spill] sm:$0xff] %v12378_v19  ;;  %v1498_v10 = vrot.slane %v1496_v2, 1  ;;  %v1861_v53 = vshll.u32 %v11903_v6, 16  ;;  %v1504_v9 = vshll.u32 %v12378_v19, 16  ;;  %v16361_v19 = vld [vmem:[#allocation7_spill] sm:$0xff] }
 0x14e   : > { %v12368_v7 = vsel %vm16070_vm2, %v1481_v55, %v1484_v3  ;;  %v1495_v45 = vor.u32 %v1493_v1, %v1491_v0  ;;  %v12382_v55 = vsel %vm16070_vm2, %v1488_v60, %v1491_v0  ;;  %v1859_v3 = vshrl.u32 %v11903_v6, 16 }
 0x14f   : > { %10108 = vmatmul.mubr.msk.bf16.gmra.mrb[12].mxu0 %vm404_vm1, %v12280_v50  ;;  %v1863_v54 = vrot.slane %v1861_v53, 1  ;;  %v1865_v39 = vshll.u32 %v16360_v27, 16  ;;  %v12395_v1 = vor.u32 %v1500_v15, %v1498_v10  ;;  %v1506_v2 = vrot.slane %v1504_v9, 1 }
 0x150   : > { %10111 = vmatprep.mubr.msk.bf16.mxu0 %vm404_vm1, %v12284_v59  ;;  %v12387_v16 = vsel %vm16070_vm2, %v1495_v45, %v1498_v10  ;;  %v1872_v40 = vshll.u32 %v16361_v19, 16  ;;  %v1869_v53 = vshrl.u32 %v16360_v27, 16  ;;  %v1876_v24 = vshrl.u32 %v16361_v19, 16 }
 0x151   : > { %v1864_v0 = vor.u32 %v1863_v54, %v1859_v3  ;;  %v1867_v60 = vrot.slane %v1865_v39, 1  ;;  %v1507_v45 = vsel %vm16070_vm2, %v12395_v1, %v1506_v2  ;;  %v1881_v3 = vrot.slane %v1879_v18, 1  ;;  %v16363_v54 = vld [vmem:[#allocation18_spill] sm:$0xff] }
 0x152   : > { %v1874_v15 = vrot.slane %v1872_v40, 1  ;;  %v1886_v39 = vshll.u32 %v16363_v54, 16  ;;  %v1883_v27 = vshrl.u32 %v16362_v22, 16  ;;  %v1890_v13 = vshrl.u32 %v16363_v54, 16 }
 0x153   : > { %v1868_v6 = vsel %vm16070_vm2, %v1864_v0, %v1867_v60  ;;  %v1871_v10 = vor.u32 %v1869_v53, %v1867_v60  ;;  %v2423_v0 = vsel %vm477_vm0, %v12244_v8, 0  ;;  %v1893_v40 = vshll.u32 %v12015_v20, 16 }
 0x154   : > { %v1878_v9 = vor.u32 %v1876_v24, %v1874_v15  ;;  %v1888_v18 = vrot.slane %v1886_v39, 1  ;;  %v1885_v24 = vor.u32 %v1883_v27, %v1881_v3  ;;  %v1907_v39 = vshll.u32 %v12025_v17, 16 }
 0x155   : > { %v1875_v2 = vsel %vm16070_vm2, %v1871_v10, %v1874_v15  ;;  %v1895_v8 = vrot.slane %v1893_v40, 1  ;;  %v1897_v15 = vshrl.u32 %v12015_v20, 16  ;;  %v1911_v40 = vshrl.u32 %v12025_v17, 16 }
 0x156   : > { %v1882_v19 = vsel %vm16070_vm2, %v1878_v9, %v1881_v3  ;;  %v1892_v60 = vor.u32 %v1890_v13, %v1888_v18  ;;  %v1889_v53 = vsel %vm16070_vm2, %v1885_v24, %v1888_v18  ;;  %v1904_v9 = vshrl.u32 %v12019_v46, 16 }
 0x157   : > { %10112 = vmatmul.mubr.msk.bf16.gmra.mrb[16].mxu0 %vm404_vm1, %v12294_v48  ;;  %v1899_v13 = vor.u32 %v1897_v15, %v1895_v8  ;;  %v1909_v3 = vrot.slane %v1907_v39, 1  ;;  %v1918_v24 = vshrl.u32 %v12027_v11, 16  ;;  %v1925_v39 = vshrl.u32 %v12033_v21, 16 }
 0x158   : > { %10115 = vmatprep.mubr.msk.bf16.mxu0 %vm404_vm1, %v12298_v36  ;;  %v1896_v10 = vsel %vm16070_vm2, %v1892_v60, %v1895_v8  ;;  %v1921_v60 = vshll.u32 %v12033_v21, 16 }
 0x159   : > { %v1913_v8 = vor.u32 %v1911_v40, %v1909_v3 }
 0x15a   : > { %v1923_v15 = vrot.slane %v1921_v60, 1  ;;  %v1939_v60 = vshrl.u32 %v12041_v25, 16 }
 0x15f   : > { %10116 = vmatmul.mubr.msk.bf16.gmra.mrb[20].mxu0 %vm404_vm1, %v12308_v5 }
 0x160   : > { %10119 = vmatprep.mubr.msk.bf16.mxu0 %vm404_vm1, %v12312_v43 }
 0x167   : > { %10120 = vmatmul.mubr.msk.bf16.gmra.mrb[24].mxu0 %vm404_vm1, %v12322_v31 }
 0x168   : > { %10123 = vmatprep.mubr.msk.bf16.mxu0 %vm404_vm1, %v12326_v51 }
 0x16f   : > { %10124 = vmatmul.mubr.msk.bf16.gmra.mrb[28].mxu0 %vm404_vm1, %v12336_v33 }
 0x170   : > { %10127 = vmatprep.mubr.msk.bf16.mxu0 %vm404_vm1, %v12340_v56 }
 0x177   : > { %10128 = vmatmul.mubr.msk.bf16.gmra.mrb[32].mxu0 %vm404_vm1, %v12350_v41 }
 0x178   : > { %10131 = vmatprep.mubr.msk.bf16.mxu0 %vm404_vm1, %v12354_v62 }
 0x17f   : > { %10132 = vmatmul.mubr.msk.bf16.gmra.mrb[36].mxu0 %vm404_vm1, %v12364_v47 }
 0x180   : > { %10135 = vmatprep.mubr.msk.bf16.mxu0 %vm404_vm1, %v12368_v7 }
 0x187   : > { %10136 = vmatmul.mubr.msk.bf16.gmra.mrb[40].mxu0 %vm404_vm1, %v12382_v55 }
 0x188   : > { %10139 = vmatprep.mubr.msk.bf16.mxu0 %vm404_vm1, %v12387_v16 }
 0x18f   : > { %10140 = vmatmul.mubr.msk.bf16.gmra.mrb[44].mxu0 %vm404_vm1, %v1507_v45  ;;  %v1900_v45 = vshll.u32 %v12019_v46, 16 }
 0x190   : > { %10145 = vmatprep.mubr.msk.bf16.mxu0 %vm404_vm1, %v1868_v6  ;;  %v12417_v6 = vld [vmem:[%s16029_s1 + $0x4] sm:$0x3] }
 0x191   : > { %v1902_v27 = vrot.slane %v1900_v45, 1 }
 0x197   : > { %10146 = vmatmul.mubr.msk.bf16.vlgmr.msra.gmra.mrb[0].mxu0 %vm404_vm1, %v1875_v2  ;;  %v1914_v2 = vshll.u32 %v12027_v11, 16 }
 0x198   : > { %10194 = vmatpush3.bf16.msra.mxu0 %v2423_v0  ;;  %10149 = vmatprep.mubr.msk.bf16.mxu0 %vm404_vm1, %v1882_v19  ;;  %v1906_v19 = vor.u32 %v1904_v9, %v1902_v27  ;;  %v1903_v0 = vsel %vm16070_vm2, %v1899_v13, %v1902_v27  ;;  %v1932_v13 = vshrl.u32 %v12035_v23, 16 }
 0x199   : > { %11635 = vmatprep.subr.msk.bf16.mxu0 %vm477_vm0, %v12417_v6  ;;  %v1916_v45 = vrot.slane %v1914_v2, 1 }
 0x19a   : > { %v1910_v18 = vsel %vm16070_vm2, %v1906_v19, %v1909_v3  ;;  %v1935_v19 = vshll.u32 %v12041_v25, 16  ;;  %v1927_v3 = vor.u32 %v1925_v39, %v1923_v15 }
 0x19b   : > { %v1917_v9 = vsel %vm16070_vm2, %v1913_v8, %v1916_v45  ;;  %v1946_v8 = vshrl.u32 %v12043_v26, 16 }
 0x19c   : > { %v1937_v40 = vrot.slane %v1935_v19, 1  ;;  %v1953_v19 = vshrl.u32 %v12049_v28, 16 }
 0x19f   : > { %10150 = vmatmul.mubr.msk.bf16.gmra.mrb[4].mxu0 %vm404_vm1, %v1889_v53  ;;  %v1920_v53 = vor.u32 %v1918_v24, %v1916_v45 }
 0x1a0   : > { %10153 = vmatprep.mubr.msk.bf16.mxu0 %vm404_vm1, %v1896_v10  ;;  %v1928_v10 = vshll.u32 %v12035_v23, 16 }
 0x1a1   : > { %v1924_v27 = vsel %vm16070_vm2, %v1920_v53, %v1923_v15  ;;  %v1949_v53 = vshll.u32 %v12049_v28, 16  ;;  %v1941_v15 = vor.u32 %v1939_v60, %v1937_v40 }
 0x1a2   : > { %v1930_v2 = vrot.slane %v1928_v10, 1 }
 0x1a3   : > { %v1951_v39 = vrot.slane %v1949_v53, 1  ;;  %v1967_v53 = vshrl.u32 %v12057_v30, 16 }
 0x1a4   : > { %v1931_v24 = vsel %vm16070_vm2, %v1927_v3, %v1930_v2  ;;  %v1960_v3 = vshrl.u32 %v12051_v29, 16 }
 0x1a7   : > { %10154 = vmatmul.mubr.msk.bf16.gmra.mrb[8].mxu0 %vm404_vm1, %v1903_v0  ;;  %v1934_v0 = vor.u32 %v1932_v13, %v1930_v2 }
 0x1a8   : > { %10157 = vmatprep.mubr.msk.bf16.mxu0 %vm404_vm1, %v1910_v18  ;;  %v1942_v18 = vshll.u32 %v12043_v26, 16 }
 0x1a9   : > { %v1938_v45 = vsel %vm16070_vm2, %v1934_v0, %v1937_v40  ;;  %v1963_v0 = vshll.u32 %v12057_v30, 16  ;;  %v1955_v40 = vor.u32 %v1953_v19, %v1951_v39 }
 0x1aa   : > { %v1944_v10 = vrot.slane %v1942_v18, 1 }
 0x1ab   : > { %v1965_v60 = vrot.slane %v1963_v0, 1  ;;  %v1981_v0 = vshrl.u32 %v12065_v34, 16 }
 0x1ac   : > { %v1945_v13 = vsel %vm16070_vm2, %v1941_v15, %v1944_v10  ;;  %v1974_v15 = vshrl.u32 %v12059_v32, 16 }
 0x1af   : > { %10158 = vmatmul.mubr.msk.bf16.gmra.mrb[12].mxu0 %vm404_vm1, %v1917_v9  ;;  %v1948_v9 = vor.u32 %v1946_v8, %v1944_v10 }
 0x1b0   : > { %10161 = vmatprep.mubr.msk.bf16.mxu0 %vm404_vm1, %v1924_v27  ;;  %v1956_v27 = vshll.u32 %v12051_v29, 16 }
 0x1b1   : > { %v1952_v2 = vsel %vm16070_vm2, %v1948_v9, %v1951_v39  ;;  %v1977_v9 = vshll.u32 %v12065_v34, 16  ;;  %v1969_v39 = vor.u32 %v1967_v53, %v1965_v60 }
 0x1b2   : > { %v1958_v18 = vrot.slane %v1956_v27, 1 }
 0x1b3   : > { %v1979_v19 = vrot.slane %v1977_v9, 1  ;;  %v1995_v9 = vshrl.u32 %v12073_v37, 16 }
 0x1b4   : > { %v1959_v8 = vsel %vm16070_vm2, %v1955_v40, %v1958_v18  ;;  %v1988_v40 = vshrl.u32 %v12067_v35, 16 }
 0x1b7   : > { %10162 = vmatmul.mubr.msk.bf16.gmra.mrb[16].mxu0 %vm404_vm1, %v1931_v24  ;;  %v1962_v24 = vor.u32 %v1960_v3, %v1958_v18 }
 0x1b8   : > { %10165 = vmatprep.mubr.msk.bf16.mxu0 %vm404_vm1, %v1938_v45  ;;  %v1970_v45 = vshll.u32 %v12059_v32, 16 }
 0x1b9   : > { %v1966_v10 = vsel %vm16070_vm2, %v1962_v24, %v1965_v60  ;;  %v1991_v24 = vshll.u32 %v12073_v37, 16  ;;  %v1983_v60 = vor.u32 %v1981_v0, %v1979_v19 }
 0x1ba   : > { %v1972_v27 = vrot.slane %v1970_v45, 1 }
 0x1bb   : > { %v1993_v53 = vrot.slane %v1991_v24, 1  ;;  %v2009_v24 = vshrl.u32 %v12084_v42, 16 }
 0x1bc   : > { %v1973_v3 = vsel %vm16070_vm2, %v1969_v39, %v1972_v27  ;;  %v2002_v39 = vshrl.u32 %v12075_v38, 16 }
 0x1bf   : > { %10166 = vmatmul.mubr.msk.bf16.gmra.mrb[20].mxu0 %vm404_vm1, %v1945_v13  ;;  %v1976_v13 = vor.u32 %v1974_v15, %v1972_v27 }
 0x1c0   : > { %10169 = vmatprep.mubr.msk.bf16.mxu0 %vm404_vm1, %v1952_v2  ;;  %v1984_v2 = vshll.u32 %v12067_v35, 16 }
 0x1c1   : > { %v1980_v18 = vsel %vm16070_vm2, %v1976_v13, %v1979_v19  ;;  %v2005_v13 = vshll.u32 %v12084_v42, 16  ;;  %v1997_v19 = vor.u32 %v1995_v9, %v1993_v53 }
 0x1c2   : > { %v1986_v45 = vrot.slane %v1984_v2, 1 }
 0x1c3   : > { %v2007_v0 = vrot.slane %v2005_v13, 1  ;;  %v2023_v13 = vshrl.u32 %v12095_v49, 16 }
 0x1c4   : > { %v1987_v15 = vsel %vm16070_vm2, %v1983_v60, %v1986_v45  ;;  %v2016_v60 = vshrl.u32 %v12087_v44, 16 }
 0x1c7   : > { %10170 = vmatmul.mubr.msk.bf16.gmra.mrb[24].mxu0 %vm404_vm1, %v1959_v8  ;;  %v1990_v8 = vor.u32 %v1988_v40, %v1986_v45 }
 0x1c8   : > { %10173 = vmatprep.mubr.msk.bf16.mxu0 %vm404_vm1, %v1966_v10  ;;  %v1998_v10 = vshll.u32 %v12075_v38, 16 }
 0x1c9   : > { %v1994_v27 = vsel %vm16070_vm2, %v1990_v8, %v1993_v53  ;;  %v2019_v8 = vshll.u32 %v12095_v49, 16  ;;  %v12496_v53 = vcombine.low %v12208_v58, %v12208_v58 }
 0x1ca   : > { %v2000_v2 = vrot.slane %v1998_v10, 1 }
 0x1cc   : > { %v2001_v40 = vsel %vm16070_vm2, %v1997_v19, %v2000_v2 }
 0x1cf   : > { %10174 = vmatmul.mubr.msk.bf16.gmra.mrb[28].mxu0 %vm404_vm1, %v1973_v3  ;;  %v2004_v3 = vor.u32 %v2002_v39, %v2000_v2  ;;  %v2027_v2 = vshll.u32 %v12496_v53, 16 }
 0x1d0   : > { %10177 = vmatprep.mubr.msk.bf16.mxu0 %vm404_vm1, %v1980_v18  ;;  %v2012_v18 = vshll.u32 %v12087_v44, 16 }
 0x1d1   : > { %v2008_v45 = vsel %vm16070_vm2, %v2004_v3, %v2007_v0  ;;  %v2029_v58 = vrot.slane %v2027_v2, 1 }
 0x1d2   : > { %v2014_v10 = vrot.slane %v2012_v18, 1 }
 0x1d4   : > { %v2018_v9 = vor.u32 %v2016_v60, %v2014_v10 }
 0x1d7   : > { %10178 = vmatmul.mubr.msk.bf16.gmra.mrb[32].mxu0 %vm404_vm1, %v1987_v15  ;;  %v2011_v15 = vor.u32 %v2009_v24, %v2007_v0  ;;  %v2823_v0 = vsel %vm477_vm0, %v12417_v6, 0 }
 0x1d8   : > { %10181 = vmatprep.mubr.msk.bf16.mxu0 %vm404_vm1, %v1994_v27  ;;  %v2021_v27 = vrot.slane %v2019_v8, 1  ;;  %v16367_v8 = vld [vmem:[#allocation5_spill] sm:$0xff] }
 0x1d9   : > { %v2015_v39 = vsel %vm16070_vm2, %v2011_v15, %v2014_v10  ;;  %v2706_v10 = vrot.slane %v16367_v8, 1 }
 0x1da   : > { %v2022_v19 = vsel %vm16070_vm2, %v2018_v9, %v2021_v27  ;;  %v2025_v3 = vor.u32 %v2023_v13, %v2021_v27  ;;  %v16368_v13 = vld [vmem:[#allocation8_spill] sm:$0xff] }
 0x1db   : > { %v2708_v2 = vrot.slane %v16368_v13, 1  ;;  %v16381_v13 = vld [vmem:[#allocation23_spill] sm:$0xff] }
 0x1dc   : > { %v2030_v18 = vsel %vm16070_vm2, %v2025_v3, %v2029_v58 }
 0x1dd   : > { %v12593_v58 = vsel %vm2700_vm3, %v2706_v10, %v2708_v2 }
 0x1df   : > { %10182 = vmatmul.mubr.msk.bf16.gmra.mrb[36].mxu0 %vm404_vm1, %v2001_v40  ;;  %v9164_v40 = vld [vmem:[%s16029_s1 + $0xa] sm:$0x3] }
 0x1e0   : > { %10185 = vmatprep.mubr.msk.bf16.mxu0 %vm404_vm1, %v2008_v45  ;;  %v3222_v9 = vsel %vm477_vm0, %v9164_v40, 0 }
 0x1e7   : > { %10186 = vmatmul.mubr.msk.bf16.gmra.mrb[40].mxu0 %vm404_vm1, %v2015_v39  ;;  %v12584_v39 = vld [vmem:[%s16029_s1 + $0x10] sm:$0x3] }
 0x1e8   : > { %10189 = vmatprep.mubr.msk.bf16.mxu0 %vm404_vm1, %v2022_v19  ;;  %v16369_v19 = vld [vmem:[#allocation9_spill] sm:$0xff] }
 0x1e9   : > { %v2710_v3 = vrot.slane %v16369_v19, 1 }
 0x1ef   : > { %10190 = vmatmul.mubr.msk.bf16.gmra.mrb[44].mxu0 %vm404_vm1, %v2030_v18  ;;  %v12596_v18 = vsel %vm2700_vm3, %v2708_v2, %v2710_v3  ;;  %v2734_v2 = vrot.slane %v16381_v13, 1  ;;  %v16390_v13 = vld [vmem:[#allocation4_spill] sm:$0xff] }
 0x1f0   : > { %10195 = vmatprep.mubr.msk.bf16.mxu0 %vm404_vm1, %v12252_v52 }
 0x1f7   : > { %10196 = vmatmul.mubr.msk.bf16.vlgmr.msra.gmra.mrb[0].mxu0 %vm404_vm1, %v12256_v57  ;;  %v2398_v57 = vshll.u32 %v12224_v12, 16 }
 0x1f8   : > { %10244 = vmatpush3.bf16.msra.mxu0 %v2823_v0  ;;  %10199 = vmatprep.mubr.msk.bf16.mxu0 %vm404_vm1, %v12266_v4  ;;  %v16370_v0 = vld [vmem:[#allocation10_spill] sm:$0xff] }
 0x1f9   : > { %11636 = vmatprep.subr.msk.bf16.mxu0 %vm477_vm0, %v9164_v40  ;;  %v2712_v40 = vrot.slane %v16370_v0, 1  ;;  %v16382_v0 = vld [vmem:[#allocation24_spill] sm:$0xff] }
 0x1ff   : > { %10200 = vmatmul.mubr.msk.bf16.gmra.mrb[4].mxu0 %vm404_vm1, %v12270_v14  ;;  %v12562_v14 = vld [vmem:[%s11895_s27 + $0xd8] ss:$0 sps:$4 sm:$0xff]  }
 0x200   : > { %10203 = vmatprep.mubr.msk.bf16.mxu0 %vm404_vm1, %v12280_v50 }
 0x207   : > { %10204 = vmatmul.mubr.msk.bf16.gmra.mrb[8].mxu0 %vm404_vm1, %v12284_v59  ;;  %v2400_v59 = vrot.slane %v2398_v57, 1  ;;  %v16373_v57 = vld [vmem:[#allocation13_spill] sm:$0xff] }
 0x208   : > { %10207 = vmatprep.mubr.msk.bf16.mxu0 %vm404_vm1, %v12294_v48 }
 0x20f   : > { %10208 = vmatmul.mubr.msk.bf16.gmra.mrb[12].mxu0 %vm404_vm1, %v12298_v36  ;;  %v2384_v36 = vshll.u32 %v12212_v61, 16 }
 0x210   : > { %10211 = vmatprep.mubr.msk.bf16.mxu0 %vm404_vm1, %v12308_v5  ;;  %v2402_v5 = vshrl.u32 %v12224_v12, 16  ;;  %v16366_v12 = vld [vmem:[#allocation6_spill] sm:$0xff] }
 0x211   : > { %v2704_v60 = vrot.slane %v16366_v12, 1 }
 0x213   : > { %v2707_v27 = vsel %vm2700_vm3, %v2704_v60, %v2706_v10 }
 0x217   : > { %10212 = vmatmul.mubr.msk.bf16.gmra.mrb[16].mxu0 %vm404_vm1, %v12312_v43  ;;  %v2386_v43 = vrot.slane %v2384_v36, 1  ;;  %v16371_v36 = vld [vmem:[#allocation11_spill] sm:$0xff] }
 0x218   : > { %10215 = vmatprep.mubr.msk.bf16.mxu0 %vm404_vm1, %v12322_v31  ;;  %v2406_v31 = vshll.u32 %v12562_v14, 16 }
 0x219   : > { %v2387_v52 = vsel %vm16070_vm2, %v12395_v1, %v2386_v43  ;;  %v16365_v1 = vld [vmem:[#allocation31_spill] sm:$0xff] }
 0x21a   : > { %v2702_v6 = vrot.slane %v16365_v1, 1 }
 0x21c   : > { %v2705_v15 = vsel %vm2700_vm3, %v2702_v6, %v2704_v60  ;;  %v16379_v60 = vld [vmem:[#allocation21_spill] sm:$0xff] }
 0x21d   : > { %v2730_v8 = vrot.slane %v16379_v60, 1  ;;  %v16388_v60 = vld [vmem:[#allocation32_spill] sm:$0xff] }
 0x21f   : > { %10216 = vmatmul.mubr.msk.bf16.gmra.mrb[20].mxu0 %vm404_vm1, %v12326_v51  ;;  %v2391_v51 = vshll.u32 %v12215_v63, 16 }
 0x220   : > { %10219 = vmatprep.mubr.msk.bf16.mxu0 %vm404_vm1, %v12336_v33 }
 0x221   : > { %v2393_v4 = vrot.slane %v2391_v51, 1  ;;  %v12605_v51 = vsel %vm2700_vm3, %v2710_v3, %v2712_v40 }
 0x227   : > { %10220 = vmatmul.mubr.msk.bf16.gmra.mrb[24].mxu0 %vm404_vm1, %v12340_v56  ;;  %v2388_v56 = vshrl.u32 %v12212_v61, 16 }
 0x228   : > { %10223 = vmatprep.mubr.msk.bf16.mxu0 %vm404_vm1, %v12350_v41  ;;  %v2404_v41 = vor.u32 %v2402_v5, %v2400_v59  ;;  %v16375_v5 = vld [vmem:[#allocation16_spill] sm:$0xff] }
 0x22f   : > { %10224 = vmatmul.mubr.msk.bf16.gmra.mrb[28].mxu0 %vm404_vm1, %v12354_v62  ;;  %v2395_v62 = vshrl.u32 %v12215_v63, 16 }
 0x230   : > { %10227 = vmatprep.mubr.msk.bf16.mxu0 %vm404_vm1, %v12364_v47  ;;  %v2408_v47 = vrot.slane %v2406_v31, 1  ;;  %v2722_v31 = vrot.slane %v16375_v5, 1 }
 0x231   : > { %v2397_v50 = vor.u32 %v2395_v62, %v2393_v4 }
 0x232   : > { %v2409_v24 = vsel %vm16070_vm2, %v2404_v41, %v2408_v47  ;;  %v16376_v47 = vld [vmem:[#allocation17_spill] sm:$0xff] }
 0x233   : > { %v2401_v33 = vsel %vm16070_vm2, %v2397_v50, %v2400_v59  ;;  %v16374_v59 = vld [vmem:[#allocation14_spill] sm:$0xff] }
 0x237   : > { %10228 = vmatmul.mubr.msk.bf16.gmra.mrb[32].mxu0 %vm404_vm1, %v12368_v7  ;;  %v2390_v7 = vor.u32 %v2388_v56, %v2386_v43  ;;  %v2714_v43 = vrot.slane %v16371_v36, 1  ;;  %v16383_v36 = vld [vmem:[#allocation25_spill] sm:$0xff] }
 0x238   : > { %10231 = vmatprep.mubr.msk.bf16.mxu0 %vm404_vm1, %v12382_v55  ;;  %v16364_v55 = vld [vmem:[#allocation30_spill] sm:$0xff] }
 0x239   : > { %v2394_v48 = vsel %vm16070_vm2, %v2390_v7, %v2393_v4  ;;  %v12608_v56 = vsel %vm2700_vm3, %v2712_v40, %v2714_v43  ;;  %v2718_v4 = vrot.slane %v16373_v57, 1  ;;  %v2736_v40 = vrot.slane %v16382_v0, 1  ;;  %v16384_v57 = vld [vmem:[#allocation26_spill] sm:$0xff] }
 0x23f   : > { %10232 = vmatmul.mubr.msk.bf16.gmra.mrb[36].mxu0 %vm404_vm1, %v12387_v16  ;;  %v2701_v16 = vrot.slane %v16364_v55, 1  ;;  %v2724_v55 = vrot.slane %v16376_v47, 1  ;;  %v16386_v47 = vld [vmem:[#allocation28_spill] sm:$0xff] }
 0x240   : > { %10235 = vmatprep.mubr.msk.bf16.mxu0 %vm404_vm1, %v2387_v52  ;;  %v16372_v52 = vld [vmem:[#allocation12_spill] sm:$0xff] }
 0x241   : > { %v2703_v45 = vsel %vm2700_vm3, %v2701_v16, %v2702_v6  ;;  %v2716_v62 = vrot.slane %v16372_v52, 1  ;;  %v16377_v16 = vld [vmem:[#allocation19_spill] sm:$0xff]  ;;  %v12641_v6 = vsel %vm2700_vm3, %v2722_v31, %v2724_v55  ;;  %v12677_v52 = vsel %vm2700_vm3, %v2734_v2, %v2736_v40 }
 0x242   : > { %v2726_v1 = vrot.slane %v16377_v16, 1  ;;  %v16387_v16 = vld [vmem:[#allocation29_spill] sm:$0xff] }
 0x243   : > { %v12617_v7 = vsel %vm2700_vm3, %v2714_v43, %v2716_v62  ;;  %v12620_v50 = vsel %vm2700_vm3, %v2716_v62, %v2718_v4  ;;  %v2738_v43 = vrot.slane %v16383_v36, 1  ;;  %v16391_v36 = vld [vmem:[#allocation7_spill] sm:$0xff] }
 0x245   : > { %v12680_v62 = vsel %vm2700_vm3, %v2736_v40, %v2738_v43 }
 0x247   : > { %10236 = vmatmul.mubr.msk.bf16.gmra.mrb[40].mxu0 %vm404_vm1, %v2394_v48  ;;  %v2720_v48 = vrot.slane %v16374_v59, 1  ;;  %v16385_v59 = vld [vmem:[#allocation27_spill] sm:$0xff] }
 0x248   : > { %10239 = vmatprep.mubr.msk.bf16.mxu0 %vm404_vm1, %v2401_v33 }
 0x249   : > { %v12629_v33 = vsel %vm2700_vm3, %v2718_v4, %v2720_v48  ;;  %v12632_v41 = vsel %vm2700_vm3, %v2720_v48, %v2722_v31  ;;  %v2740_v4 = vrot.slane %v16384_v57, 1  ;;  %v2742_v48 = vrot.slane %v16385_v59, 1 }
 0x24a   : > { %v3105_v57 = vrot.slane %v16362_v22, 1  ;;  %v3520_v59 = vsel %vm477_vm0, %v12584_v39, 0 }
 0x24b   : > { %v12689_v5 = vsel %vm2700_vm3, %v2738_v43, %v2740_v4  ;;  %v12692_v31 = vsel %vm2700_vm3, %v2740_v4, %v2742_v48  ;;  %v3103_v43 = vrot.slane %v16391_v36, 1 }
 0x24f   : > { %10240 = vmatmul.mubr.msk.bf16.gmra.mrb[44].mxu0 %vm404_vm1, %v2409_v24  ;;  %v12644_v24 = vsel %vm2700_vm3, %v2724_v55, %v2726_v1  ;;  %v2744_v55 = vrot.slane %v16386_v47, 1  ;;  %v3107_v47 = vrot.slane %v16363_v54, 1  ;;  %v3117_v54 = vrot.slane %v12033_v21, 1 }
 0x250   : > { %10245 = vmatprep.mubr.msk.bf16.mxu0 %vm404_vm1, %v2703_v45  ;;  %v16378_v45 = vld [vmem:[#allocation20_spill] sm:$0xff]  ;;  %v3125_v21 = vrot.slane %v12049_v28, 1  ;;  %v3133_v28 = vrot.slane %v12065_v34, 1  ;;  %v3141_v34 = vrot.slane %v12084_v42, 1 }
 0x251   : > { %v2728_v12 = vrot.slane %v16378_v45, 1  ;;  %v12703_v45 = vsel %vm2700_vm3, %v2742_v48, %v2744_v55  ;;  %v3106_v48 = vsel %vm2700_vm3, %v3103_v43, %v3105_v57 }
 0x253   : > { %v12653_v10 = vsel %vm2700_vm3, %v2726_v1, %v2728_v12  ;;  %v12700_v1 = vrot.slane %v16387_v16, 1  ;;  %v3108_v16 = vsel %vm2700_vm3, %v3105_v57, %v3107_v47 }
 0x257   : > { %10246 = vmatmul.mubr.msk.bf16.vlgmr.msra.gmra.mrb[0].mxu0 %vm404_vm1, %v2705_v15  ;;  %v12656_v15 = vsel %vm2700_vm3, %v2728_v12, %v2730_v8  ;;  %v12707_v12 = vsel %vm2700_vm3, %v2744_v55, %v12700_v1  ;;  %v3109_v55 = vrot.slane %v12015_v20, 1  ;;  %v3115_v20 = vrot.slane %v12027_v11, 1 }
 0x258   : > { %10294 = vmatpush3.bf16.msra.mxu0 %v3222_v9  ;;  %10249 = vmatprep.mubr.msk.bf16.mxu0 %vm404_vm1, %v2707_v27  ;;  %v16380_v9 = vld [vmem:[#allocation22_spill] sm:$0xff]  ;;  %v3123_v11 = vrot.slane %v12043_v26, 1  ;;  %v3131_v26 = vrot.slane %v12059_v32, 1  ;;  %v3139_v32 = vrot.slane %v12075_v38, 1  ;;  %v3147_v38 = vrot.slane %v12496_v53, 1 }
 0x259   : > { %11637 = vmatprep.subr.msk.bf16.mxu0 %vm477_vm0, %v12584_v39  ;;  %v2732_v27 = vrot.slane %v16380_v9, 1  ;;  %v16389_v9 = vld [vmem:[#allocation3_spill] sm:$0xff]  ;;  %v3110_v22 = vsel %vm2700_vm3, %v3107_v47, %v3109_v55  ;;  %v3111_v39 = vrot.slane %v12019_v46, 1  ;;  %v3121_v46 = vrot.slane %v12041_v25, 1 }
 0x25a   : > { %v3126_v36 = vsel %vm2700_vm3, %v3123_v11, %v3125_v21  ;;  %v3129_v25 = vrot.slane %v12057_v30, 1  ;;  %v3137_v30 = vrot.slane %v12073_v37, 1  ;;  %v3145_v37 = vrot.slane %v12095_v49, 1 }
 0x25b   : > { %v12665_v19 = vsel %vm2700_vm3, %v2730_v8, %v2732_v27  ;;  %v12668_v3 = vsel %vm2700_vm3, %v2732_v27, %v2734_v2  ;;  %v2748_v8 = vrot.slane %v16388_v60, 1  ;;  %v3100_v27 = vrot.slane %v16389_v9, 1 }
 0x25c   : > { %v3101_v2 = vrot.slane %v16390_v13, 1  ;;  %v3113_v60 = vrot.slane %v12025_v17, 1  ;;  %v3118_v13 = vsel %vm2700_vm3, %v3115_v20, %v3117_v54  ;;  %v3119_v17 = vrot.slane %v12035_v23, 1 }
 0x25d   : > { %v2749_v0 = vsel %vm2700_vm3, %v12700_v1, %v2748_v8  ;;  %v3112_v8 = vsel %vm2700_vm3, %v3109_v55, %v3111_v39  ;;  %v3127_v23 = vrot.slane %v12051_v29, 1  ;;  %v3135_v29 = vrot.slane %v12067_v35, 1 }
 0x25e   : > { %v3102_v40 = vsel %vm2700_vm3, %v3100_v27, %v3101_v2  ;;  %v3104_v4 = vsel %vm2700_vm3, %v3101_v2, %v3103_v43  ;;  %v3114_v9 = vsel %vm2700_vm3, %v3111_v39, %v3113_v60  ;;  %v3116_v27 = vsel %vm2700_vm3, %v3113_v60, %v3115_v20 }
 0x25f   : > { %10250 = vmatmul.mubr.msk.bf16.gmra.mrb[4].mxu0 %vm404_vm1, %v12593_v58  ;;  %v3120_v2 = vsel %vm2700_vm3, %v3117_v54, %v3119_v17  ;;  %v3128_v43 = vsel %vm2700_vm3, %v3125_v21, %v3127_v23  ;;  %v3130_v57 = vsel %vm2700_vm3, %v3127_v23, %v3129_v25  ;;  %v3138_v47 = vsel %vm2700_vm3, %v3135_v29, %v3137_v30 }
 0x260   : > { %10253 = vmatprep.mubr.msk.bf16.mxu0 %vm404_vm1, %v12596_v18  ;;  %v3140_v55 = vsel %vm2700_vm3, %v3137_v30, %v3139_v32  ;;  %v3143_v35 = vrot.slane %v12087_v44, 1  ;;  %v3148_v42 = vsel %vm2700_vm3, %v3145_v37, %v3147_v38  ;;  %v3499_v44 = vrot.slane %v12212_v61, 1 }
 0x261   : > { %v3501_v53 = vrot.slane %v12215_v63, 1  ;;  %v3505_v61 = vrot.slane %v12562_v14, 1 }
 0x262   : > { %v3146_v39 = vsel %vm2700_vm3, %v3143_v35, %v3145_v37  ;;  %v3500_v49 = vsel %vm2700_vm3, %v12700_v1, %v3499_v44 }
 0x267   : > { %10254 = vmatmul.mubr.msk.bf16.gmra.mrb[8].mxu0 %vm404_vm1, %v12605_v51 }
 0x268   : > { %10257 = vmatprep.mubr.msk.bf16.mxu0 %vm404_vm1, %v12608_v56 }
 0x26f   : > { %10258 = vmatmul.mubr.msk.bf16.gmra.mrb[12].mxu0 %vm404_vm1, %v12617_v7 }
 0x270   : > { %10261 = vmatprep.mubr.msk.bf16.mxu0 %vm404_vm1, %v12620_v50 }
 0x277   : > { %10262 = vmatmul.mubr.msk.bf16.gmra.mrb[16].mxu0 %vm404_vm1, %v12629_v33 }
 0x278   : > { %10265 = vmatprep.mubr.msk.bf16.mxu0 %vm404_vm1, %v12632_v41 }
 0x27f   : > { %10266 = vmatmul.mubr.msk.bf16.gmra.mrb[20].mxu0 %vm404_vm1, %v12641_v6 }
 0x280   : > { %10269 = vmatprep.mubr.msk.bf16.mxu0 %vm404_vm1, %v12644_v24 }
 0x287   : > { %10270 = vmatmul.mubr.msk.bf16.gmra.mrb[24].mxu0 %vm404_vm1, %v12653_v10 }
 0x288   : > { %10273 = vmatprep.mubr.msk.bf16.mxu0 %vm404_vm1, %v12656_v15 }
 0x28f   : > { %10274 = vmatmul.mubr.msk.bf16.gmra.mrb[28].mxu0 %vm404_vm1, %v12665_v19 }
 0x290   : > { %10277 = vmatprep.mubr.msk.bf16.mxu0 %vm404_vm1, %v12668_v3 }
 0x297   : > { %10278 = vmatmul.mubr.msk.bf16.gmra.mrb[32].mxu0 %vm404_vm1, %v12677_v52 }
 0x298   : > { %10281 = vmatprep.mubr.msk.bf16.mxu0 %vm404_vm1, %v12680_v62 }
 0x29f   : > { %10282 = vmatmul.mubr.msk.bf16.gmra.mrb[36].mxu0 %vm404_vm1, %v12689_v5 }
 0x2a0   : > { %10285 = vmatprep.mubr.msk.bf16.mxu0 %vm404_vm1, %v12692_v31 }
 0x2a7   : > { %10286 = vmatmul.mubr.msk.bf16.gmra.mrb[40].mxu0 %vm404_vm1, %v12703_v45 }
 0x2a8   : > { %10289 = vmatprep.mubr.msk.bf16.mxu0 %vm404_vm1, %v12707_v12 }
 0x2af   : > { %10290 = vmatmul.mubr.msk.bf16.gmra.mrb[44].mxu0 %vm404_vm1, %v2749_v0  ;;  %v3122_v0 = vsel %vm2700_vm3, %v3119_v17, %v3121_v46 }
 0x2b0   : > { %10295 = vmatprep.mubr.msk.bf16.mxu0 %vm404_vm1, %v3102_v40  ;;  %v3124_v40 = vsel %vm2700_vm3, %v3121_v46, %v3123_v11 }
 0x2b7   : > { %10296 = vmatmul.mubr.msk.bf16.vlgmr.msra.gmra.mrb[0].mxu0 %vm404_vm1, %v3104_v4  ;;  %v3132_v4 = vsel %vm2700_vm3, %v3129_v25, %v3131_v26 }
 0x2b8   : > { %10344 = vmatpush3.bf16.msra.mxu0 %v3520_v59  ;;  %10299 = vmatprep.mubr.msk.bf16.mxu0 %vm404_vm1, %v3106_v48  ;;  %v3134_v59 = vsel %vm2700_vm3, %v3131_v26, %v3133_v28  ;;  %v3136_v48 = vsel %vm2700_vm3, %v3133_v28, %v3135_v29 }
 0x2bf   : > { %10300 = vmatmul.mubr.msk.bf16.gmra.mrb[4].mxu0 %vm404_vm1, %v3108_v16  ;;  %v3142_v16 = vsel %vm2700_vm3, %v3139_v32, %v3141_v34 }
 0x2c0   : > { %10303 = vmatprep.mubr.msk.bf16.mxu0 %vm404_vm1, %v3110_v22  ;;  %v3144_v22 = vsel %vm2700_vm3, %v3141_v34, %v3143_v35  ;;  %v11841_v34 = vmov 0  }
 0x2c1   : > { %5005 = vst.msk [vmem:[#allocation2 + $0x8] sm:$0xff] %vm16071_vm4, %v11841_v34  ;;  %5004 = vst.msk [vmem:[#allocation2] sm:$0xff] %vm16071_vm4, %v11841_v34 }
 0x2c2   : > { %5006 = vst.msk [vmem:[#allocation2 + $0xd0] sm:$0xff] %vm16071_vm4, %v11841_v34  ;;  %5007 = vst.msk [vmem:[#allocation2 + $0xd8] sm:$0xff] %vm16071_vm4, %v11841_v34 }
 0x2c7   : > { %10304 = vmatmul.mubr.msk.bf16.gmra.mrb[8].mxu0 %vm404_vm1, %v3112_v8 }
 0x2c8   : > { %10307 = vmatprep.mubr.msk.bf16.mxu0 %vm404_vm1, %v3114_v9 }
 0x2cf   : > { %10308 = vmatmul.mubr.msk.bf16.gmra.mrb[12].mxu0 %vm404_vm1, %v3116_v27  ;;  %v11799_v27 = vld [vmem:[%s16031_s3 + $0x30] sm:$0xff]  }
 0x2d0   : > { %10311 = vmatprep.mubr.msk.bf16.mxu0 %vm404_vm1, %v3118_v13  ;;  %10393 = vmatprep.subr.bf16.mxu1 %v11799_v27 }
 0x2d1   : > { %10394 = vmatpush3.bf16.msra.mxu1 %v11799_v27  ;;  %v11801_v27 = vld [vmem:[%s16031_s3] sm:$0xff]  }
 0x2d7   : > { %10312 = vmatmul.mubr.msk.bf16.gmra.mrb[16].mxu0 %vm404_vm1, %v3120_v2 }
 0x2d8   : > { %10315 = vmatprep.mubr.msk.bf16.mxu0 %vm404_vm1, %v3122_v0 }
 0x2df   : > { %10316 = vmatmul.mubr.msk.bf16.gmra.mrb[20].mxu0 %vm404_vm1, %v3124_v40 }
 0x2e0   : > { %10319 = vmatprep.mubr.msk.bf16.mxu0 %vm404_vm1, %v3126_v36 }
 0x2e7   : > { %10320 = vmatmul.mubr.msk.bf16.gmra.mrb[24].mxu0 %vm404_vm1, %v3128_v43 }
 0x2e8   : > { %10323 = vmatprep.mubr.msk.bf16.mxu0 %vm404_vm1, %v3130_v57  ;;  %v11800_v57 = vld [vmem:[%s16031_s3 + $0x38] sm:$0xff]  }
 0x2e9   : > { %10395 = vmatprep.subr.bf16.mxu1 %v11800_v57 }
 0x2ea   : > { %10396 = vmatpush3.bf16.msra.mxu1 %v11800_v57 }
 0x2eb   : > { %10445 = vmatprep.subr.bf16.mxu1 %v11801_v27 }
 0x2ef   : > { %10324 = vmatmul.mubr.msk.bf16.gmra.mrb[28].mxu0 %vm404_vm1, %v3132_v4 }
 0x2f0   : > { %10327 = vmatprep.mubr.msk.bf16.mxu0 %vm404_vm1, %v3134_v59 }
 0x2f7   : > { %10328 = vmatmul.mubr.msk.bf16.gmra.mrb[32].mxu0 %vm404_vm1, %v3136_v48 }
 0x2f8   : > { %10331 = vmatprep.mubr.msk.bf16.mxu0 %vm404_vm1, %v3138_v47 }
 0x2ff   : > { %10332 = vmatmul.mubr.msk.bf16.gmra.mrb[36].mxu0 %vm404_vm1, %v3140_v55 }
 0x300   : > { %10335 = vmatprep.mubr.msk.bf16.mxu0 %vm404_vm1, %v3142_v16 }
 0x307   : > { %10336 = vmatmul.mubr.msk.bf16.gmra.mrb[40].mxu0 %vm404_vm1, %v3144_v22 }
 0x308   : > { %10339 = vmatprep.mubr.msk.bf16.mxu0 %vm404_vm1, %v3146_v39 }
 0x30f   : > { %10340 = vmatmul.mubr.msk.bf16.gmra.mrb[44].mxu0 %vm404_vm1, %v3148_v42 }
 0x310   : > { %10345 = vmatprep.mubr.msk.bf16.mxu0 %vm404_vm1, %v12593_v58  ;;  %v11817_v58 = vld [vmem:[%s11895_s27 + $0xd0] sm:$0xff]  }
 0x317   : > { %10346 = vmatmul.mubr.msk.bf16.vlgmr.msra.gmra.mrb[0].mxu0 %vm404_vm1, %v12596_v18  ;;  %v3503_v18 = vrot.slane %v11817_v58, 1 }
 0x318   : > { %10349 = vmatprep.mubr.msk.bf16.mxu0 %vm404_vm1, %v12605_v51  ;;  %v3502_v51 = vsel %vm2700_vm3, %v3499_v44, %v3501_v53 }
 0x31f   : > { %10350 = vmatmul.mubr.msk.bf16.gmra.mrb[4].mxu0 %vm404_vm1, %v12608_v56  ;;  %v3504_v56 = vsel %vm2700_vm3, %v3501_v53, %v3503_v18 }
 0x320   : > { %10353 = vmatprep.mubr.msk.bf16.mxu0 %vm404_vm1, %v12617_v7  ;;  %v3994_v7 = vlaneseq }
 0x327   : > { %10354 = vmatmul.mubr.msk.bf16.gmra.mrb[8].mxu0 %vm404_vm1, %v12620_v50  ;;  %v12843_v50 = vshrl.u32 %v3994_v7, 7 }
 0x328   : > { %10357 = vmatprep.mubr.msk.bf16.mxu0 %vm404_vm1, %v12629_v33  ;;  %v3506_v33 = vsel %vm2700_vm3, %v3503_v18, %v3505_v61 }
 0x329   : > { %v3998_v63 = vadd.s32 24, %v12843_v50  ;;  %v12873_v60 = vadd.s32 56, %v12843_v50  ;;  %v12881_v54 = vadd.s32 40, %v12843_v50  ;;  %v12891_v46 = vadd.s32 80, %v12843_v50 }
 0x32a   : > { %v12894_v11 = vadd.s32 64, %v12843_v50  ;;  %v12912_v4 = vadd.s32 88, %v12843_v50  ;;  %v12943_v39 = vadd.s32 72, %v12843_v50 }
 0x32b   : > { %v12897_v40 = vmul.u32.u64.low 2863311531, %v12873_v60  ;;  %v12898_v36 = vmul.u32.u64.high 2863311531, %v12873_v60, %v12897_v40  ;;  %v12901_v25 = vmul.u32.u64.low 2863311531, %v12881_v54  ;;  %v12902_v43 = vmul.u32.u64.high 2863311531, %v12881_v54, %v12901_v25 }
 0x32c   : > { %v12908_v26 = vmul.u32.u64.low 2863311531, %v12891_v46  ;;  %v12909_v28 = vmul.u32.u64.high 2863311531, %v12891_v46, %v12908_v26  ;;  %v12917_v29 = vmul.u32.u64.low 2863311531, %v12894_v11  ;;  %v12918_v30 = vmul.u32.u64.high 2863311531, %v12894_v11, %v12917_v29 }
 0x32d   : > { %v12934_v35 = vmul.u32.u64.low 2863311531, %v12912_v4  ;;  %v12935_v37 = vmul.u32.u64.high 2863311531, %v12912_v4, %v12934_v35  ;;  %v4126_v42 = vshrl.u32 %v12898_v36, 4  ;;  %v4104_v44 = vshrl.u32 %v12902_v43, 4 }
 0x32e   : > { %v4159_v18 = vshrl.u32 %v12909_v28, 4  ;;  %v12967_v7 = vmul.u32.u64.low 2863311531, %v12943_v39  ;;  %v12968_v61 = vmul.u32.u64.high 2863311531, %v12943_v39, %v12967_v7  ;;  %v16405_v26 = vmov 0 }
 0x32f   : > { %10358 = vmatmul.mubr.msk.bf16.gmra.mrb[12].mxu0 %vm404_vm1, %v12632_v41  ;;  %v3997_v41 = vadd.s32 16, %v12843_v50  ;;  %v16408_v29 = vmov 0 }
 0x330   : > { %10361 = vmatprep.mubr.msk.bf16.mxu0 %vm404_vm1, %v12641_v6  ;;  %v3996_v6 = vadd.s32 8, %v12843_v50  ;;  %v4148_v25 = vshrl.u32 %v12968_v61, 4 }
 0x337   : > { %10362 = vmatmul.mubr.msk.bf16.gmra.mrb[16].mxu0 %vm404_vm1, %v12644_v24 }
 0x338   : > { %10365 = vmatprep.mubr.msk.bf16.mxu0 %vm404_vm1, %v12653_v10  ;;  %v12850_v24 = vmul.u32.u64.low 2863311531, %v3997_v41  ;;  %v12851_v10 = vmul.u32.u64.high 2863311531, %v3997_v41, %v12850_v24 }
 0x33a   : > { %v4071_v1 = vshrl.u32 %v12851_v10, 4  ;;  %v14012_v10 = vld [vmem:[%s16030_s2] ss:$0 sm:$0xff] }
 0x33c   : > { %v4072_v2 = vmul.u32 24, %v4071_v1  ;;  %v4160_v1 = vmul.u32 24, %v4159_v18 }
 0x33e   : > { %v12914_v59 = vsub.s32 %v3997_v41, %v4072_v2 }
 0x33f   : > { %10366 = vmatmul.mubr.msk.bf16.gmra.mrb[20].mxu0 %vm404_vm1, %v12656_v15 }
 0x340   : > { %10369 = vmatprep.mubr.msk.bf16.mxu0 %vm404_vm1, %v12665_v19  ;;  %v12854_v15 = vmul.u32.u64.low 2863311531, %v12843_v50  ;;  %v12855_v19 = vmul.u32.u64.high 2863311531, %v12843_v50, %v12854_v15  ;;  %vm4573_vm5 = vcmp.ne.s32.totalorder %v12914_v59, 0  ;;  %vm4621_vm6 = vcmp.lt.s32.totalorder %v12914_v59, 0 }
 0x341   : > { %v12940_v22 = vadd.s32 24, %v12914_v59  ;;  %vm12955_vm12 = vmand %vm4621_vm6, %vm4573_vm5 }
 0x347   : > { %10370 = vmatmul.mubr.msk.bf16.gmra.mrb[24].mxu0 %vm404_vm1, %v12668_v3  ;;  %v12857_v14 = vmul.u32.u64.low 2863311531, %v3998_v63  ;;  %v12858_v3 = vmul.u32.u64.high 2863311531, %v3998_v63, %v12857_v14 }
 0x348   : > { %10373 = vmatprep.mubr.msk.bf16.mxu0 %vm404_vm1, %v12677_v52  ;;  %v12995_v14 = vadd.s32 120, %v12843_v50 }
 0x34f   : > { %10374 = vmatmul.mubr.msk.bf16.gmra.mrb[28].mxu0 %vm404_vm1, %v12680_v62  ;;  %v12860_v52 = vmul.u32.u64.low 2863311531, %v3996_v6  ;;  %v12861_v62 = vmul.u32.u64.high 2863311531, %v3996_v6, %v12860_v52 }
 0x350   : > { %10377 = vmatprep.mubr.msk.bf16.mxu0 %vm404_vm1, %v12689_v5  ;;  %v12864_v5 = vadd.s32 48, %v12843_v50  ;;  %v16398_v52 = vmov 0 }
 0x351   : > { %v4060_v8 = vshrl.u32 %v12861_v62, 4 }
 0x352   : > { %v12877_v9 = vmul.u32.u64.low 2863311531, %v12864_v5  ;;  %v12878_v20 = vmul.u32.u64.high 2863311531, %v12864_v5, %v12877_v9 }
 0x353   : > { %v4061_v23 = vmul.u32 24, %v4060_v8 }
 0x354   : > { %v4115_v55 = vshrl.u32 %v12878_v20, 4 }
 0x355   : > { %v12925_v32 = vsub.s32 %v3996_v6, %v4061_v23  ;;  %v12977_v6 = vadd.s32 96, %v12843_v50 }
 0x356   : > { %v4116_v53 = vmul.u32 24, %v4115_v55 }
 0x357   : > { %10378 = vmatmul.mubr.msk.bf16.gmra.mrb[32].mxu0 %vm404_vm1, %v12692_v31  ;;  %v12867_v31 = vadd.s32 32, %v12843_v50  ;;  %vm4572_vm11 = vcmp.ne.s32.totalorder %v12925_v32, 0  ;;  %vm4620_vm13 = vcmp.lt.s32.totalorder %v12925_v32, 0  ;;  %v12992_v15 = vadd.s32 24, %v12925_v32 }
 0x358   : > { %10381 = vmatprep.mubr.msk.bf16.mxu0 %vm404_vm1, %v12703_v45  ;;  %v4049_v45 = vshrl.u32 %v12855_v19, 4  ;;  %v4105_v19 = vmul.u32 24, %v4104_v44  ;;  %vm13005_vm0 = vmand %vm4620_vm13, %vm4572_vm11  ;;  %v13010_v62 = vsub.s32 %v12864_v5, %v4116_v53 }
 0x359   : > { %v12887_v13 = vmul.u32.u64.low 2863311531, %v12867_v31  ;;  %v12888_v17 = vmul.u32.u64.high 2863311531, %v12867_v31, %v12887_v13  ;;  %v16399_v52 = vsel %vm13005_vm0, 4294967295, %v16398_v52 }
 0x35a   : > { %v4050_v0 = vmul.u32 24, %v4049_v45  ;;  %v4170_v45 = vshrl.u32 %v12935_v37, 4  ;;  %vm4625_vm3 = vcmp.lt.s32.totalorder %v13010_v62, 0  ;;  %v13051_v23 = vadd.s32 24, %v13010_v62 }
 0x35b   : > { %v4093_v16 = vshrl.u32 %v12888_v17, 4  ;;  %v13113_v37 = vadd.s32 128, %v12843_v50 }
 0x35c   : > { %v12921_v48 = vsub.s32 %v12843_v50, %v4050_v0  ;;  %v13039_v0 = vsub.s32 %v12881_v54, %v4105_v19  ;;  %v4171_v36 = vmul.u32 24, %v4170_v45  ;;  %v5057_v19 = vld [vmem:[#allocation2 + $0x8] sm:$0xff] }
 0x35d   : > { %v4094_v58 = vmul.u32 24, %v4093_v16 }
 0x35e   : > { %vm4571_vm7 = vcmp.ne.s32.totalorder %v12921_v48, 0  ;;  %vm4619_vm8 = vcmp.lt.s32.totalorder %v12921_v48, 0  ;;  %v12948_v38 = vadd.s32 24, %v12921_v48  ;;  %16401 = vst [vmem:[#allocation18_spill] sm:$0xff] %v13039_v0  ;;  %vm4624_vm11 = vcmp.lt.s32.totalorder %v13039_v0, 0 }
 0x35f   : > { %10382 = vmatmul.mubr.msk.bf16.gmra.mrb[36].mxu0 %vm404_vm1, %v12707_v12  ;;  %v4082_v12 = vshrl.u32 %v12858_v3, 4  ;;  %vm12961_vm14 = vmand %vm4619_vm8, %vm4571_vm7  ;;  %v13086_v28 = vsub.s32 %v12912_v4, %v4171_v36  ;;  %v16410_v4 = vmov 0  ;;  %v13122_v44 = vadd.s32 24, %v13039_v0 }
 0x360   : > { %10385 = vmatprep.mubr.msk.bf16.mxu0 %vm404_vm1, %v3500_v49  ;;  %v13184_v36 = vadd.s32 152, %v12843_v50 }
 0x361   : > { %v4083_v21 = vmul.u32 24, %v4082_v12  ;;  %v13014_v12 = vsub.s32 %v12867_v31, %v4094_v58  ;;  %v13031_v31 = vmul.u32.u64.low 2863311531, %v12977_v6  ;;  %v13032_v17 = vmul.u32.u64.high 2863311531, %v12977_v6, %v13031_v31  ;;  %16407 = vst [vmem:[#allocation5_spill] sm:$0xff] %v13086_v28  ;;  %16415 = vst [vmem:[#allocation9_spill] sm:$0xff] %v13122_v44 }
 0x362   : > { %v13168_v27 = vmul.u32.u64.low 2863311531, %v13113_v37  ;;  %v13169_v31 = vmul.u32.u64.high 2863311531, %v13113_v37, %v13168_v27 }
 0x363   : > { %v12923_v47 = vsub.s32 %v3998_v63, %v4083_v21  ;;  %v4127_v63 = vmul.u32 24, %v4126_v42  ;;  %16400 = vst [vmem:[#allocation15_spill] sm:$0xff] %v13014_v12  ;;  %v13042_v21 = vmul.u32.u64.low 2863311531, %v12995_v14  ;;  %v13043_v40 = vmul.u32.u64.high 2863311531, %v12995_v14, %v13042_v21 }
 0x364   : > { %vm4575_vm5 = vcmp.ne.s32.totalorder %v13014_v12, 0  ;;  %vm4623_vm6 = vcmp.lt.s32.totalorder %v13014_v12, 0  ;;  %v13060_v43 = vadd.s32 24, %v13014_v12  ;;  %v4181_v55 = vshrl.u32 %v13032_v17, 4 }
 0x365   : > { %vm4574_vm9 = vcmp.ne.s32.totalorder %v12923_v47, 0  ;;  %vm4622_vm10 = vcmp.lt.s32.totalorder %v12923_v47, 0  ;;  %v12974_v41 = vadd.s32 24, %v12923_v47  ;;  %v13028_v13 = vsub.s32 %v12873_v60, %v4127_v63  ;;  %vm13092_vm4 = vmand %vm4623_vm6, %vm4575_vm5 }
 0x366   : > { %vm12987_vm15 = vmand %vm4622_vm10, %vm4574_vm9  ;;  %v13048_v60 = vsub.s32 %v12891_v46, %v4160_v1  ;;  %16404 = vst [vmem:[#allocation6_spill] sm:$0xff] %v13060_v43  ;;  %v13064_v46 = vadd.s32 104, %v12843_v50  ;;  %vm4576_vm9 = vcmp.ne.s32.totalorder %v13039_v0, 0  ;;  %v16409_v29 = vsel %vm13092_vm4, 4294967295, %v16408_v29 }
 0x367   : > { %10386 = vmatmul.mubr.msk.bf16.gmra.mrb[40].mxu0 %vm404_vm1, %v3502_v51  ;;  %v16394_v51 = vmov 0  ;;  %vm4578_vm7 = vcmp.ne.s32.totalorder %v13028_v13, 0  ;;  %vm4626_vm8 = vcmp.lt.s32.totalorder %v13028_v13, 0  ;;  %v13068_v57 = vadd.s32 24, %v13028_v13  ;;  %vm13117_vm5 = vmand %vm4624_vm11, %vm4576_vm9 }
 0x368   : > { %10389 = vmatprep.mubr.msk.bf16.mxu0 %vm404_vm1, %v3504_v56  ;;  %v16395_v51 = vsel %vm12961_vm14, 4294967295, %v16394_v51  ;;  %v4137_v56 = vshrl.u32 %v12918_v30, 4  ;;  %16402 = vst [vmem:[#allocation30_spill] sm:$0xff] %v13048_v60  ;;  %vm4581_vm13 = vcmp.ne.s32.totalorder %v13048_v60, 0  ;;  %v4149_v30 = vmul.u32 24, %v4148_v25  ;;  %vm13103_vm2 = vmand %vm4626_vm8, %vm4578_vm7 }
 0x369   : > { %v16411_v4 = vsel %vm13103_vm2, 4294967295, %v16410_v4  ;;  %v13109_v16 = vmul.u32.u64.low 2863311531, %v13064_v46  ;;  %v13110_v35 = vmul.u32.u64.high 2863311531, %v13064_v46, %v13109_v16  ;;  %v16412_v42 = vmov 0 }
 0x36a   : > { %v4138_v8 = vmul.u32 24, %v4137_v56  ;;  %v16413_v42 = vsel %vm13117_vm5, 4294967295, %v16412_v42  ;;  %v4214_v53 = vshrl.u32 %v13043_v40, 4  ;;  %vm16416_vm6 = vcmp.lt.s32.totalorder %v13048_v60, 0 }
 0x36b   : > { %16414 = vst [vmem:[#allocation8_spill] sm:$0xff] %v16413_v42  ;;  %vm13133_vm7 = vmand %vm16416_vm6, %vm4581_vm13  ;;  %v16417_v56 = vmov 0  ;;  %v13138_v7 = vadd.s32 24, %v13048_v60  ;;  %vm4582_vm8 = vcmp.ne.s32.totalorder %v13086_v28, 0  ;;  %vm4630_vm9 = vcmp.lt.s32.totalorder %v13086_v28, 0 }
 0x36c   : > { %v13055_v54 = vsub.s32 %v12894_v11, %v4138_v8  ;;  %v13072_v11 = vadd.s32 144, %v12843_v50  ;;  %v16418_v56 = vsel %vm13133_vm7, 4294967295, %v16417_v56  ;;  %v16422_v1 = vmov 0  ;;  %vm13179_vm13 = vmand %vm4630_vm9, %vm4582_vm8 }
 0x36d   : > { %16419 = vst [vmem:[#allocation10_spill] sm:$0xff] %v16418_v56  ;;  %16420 = vst [vmem:[#allocation11_spill] sm:$0xff] %v13138_v7  ;;  %v13162_v45 = vsub.s32 %v12943_v39, %v4149_v30  ;;  %v16427_v21 = vmov 0  ;;  %v4215_v40 = vmul.u32 24, %v4214_v53  ;;  %v13206_v53 = vadd.s32 160, %v12843_v50 }
 0x36e   : > { %16403 = vst [vmem:[#allocation31_spill] sm:$0xff] %v13055_v54  ;;  %v13126_v58 = vmul.u32.u64.low 2863311531, %v13072_v11  ;;  %v13127_v18 = vmul.u32.u64.high 2863311531, %v13072_v11, %v13126_v58  ;;  %v13141_v61 = vadd.s32 24, %v13055_v54  ;;  %v16428_v21 = vsel %vm13179_vm13, 4294967295, %v16427_v21 }
 0x36f   : > { %10390 = vmatmul.mubr.msk.bf16.gmra.mrb[44].mxu0 %vm404_vm1, %v3506_v33  ;;  %v12971_v33 = vadd.s32 112, %v12843_v50  ;;  %vm4577_vm1 = vcmp.ne.s32.totalorder %v13010_v62, 0  ;;  %16425 = vst [vmem:[#allocation14_spill] sm:$0xff] %v13162_v45  ;;  %16429 = vst [vmem:[#allocation17_spill] sm:$0xff] %v16428_v21  ;;  %v13203_v16 = vadd.s32 24, %v13162_v45  ;;  %v4192_v25 = vshrl.u32 %v13110_v35, 4 }
 0x370   : > { %vm13078_vm10 = vmand %vm4625_vm3, %vm4577_vm1  ;;  %vm4579_vm1 = vcmp.ne.s32.totalorder %v13055_v54, 0  ;;  %vm4627_vm3 = vcmp.lt.s32.totalorder %v13055_v54, 0  ;;  %16421 = vst [vmem:[#allocation12_spill] sm:$0xff] %v13141_v61  ;;  %v13220_v39 = vsub.s32 %v12995_v14, %v4215_v40  ;;  %v4247_v17 = vshrl.u32 %v13127_v18, 4 }
 0x371   : > { %v13017_v9 = vmul.u32.u64.low 2863311531, %v12971_v33  ;;  %v13018_v20 = vmul.u32.u64.high 2863311531, %v12971_v33, %v13017_v9  ;;  %v16406_v26 = vsel %vm13078_vm10, 4294967295, %v16405_v26  ;;  %vm13157_vm11 = vmand %vm4627_vm3, %vm4579_vm1  ;;  %vm4580_vm1 = vcmp.ne.s32.totalorder %v13162_v45, 0  ;;  %16430 = vst [vmem:[#allocation19_spill] sm:$0xff] %v13203_v16 }
 0x372   : > { %v16423_v1 = vsel %vm13157_vm11, 4294967295, %v16422_v1  ;;  %v13165_v9 = vadd.s32 24, %v13086_v28  ;;  %16433 = vst [vmem:[#allocation22_spill] sm:$0xff] %v13220_v39  ;;  %v13224_v63 = vmul.u32.u64.low 2863311531, %v13184_v36  ;;  %v13225_v2 = vmul.u32.u64.high 2863311531, %v13184_v36, %v13224_v63 }
 0x373   : > { %v4203_v34 = vshrl.u32 %v13018_v20, 4  ;;  %16424 = vst [vmem:[#allocation13_spill] sm:$0xff] %v16423_v1  ;;  %v4182_v20 = vmul.u32 24, %v4181_v55  ;;  %v13198_v55 = vadd.s32 176, %v12843_v50  ;;  %v13240_v14 = vadd.s32 184, %v12843_v50 }
 0x374   : > { %16426 = vst [vmem:[#allocation16_spill] sm:$0xff] %v13165_v9  ;;  %v13243_v18 = vadd.s32 168, %v12843_v50  ;;  %v13247_v63 = vshrl.u32 %v5057_v19, 16  ;;  %v4193_v40 = vmul.u32 24, %v4192_v25  ;;  %vm16435_vm13 = vcmp.lt.s32.totalorder %v13162_v45, 0 }
 0x375   : > { %v4204_v8 = vmul.u32 24, %v4203_v34  ;;  %v13195_v34 = vadd.s32 136, %v12843_v50  ;;  %v13216_v30 = vsub.s32 %v12977_v6, %v4182_v20  ;;  %v4225_v20 = vshrl.u32 %v13169_v31, 4  ;;  %vm13259_vm11 = vmand %vm16435_vm13, %vm4580_vm1 }
 0x376   : > { %16434 = vst [vmem:[#allocation23_spill] sm:$0xff] %v13247_v63  ;;  %vm4634_vm7 = vcmp.lt.s32.totalorder %v13220_v39, 0  ;;  %v4248_v19 = vmul.u32 24, %v4247_v17  ;;  %v13266_v31 = vadd.s32 192, %v12843_v50  ;;  %v16440_v25 = vmov 0 }
 0x377   : > { %v13213_v27 = vsub.s32 %v12971_v33, %v4204_v8  ;;  %16432 = vst [vmem:[#allocation21_spill] sm:$0xff] %v13216_v30  ;;  %v13228_v58 = vmul.u32.u64.low 2863311531, %v13195_v34  ;;  %v13229_v3 = vmul.u32.u64.high 2863311531, %v13195_v34, %v13228_v58  ;;  %vm16444_vm13 = vcmp.ne.s32.totalorder %v13216_v30, 0 }
 0x378   : > { %v13232_v33 = vmul.u32.u64.low 2863311531, %v13198_v55  ;;  %v13233_v6 = vmul.u32.u64.high 2863311531, %v13198_v55, %v13232_v33  ;;  %v13236_v35 = vmul.u32.u64.low 2863311531, %v13206_v53  ;;  %v13237_v8 = vmul.u32.u64.high 2863311531, %v13206_v53, %v13236_v35 }
 0x379   : > { %16431 = vst [vmem:[#allocation20_spill] sm:$0xff] %v13213_v27  ;;  %vm4633_vm8 = vcmp.lt.s32.totalorder %v13213_v27, 0  ;;  %v13253_v58 = vadd.s32 208, %v12843_v50  ;;  %v16436_v33 = vmov 0  ;;  %vm16439_vm3 = vcmp.ne.s32.totalorder %v13213_v27, 0 }
 0x37a   : > { %v16437_v33 = vsel %vm13259_vm11, 4294967295, %v16436_v33  ;;  %vm13270_vm9 = vmand %vm4633_vm8, %vm16439_vm3  ;;  %v13275_v35 = vmul.u32.u64.low 2863311531, %v13240_v14  ;;  %v13276_v5 = vmul.u32.u64.high 2863311531, %v13240_v14, %v13275_v35  ;;  %v13283_v9 = vadd.s32 24, %v13213_v27 }
 0x37b   : > { %16438 = vst [vmem:[#allocation24_spill] sm:$0xff] %v16437_v33  ;;  %v16441_v25 = vsel %vm13270_vm9, 4294967295, %v16440_v25  ;;  %v13279_v24 = vmul.u32.u64.low 2863311531, %v13243_v18  ;;  %v13280_v28 = vmul.u32.u64.high 2863311531, %v13243_v18, %v13279_v24  ;;  %vm16445_vm1 = vcmp.lt.s32.totalorder %v13216_v30, 0 }
 0x37c   : > { %16442 = vst [vmem:[#allocation25_spill] sm:$0xff] %v16441_v25  ;;  %16443 = vst [vmem:[#allocation26_spill] sm:$0xff] %v13283_v9  ;;  %v16446_v17 = vmov 0  ;;  %v13294_v21 = vadd.s32 24, %v13216_v30  ;;  %v13297_v35 = vadd.s32 24, %v13220_v39  ;;  %v4226_v54 = vmul.u32 24, %v4225_v20 }
 0x37d   : > { %vm13289_vm6 = vmand %vm16445_vm1, %vm16444_vm13  ;;  %vm16451_vm3 = vcmp.ne.s32.totalorder %v13220_v39, 0  ;;  %v16452_v24 = vmov 0  ;;  %v13306_v61 = vsub.s32 %v13064_v46, %v4193_v40  ;;  %v4258_v1 = vshrl.u32 %v13225_v2, 4 }
 0x37e   : > { %v16447_v17 = vsel %vm13289_vm6, 4294967295, %v16446_v17  ;;  %16449 = vst [vmem:[#allocation28_spill] sm:$0xff] %v13294_v21  ;;  %16450 = vst [vmem:[#allocation29_spill] sm:$0xff] %v13297_v35  ;;  %v13310_v60 = vmul.u32.u64.low 2863311531, %v13253_v58  ;;  %v13311_v7 = vmul.u32.u64.high 2863311531, %v13253_v58, %v13310_v60  ;;  %v13314_v56 = vsub.s32 %v13072_v11, %v4248_v19 }
 0x37f   : > { %16448 = vst [vmem:[#allocation27_spill] sm:$0xff] %v16447_v17  ;;  %vm13301_vm8 = vmand %vm4634_vm7, %vm16451_vm3  ;;  %v4236_v20 = vshrl.u32 %v13229_v3, 4  ;;  %v13318_v0 = vmul.u32.u64.low 2863311531, %v13266_v31  ;;  %v13319_v44 = vmul.u32.u64.high 2863311531, %v13266_v31, %v13318_v0  ;;  %v4291_v40 = vshrl.u32 %v13233_v6, 4 }
 0x380   : > { %v16453_v24 = vsel %vm13301_vm8, 4294967295, %v16452_v24  ;;  %16455 = vst [vmem:[#allocation3_spill] sm:$0xff] %v13306_v61  ;;  %16456 = vst [vmem:[#allocation4_spill] sm:$0xff] %v13314_v56  ;;  %v4269_v60 = vshrl.u32 %v13237_v8, 4  ;;  %v13341_v19 = vsub.s32 %v13113_v37, %v4226_v54  ;;  %v13346_v6 = vadd.s32 24, %v13306_v61 }
 0x381   : > { %16454 = vst [vmem:[#allocation32_spill] sm:$0xff] %v16453_v24  ;;  %v4259_v8 = vmul.u32 24, %v4258_v1  ;;  %v4237_v2 = vmul.u32 24, %v4236_v20  ;;  %v13351_v0 = vadd.s32 216, %v12843_v50  ;;  %v4302_v54 = vshrl.u32 %v13276_v5, 4 }
 0x382   : > { %16457 = vst [vmem:[#allocation7_spill] sm:$0xff] %v13341_v19  ;;  %16458 = vst [vmem:[#allocation33_spill] sm:$0xff] %v13346_v6  ;;  %v4292_v11 = vmul.u32 24, %v4291_v40  ;;  %v4270_v3 = vmul.u32 24, %v4269_v60  ;;  %v4280_v37 = vshrl.u32 %v13280_v28, 4  ;;  %vm4587_vm13 = vcmp.ne.s32.totalorder %v13341_v19, 0 }
 0x383   : > { %vm4635_vm7 = vcmp.lt.s32.totalorder %v13341_v19, 0  ;;  %v13358_v1 = vadd.s32 200, %v12843_v50  ;;  %v13361_v46 = vadd.s32 240, %v12843_v50  ;;  %vm16459_vm3 = vcmp.ne.s32.totalorder %v13306_v61, 0 }
 0x384   : > { %vm16460_vm1 = vcmp.lt.s32.totalorder %v13306_v61, 0  ;;  %v16461_v20 = vmov 0  ;;  %v13372_v5 = vadd.s32 24, %v13314_v56  ;;  %v13375_v28 = vadd.s32 24, %v13341_v19 }
 0x385   : > { %vm13367_vm8 = vmand %vm16460_vm1, %vm16459_vm3  ;;  %v13378_v40 = vsub.s32 %v13184_v36, %v4259_v8  ;;  %v4335_v60 = vshrl.u32 %v13311_v7, 4  ;;  %vm16467_vm6 = vcmp.ne.s32.totalorder %v13314_v56, 0  ;;  %vm16468_vm9 = vcmp.lt.s32.totalorder %v13314_v56, 0 }
 0x386   : > { %v16462_v20 = vsel %vm13367_vm8, 4294967295, %v16461_v20  ;;  %16464 = vst [vmem:[#allocation35_spill] sm:$0xff] %v13372_v5  ;;  %16465 = vst [vmem:[#allocation36_spill] sm:$0xff] %v13375_v28  ;;  %v16469_v63 = vmov 0  ;;  %v13390_v39 = vsub.s32 %v13195_v34, %v4237_v2  ;;  %v4313_v35 = vshrl.u32 %v13319_v44, 4 }
 0x387   : > { %16463 = vst [vmem:[#allocation34_spill] sm:$0xff] %v16462_v20  ;;  %16466 = vst [vmem:[#allocation37_spill] sm:$0xff] %v13378_v40  ;;  %v13394_v24 = vmul.u32.u64.low 2863311531, %v13351_v0  ;;  %v13395_v30 = vmul.u32.u64.high 2863311531, %v13351_v0, %v13394_v24  ;;  %v16473_v36 = vmov 0  ;;  %v13402_v7 = vsub.s32 %v13198_v55, %v4292_v11 }
 0x388   : > { %vm13385_vm11 = vmand %vm16468_vm9, %vm16467_vm6  ;;  %16472 = vst [vmem:[#allocation39_spill] sm:$0xff] %v13390_v39  ;;  %v13405_v8 = vsub.s32 %v13206_v53, %v4270_v3  ;;  %v4303_v21 = vmul.u32 24, %v4302_v54  ;;  %v4281_v17 = vmul.u32 24, %v4280_v37  ;;  %v13424_v3 = vadd.s32 224, %v12843_v50 }
 0x389   : > { %v16470_v63 = vsel %vm13385_vm11, 4294967295, %v16469_v63  ;;  %vm13397_vm1 = vmand %vm4635_vm7, %vm4587_vm13  ;;  %16476 = vst [vmem:[#allocation41_spill] sm:$0xff] %v13402_v7  ;;  %v13408_v34 = vmul.u32.u64.low 2863311531, %v13358_v1  ;;  %v13409_v2 = vmul.u32.u64.high 2863311531, %v13358_v1, %v13408_v34  ;;  %v4336_v53 = vmul.u32 24, %v4335_v60 }
 0x38a   : > { %16471 = vst [vmem:[#allocation38_spill] sm:$0xff] %v16470_v63  ;;  %v16474_v36 = vsel %vm13397_vm1, 4294967295, %v16473_v36  ;;  %16477 = vst [vmem:[#allocation42_spill] sm:$0xff] %v13405_v8  ;;  %v13412_v44 = vmul.u32.u64.low 2863311531, %v13361_v46  ;;  %v13413_v27 = vmul.u32.u64.high 2863311531, %v13361_v46, %v13412_v44  ;;  %v4314_v54 = vmul.u32 24, %v4313_v35 }
 0x38b   : > { %16475 = vst [vmem:[#allocation40_spill] sm:$0xff] %v16474_v36  ;;  %v13432_v37 = vadd.s32 248, %v12843_v50  ;;  %vm4638_vm9 = vcmp.lt.s32.totalorder %v13378_v40, 0  ;;  %v13438_v60 = vsub.s32 %v13240_v14, %v4303_v21  ;;  %vm4593_vm3 = vcmp.ne.s32.totalorder %v13402_v7, 0 }
 0x38c   : > { %v13444_v35 = vsub.s32 %v13243_v18, %v4281_v17  ;;  %v13448_v34 = vsub.s32 %v13253_v58, %v4336_v53  ;;  %v13451_v44 = vmul.u32.u64.low 2863311531, %v13424_v3  ;;  %v13452_v11 = vmul.u32.u64.high 2863311531, %v13424_v3, %v13451_v44 }
 0x38d   : > { %16478 = vst [vmem:[#allocation43_spill] sm:$0xff] %v13438_v60  ;;  %vm16481_vm13 = vcmp.ne.s32.totalorder %v13378_v40, 0  ;;  %v16482_v21 = vmov 0  ;;  %v13461_v14 = vsub.s32 %v13266_v31, %v4314_v54  ;;  %v4346_v18 = vshrl.u32 %v13395_v30, 4 }
 0x38e   : > { %16479 = vst [vmem:[#allocation44_spill] sm:$0xff] %v13444_v35  ;;  %16480 = vst [vmem:[#allocation45_spill] sm:$0xff] %v13448_v34  ;;  %v13465_v17 = vmul.u32.u64.low 2863311531, %v13432_v37  ;;  %v13466_v55 = vmul.u32.u64.high 2863311531, %v13432_v37, %v13465_v17  ;;  %v13469_v58 = vadd.s32 24, %v13378_v40  ;;  %vm16487_vm6 = vcmp.ne.s32.totalorder %v13390_v39, 0 }
 0x38f   : > { %vm13456_vm7 = vmand %vm4638_vm9, %vm16481_vm13  ;;  %16485 = vst [vmem:[#allocation47_spill] sm:$0xff] %v13461_v14  ;;  %vm16488_vm1 = vcmp.lt.s32.totalorder %v13390_v39, 0  ;;  %v16489_v53 = vmov 0  ;;  %v13480_v31 = vadd.s32 24, %v13390_v39  ;;  %vm4594_vm13 = vcmp.ne.s32.totalorder %v13438_v60, 0 }
 0x390   : > { %v16483_v21 = vsel %vm13456_vm7, 4294967295, %v16482_v21  ;;  %16486 = vst [vmem:[#allocation48_spill] sm:$0xff] %v13469_v58  ;;  %vm13475_vm9 = vmand %vm16488_vm1, %vm16487_vm6  ;;  %vm4642_vm11 = vcmp.lt.s32.totalorder %v13438_v60, 0  ;;  %vm16493_vm8 = vcmp.lt.s32.totalorder %v13402_v7, 0  ;;  %v16494_v30 = vmov 0 }
 0x391   : > { %16484 = vst [vmem:[#allocation46_spill] sm:$0xff] %v16483_v21  ;;  %v16490_v53 = vsel %vm13475_vm9, 4294967295, %v16489_v53  ;;  %16492 = vst [vmem:[#allocation50_spill] sm:$0xff] %v13480_v31  ;;  %v4324_v54 = vshrl.u32 %v13409_v2, 4  ;;  %v4379_v44 = vshrl.u32 %v13413_v27, 4  ;;  %v13497_v17 = vadd.s32 24, %v13402_v7 }
 0x392   : > { %16491 = vst [vmem:[#allocation49_spill] sm:$0xff] %v16490_v53  ;;  %vm13488_vm5 = vmand %vm16493_vm8, %vm4593_vm3  ;;  %vm16498_vm4 = vcmp.ne.s32.totalorder %v13405_v8, 0  ;;  %vm16499_vm2 = vcmp.lt.s32.totalorder %v13405_v8, 0  ;;  %v16500_v24 = vmov 0  ;;  %vm4597_vm8 = vcmp.ne.s32.totalorder %v13448_v34, 0 }
 0x393   : > { %v16495_v30 = vsel %vm13488_vm5, 4294967295, %v16494_v30  ;;  %16497 = vst [vmem:[#allocation52_spill] sm:$0xff] %v13497_v17  ;;  %vm13503_vm10 = vmand %vm16499_vm2, %vm16498_vm4  ;;  %vm4645_vm3 = vcmp.lt.s32.totalorder %v13448_v34, 0  ;;  %v13510_v19 = vadd.s32 232, %v12843_v50  ;;  %v13513_v27 = vadd.s32 24, %v13405_v8 }
 0x394   : > { %16496 = vst [vmem:[#allocation51_spill] sm:$0xff] %v16495_v30  ;;  %v16501_v24 = vsel %vm13503_vm10, 4294967295, %v16500_v24  ;;  %vm13515_vm6 = vmand %vm4642_vm11, %vm4594_vm13  ;;  %v16504_v2 = vmov 0  ;;  %vm4595_vm1 = vcmp.ne.s32.totalorder %v13461_v14, 0  ;;  %vm4643_vm2 = vcmp.lt.s32.totalorder %v13461_v14, 0 }
 0x395   : > { %16502 = vst [vmem:[#allocation53_spill] sm:$0xff] %v16501_v24  ;;  %16503 = vst [vmem:[#allocation54_spill] sm:$0xff] %v13513_v27  ;;  %v16505_v2 = vsel %vm13515_vm6, 4294967295, %v16504_v2  ;;  %v4347_v28 = vmul.u32 24, %v4346_v18  ;;  %v13526_v56 = vadd.s32 24, %v13438_v60  ;;  %vm16508_vm4 = vcmp.ne.s32.totalorder %v13444_v35, 0 }
 0x396   : > { %16506 = vst [vmem:[#allocation55_spill] sm:$0xff] %v16505_v2  ;;  %vm16509_vm11 = vcmp.lt.s32.totalorder %v13444_v35, 0  ;;  %v16510_v5 = vmov 0  ;;  %v13537_v63 = vadd.s32 24, %v13444_v35  ;;  %v13540_v18 = vadd.s32 24, %v13448_v34  ;;  %vm13550_vm7 = vmand %vm4645_vm3, %vm4597_vm8 }
 0x397   : > { %16507 = vst [vmem:[#allocation56_spill] sm:$0xff] %v13526_v56  ;;  %vm13532_vm13 = vmand %vm16509_vm11, %vm16508_vm4  ;;  %v16515_v40 = vmov 0  ;;  %v13555_v58 = vadd.s32 24, %v13461_v14  ;;  %v4325_v21 = vmul.u32 24, %v4324_v54  ;;  %v4380_v61 = vmul.u32 24, %v4379_v44 }
 0x398   : > { %v16511_v5 = vsel %vm13532_vm13, 4294967295, %v16510_v5  ;;  %16513 = vst [vmem:[#allocation58_spill] sm:$0xff] %v13537_v63  ;;  %16514 = vst [vmem:[#allocation59_spill] sm:$0xff] %v13540_v18  ;;  %v16516_v40 = vsel %vm13550_vm7, 4294967295, %v16515_v40  ;;  %v16519_v6 = vmov 0  ;;  %v4357_v53 = vshrl.u32 %v13452_v11, 4 }
 0x399   : > { %16512 = vst [vmem:[#allocation57_spill] sm:$0xff] %v16511_v5  ;;  %16517 = vst [vmem:[#allocation60_spill] sm:$0xff] %v16516_v40  ;;  %v13563_v36 = vmul.u32.u64.low 2863311531, %v13510_v19  ;;  %v13564_v39 = vmul.u32.u64.high 2863311531, %v13510_v19, %v13563_v36  ;;  %v13567_v31 = vadd.s32 272, %v12843_v50  ;;  %v13578_v44 = vsub.s32 %v13351_v0, %v4347_v28 }
 0x39a   : > { %16518 = vst [vmem:[#allocation61_spill] sm:$0xff] %v13555_v58  ;;  %vm13557_vm4 = vmand %vm4643_vm2, %vm4595_vm1  ;;  %v4390_v11 = vshrl.u32 %v13466_v55, 4  ;;  %v13594_v0 = vadd.s32 256, %v12843_v50  ;;  %v13601_v55 = vsub.s32 %v13358_v1, %v4325_v21  ;;  %v13604_v36 = vsub.s32 %v13361_v46, %v4380_v61 }
 0x39b   : > { %v16520_v6 = vsel %vm13557_vm4, 4294967295, %v16519_v6  ;;  %16522 = vst [vmem:[#allocation63_spill] sm:$0xff] %v13578_v44  ;;  %v13607_v20 = vadd.s32 280, %v12843_v50  ;;  %v4358_v35 = vmul.u32 24, %v4357_v53  ;;  %v13614_v18 = vadd.s32 264, %v12843_v50 }
 0x39c   : > { %16521 = vst [vmem:[#allocation62_spill] sm:$0xff] %v16520_v6  ;;  %16523 = vst [vmem:[#allocation64_spill] sm:$0xff] %v13601_v55  ;;  %v13610_v54 = vmul.u32.u64.low 2863311531, %v13567_v31  ;;  %v13611_v34 = vmul.u32.u64.high 2863311531, %v13567_v31, %v13610_v54  ;;  %vm4598_vm1 = vcmp.ne.s32.totalorder %v13578_v44, 0  ;;  %v13619_v1 = vadd.s32 24, %v13578_v44 }
 0x39d   : > { %16524 = vst [vmem:[#allocation65_spill] sm:$0xff] %v13604_v36  ;;  %v4391_v61 = vmul.u32 24, %v4390_v11  ;;  %v13622_v46 = vmul.u32.u64.low 2863311531, %v13594_v0  ;;  %v13623_v21 = vmul.u32.u64.high 2863311531, %v13594_v0, %v13622_v46  ;;  %v13626_v53 = vadd.s32 304, %v12843_v50 }
 0x39e   : > { %16525 = vst [vmem:[#allocation66_spill] sm:$0xff] %v13619_v1  ;;  %v13629_v54 = vadd.s32 288, %v12843_v50  ;;  %vm4596_vm3 = vcmp.ne.s32.totalorder %v13601_v55, 0  ;;  %v13635_v28 = vadd.s32 312, %v12843_v50  ;;  %v13638_v11 = vsub.s32 %v13424_v3, %v4358_v35 }
 0x39f   : > { %v4368_v46 = vshrl.u32 %v13564_v39, 4  ;;  %v13642_v14 = vmul.u32.u64.low 2863311531, %v13607_v20  ;;  %v13643_v58 = vmul.u32.u64.high 2863311531, %v13607_v20, %v13642_v14  ;;  %vm4649_vm8 = vcmp.lt.s32.totalorder %v13604_v36, 0 }
 0x3a0   : > { %16526 = vst [vmem:[#allocation67_spill] sm:$0xff] %v13638_v11  ;;  %v13647_v6 = vsub.s32 %v13432_v37, %v4391_v61  ;;  %v13650_v40 = vmul.u32.u64.low 2863311531, %v13614_v18  ;;  %v13651_v63 = vmul.u32.u64.high 2863311531, %v13614_v18, %v13650_v40  ;;  %vm16528_vm11 = vcmp.lt.s32.totalorder %v13578_v44, 0 }
 0x3a1   : > { %vm13657_vm2 = vmand %vm16528_vm11, %vm4598_vm1  ;;  %v16529_v3 = vmov 0  ;;  %v13662_v39 = vadd.s32 24, %v13601_v55  ;;  %v13665_v35 = vmul.u32.u64.low 2863311531, %v13626_v53  ;;  %v13666_v14 = vmul.u32.u64.high 2863311531, %v13626_v53, %v13665_v35 }
 0x3a2   : > { %16527 = vst [vmem:[#allocation68_spill] sm:$0xff] %v13647_v6  ;;  %v16530_v3 = vsel %vm13657_vm2, 4294967295, %v16529_v3  ;;  %v13669_v37 = vadd.s32 296, %v12843_v50  ;;  %vm16533_vm4 = vcmp.lt.s32.totalorder %v13601_v55, 0  ;;  %v16534_v40 = vmov 0 }
 0x3a3   : > { %16531 = vst [vmem:[#allocation69_spill] sm:$0xff] %v16530_v3  ;;  %16532 = vst [vmem:[#allocation70_spill] sm:$0xff] %v13662_v39  ;;  %v13680_v61 = vadd.s32 24, %v13604_v36  ;;  %v13683_v5 = vmul.u32.u64.low 2863311531, %v13629_v54  ;;  %v13684_v60 = vmul.u32.u64.high 2863311531, %v13629_v54, %v13683_v5  ;;  %v13687_v35 = vadd.s32 336, %v12843_v50 }
 0x3a4   : > { %vm13675_vm7 = vmand %vm16533_vm4, %vm4596_vm3  ;;  %vm16538_vm1 = vcmp.ne.s32.totalorder %v13604_v36, 0  ;;  %v16539_v56 = vmov 0  ;;  %vm4599_vm4 = vcmp.ne.s32.totalorder %v13638_v11, 0  ;;  %vm4647_vm3 = vcmp.lt.s32.totalorder %v13638_v11, 0 }
 0x3a5   : > { %v16535_v40 = vsel %vm13675_vm7, 4294967295, %v16534_v40  ;;  %16537 = vst [vmem:[#allocation72_spill] sm:$0xff] %v13680_v61  ;;  %vm13691_vm11 = vmand %vm4649_vm8, %vm16538_vm1  ;;  %v4369_v2 = vmul.u32 24, %v4368_v46  ;;  %v4423_v8 = vshrl.u32 %v13611_v34, 4  ;;  %vm4602_vm13 = vcmp.ne.s32.totalorder %v13647_v6, 0 }
 0x3a6   : > { %16536 = vst [vmem:[#allocation71_spill] sm:$0xff] %v16535_v40  ;;  %v16540_v56 = vsel %vm13691_vm11, 4294967295, %v16539_v56  ;;  %vm4650_vm6 = vcmp.lt.s32.totalorder %v13647_v6, 0  ;;  %v13701_v5 = vmul.u32.u64.low 2863311531, %v13635_v28  ;;  %v13702_v27 = vmul.u32.u64.high 2863311531, %v13635_v28, %v13701_v5  ;;  %vm13728_vm8 = vmand %vm4647_vm3, %vm4599_vm4 }
 0x3a7   : > { %16541 = vst [vmem:[#allocation73_spill] sm:$0xff] %v16540_v56  ;;  %v13705_v24 = vadd.s32 24, %v13638_v11  ;;  %v4401_v7 = vshrl.u32 %v13623_v21, 4  ;;  %v13709_v17 = vmul.u32.u64.low 2863311531, %v13669_v37  ;;  %v13710_v30 = vmul.u32.u64.high 2863311531, %v13669_v37, %v13709_v17  ;;  %vm13735_vm1 = vmand %vm4650_vm6, %vm4602_vm13 }
 0x3a8   : > { %v16543_v17 = vmov 0  ;;  %v13733_v21 = vadd.s32 24, %v13647_v6  ;;  %v16547_v34 = vmov 0  ;;  %v4424_v46 = vmul.u32 24, %v4423_v8 }
 0x3a9   : > { %16542 = vst [vmem:[#allocation74_spill] sm:$0xff] %v13705_v24  ;;  %v16544_v17 = vsel %vm13728_vm8, 4294967295, %v16543_v17  ;;  %v16548_v34 = vsel %vm13735_vm1, 4294967295, %v16547_v34  ;;  %v4434_v55 = vshrl.u32 %v13643_v58, 4  ;;  %v13741_v5 = vadd.s32 320, %v12843_v50 }
 0x3aa   : > { %16545 = vst [vmem:[#allocation75_spill] sm:$0xff] %v16544_v17  ;;  %16546 = vst [vmem:[#allocation76_spill] sm:$0xff] %v13733_v21  ;;  %v13744_v36 = vadd.s32 344, %v12843_v50  ;;  %v13747_v61 = vsub.s32 %v13510_v19, %v4369_v2  ;;  %v4412_v56 = vshrl.u32 %v13651_v63, 4  ;;  %v4402_v58 = vmul.u32 24, %v4401_v7 }
 0x3ab   : > { %16549 = vst [vmem:[#allocation77_spill] sm:$0xff] %v16548_v34  ;;  %v13751_v39 = vmul.u32.u64.low 2863311531, %v13687_v35  ;;  %v13752_v40 = vmul.u32.u64.high 2863311531, %v13687_v35, %v13751_v39  ;;  %v4467_v44 = vshrl.u32 %v13666_v14, 4  ;;  %v13760_v1 = vadd.s32 328, %v12843_v50 }
 0x3ac   : > { %16550 = vst [vmem:[#allocation78_spill] sm:$0xff] %v13747_v61  ;;  %v4445_v19 = vshrl.u32 %v13684_v60, 4  ;;  %v13768_v2 = vadd.s32 368, %v12843_v50  ;;  %v13771_v39 = vadd.s32 352, %v12843_v50  ;;  %v13774_v7 = vsub.s32 %v13567_v31, %v4424_v46 }
 0x3ad   : > { %v4435_v14 = vmul.u32 24, %v4434_v55  ;;  %v13777_v8 = vmul.u32.u64.low 2863311531, %v13741_v5  ;;  %v13778_v11 = vmul.u32.u64.high 2863311531, %v13741_v5, %v13777_v8  ;;  %v4478_v60 = vshrl.u32 %v13702_v27, 4 }
 0x3ae   : > { %v4413_v63 = vmul.u32 24, %v4412_v56  ;;  %v13784_v6 = vadd.s32 24, %v13747_v61  ;;  %v13787_v21 = vsub.s32 %v13594_v0, %v4402_v58  ;;  %v4468_v31 = vmul.u32 24, %v4467_v44 }
 0x3af   : > { %v4456_v55 = vshrl.u32 %v13710_v30, 4  ;;  %v4446_v46 = vmul.u32 24, %v4445_v19  ;;  %v4511_v34 = vshrl.u32 %v13752_v40, 4  ;;  %v13798_v56 = vsub.s32 %v13607_v20, %v4435_v14 }
 0x3b0   : > { %16551 = vst [vmem:[#allocation79_spill] sm:$0xff] %v13784_v6  ;;  %v13792_v8 = vmul.u32.u64.low 2863311531, %v13744_v36  ;;  %v13793_v24 = vmul.u32.u64.high 2863311531, %v13744_v36, %v13792_v8  ;;  %v13801_v27 = vadd.s32 376, %v12843_v50  ;;  %v13804_v44 = vadd.s32 24, %v13774_v7 }
 0x3b1   : > { %v13807_v30 = vsub.s32 %v13614_v18, %v4413_v63  ;;  %v4479_v0 = vmul.u32 24, %v4478_v60  ;;  %v4489_v40 = vshrl.u32 %v13778_v11, 4  ;;  %v13811_v58 = vsub.s32 %v13626_v53, %v4468_v31 }
 0x3b2   : > { %16552 = vst [vmem:[#allocation80_spill] sm:$0xff] %v13801_v27  ;;  %v4457_v19 = vmul.u32 24, %v4456_v55  ;;  %v13814_v8 = vmul.u32.u64.low 2863311531, %v13760_v1  ;;  %v13815_v20 = vmul.u32.u64.high 2863311531, %v13760_v1, %v13814_v8  ;;  %v13820_v14 = vsub.s32 %v13629_v54, %v4446_v46 }
 0x3b3   : > { %v4512_v18 = vmul.u32 24, %v4511_v34  ;;  %v13823_v63 = vadd.s32 24, %v13787_v21  ;;  %v4490_v53 = vmul.u32 24, %v4489_v40  ;;  %vm16553_vm1 = vcmp.ne.s32.totalorder %v13747_v61, 0 }
 0x3b4   : > { %vm16554_vm8 = vcmp.lt.s32.totalorder %v13747_v61, 0  ;;  %v16555_v11 = vmov 0  ;;  %v13837_v54 = vsub.s32 %v13635_v28, %v4479_v0  ;;  %vm16557_vm6 = vcmp.ne.s32.totalorder %v13774_v7, 0 }
 0x3b5   : > { %vm13831_vm11 = vmand %vm16554_vm8, %vm16553_vm1  ;;  %v13840_v34 = vmul.u32.u64.low 2863311531, %v13768_v2  ;;  %v13841_v60 = vmul.u32.u64.high 2863311531, %v13768_v2, %v13840_v34  ;;  %vm16558_vm13 = vcmp.lt.s32.totalorder %v13774_v7, 0  ;;  %v16559_v31 = vmov 0 }
 0x3b6   : > { %v16556_v11 = vsel %vm13831_vm11, 4294967295, %v16555_v11  ;;  %vm13847_vm3 = vmand %vm16558_vm13, %vm16557_vm6  ;;  %v13854_v55 = vsub.s32 %v13669_v37, %v4457_v19  ;;  %v4522_v28 = vshrl.u32 %v13793_v24, 4  ;;  %vm16562_vm4 = vcmp.ne.s32.totalorder %v13787_v21, 0 }
 0x3b7   : > { %v16560_v31 = vsel %vm13847_vm3, 4294967295, %v16559_v31  ;;  %vm16563_vm7 = vcmp.lt.s32.totalorder %v13787_v21, 0  ;;  %v16564_v46 = vmov 0  ;;  %vm4657_vm6 = vcmp.lt.s32.totalorder %v13811_v58, 0 }
 0x3b8   : > { %16561 = vst [vmem:[#allocation81_spill] sm:$0xff] %v13854_v55  ;;  %vm13861_vm2 = vmand %vm16563_vm7, %vm16562_vm4  ;;  %v13868_v0 = vsub.s32 %v13687_v35, %v4512_v18  ;;  %v13871_v37 = vsub.s32 %v13741_v5, %v4490_v53  ;;  %vm16568_vm1 = vcmp.ne.s32.totalorder %v13798_v56, 0  ;;  %vm16569_vm8 = vcmp.lt.s32.totalorder %v13798_v56, 0 }
 0x3b9   : > { %v16565_v46 = vsel %vm13861_vm2, 4294967295, %v16564_v46  ;;  %vm13877_vm10 = vmand %vm16569_vm8, %vm16568_vm1  ;;  %v16570_v24 = vmov 0  ;;  %v4500_v40 = vshrl.u32 %v13815_v20, 4  ;;  %v13888_v35 = vadd.s32 24, %v13798_v56 }
 0x3ba   : > { %16566 = vst [vmem:[#allocation82_spill] sm:$0xff] %v13868_v0  ;;  %16567 = vst [vmem:[#allocation83_spill] sm:$0xff] %v13871_v37  ;;  %v16571_v24 = vsel %vm13877_vm10, 4294967295, %v16570_v24  ;;  %v13884_v19 = vmul.u32.u64.low 2863311531, %v13771_v39  ;;  %v13885_v8 = vmul.u32.u64.high 2863311531, %v13771_v39, %v13884_v19  ;;  %vm16572_vm4 = vcmp.ne.s32.totalorder %v13807_v30, 0 }
 0x3bb   : > { %vm16573_vm13 = vcmp.lt.s32.totalorder %v13807_v30, 0  ;;  %v16574_v5 = vmov 0  ;;  %v13899_v18 = vadd.s32 24, %v13807_v30  ;;  %vm4610_vm8 = vcmp.ne.s32.totalorder %v13837_v54, 0 }
 0x3bc   : > { %vm13894_vm5 = vmand %vm16573_vm13, %vm16572_vm4  ;;  %vm4658_vm1 = vcmp.lt.s32.totalorder %v13837_v54, 0  ;;  %vm16576_vm7 = vcmp.ne.s32.totalorder %v13811_v58, 0  ;;  %v16577_v20 = vmov 0  ;;  %v13910_v53 = vadd.s32 24, %v13811_v58 }
 0x3bd   : > { %v16575_v5 = vsel %vm13894_vm5, 4294967295, %v16574_v5  ;;  %vm13905_vm9 = vmand %vm4657_vm6, %vm16576_vm7  ;;  %vm4656_vm4 = vcmp.lt.s32.totalorder %v13854_v55, 0  ;;  %v4523_v34 = vmul.u32 24, %v4522_v28  ;;  %vm16579_vm5 = vcmp.ne.s32.totalorder %v13820_v14, 0 }
 0x3be   : > { %v16578_v20 = vsel %vm13905_vm9, 4294967295, %v16577_v20  ;;  %vm16580_vm0 = vcmp.lt.s32.totalorder %v13820_v14, 0  ;;  %v16581_v19 = vmov 0  ;;  %vm4613_vm6 = vcmp.ne.s32.totalorder %v13868_v0, 0  ;;  %vm13926_vm13 = vmand %vm4658_vm1, %vm4610_vm8 }
 0x3bf   : > { %vm13918_vm14 = vmand %vm16580_vm0, %vm16579_vm5  ;;  %vm4661_vm7 = vcmp.lt.s32.totalorder %v13868_v0, 0  ;;  %vm4611_vm9 = vcmp.ne.s32.totalorder %v13871_v37, 0  ;;  %vm4659_vm10 = vcmp.lt.s32.totalorder %v13871_v37, 0  ;;  %v16583_v17 = vmov 0 }
 0x3c0   : > { %v16582_v19 = vsel %vm13918_vm14, 4294967295, %v16581_v19  ;;  %v16584_v17 = vsel %vm13926_vm13, 4294967295, %v16583_v17  ;;  %v4501_v28 = vmul.u32 24, %v4500_v40  ;;  %v4555_v3 = vshrl.u32 %v13841_v60, 4  ;;  %vm13955_vm8 = vmand %vm4661_vm7, %vm4613_vm6 }
 0x3c1   : > { %v13932_v9 = vmul.u32.u64.low 2863311531, %v13801_v27  ;;  %v13933_v25 = vmul.u32.u64.high 2863311531, %v13801_v27, %v13932_v9  ;;  %v13936_v45 = vadd.s32 24, %v13820_v14  ;;  %v13939_v16 = vadd.s32 24, %v13837_v54 }
 0x3c2   : > { %vm16585_vm0 = vcmp.ne.s32.totalorder %v13854_v55, 0  ;;  %v16586_v33 = vmov 0  ;;  %v13948_v40 = vadd.s32 24, %v13854_v55  ;;  %v4533_v60 = vshrl.u32 %v13885_v8, 4 }
 0x3c3   : > { %vm13943_vm5 = vmand %vm4656_vm4, %vm16585_vm0  ;;  %v16588_v27 = vmov 0  ;;  %v13960_v42 = vadd.s32 24, %v13868_v0  ;;  %v13963_v12 = vadd.s32 24, %v13871_v37  ;;  %v13966_v43 = vsub.s32 %v13744_v36, %v4523_v34  ;;  %v16672_v0 = vld [vmem:[#allocation17_spill] sm:$0xff] }
 0x3c4   : > { %v16587_v33 = vsel %vm13943_vm5, 4294967295, %v16586_v33  ;;  %v16589_v27 = vsel %vm13955_vm8, 4294967295, %v16588_v27  ;;  %v16593_v8 = vsel %vm12955_vm12, %v12940_v22, %v12914_v59  ;;  %v16596_v61 = vsel %vm12987_vm15, %v12974_v41, %v12923_v47  ;;  %vm14002_vm15 = vmand %vm4659_vm10, %vm4611_vm9 }
 0x3c5   : > { %16590 = vst [vmem:[#allocation84_spill] sm:$0xff] %v16589_v27  ;;  %16591 = vst [vmem:[#allocation85_spill] sm:$0xff] %v13960_v42  ;;  %vm13973_vm1 = vcmp.lt.s32.totalorder %v16593_v8, 16  ;;  %vm13982_vm4 = vcmp.lt.s32.totalorder %v16596_v61, 16  ;;  %v16600_v47 = vmov 0  ;;  %v14007_v41 = vadd.s32 360, %v12843_v50 }
 0x3c6   : > { %16592 = vst [vmem:[#allocation86_spill] sm:$0xff] %v13963_v12  ;;  %v16601_v47 = vsel %vm14002_vm15, 4294967295, %v16600_v47  ;;  %vm16603_vm6 = vnez %v16395_v51  ;;  %vm16607_vm10 = vnez %v16399_v52  ;;  %v4556_v52 = vmul.u32 24, %v4555_v3  ;;  %v16665_v12 = vld [vmem:[#allocation13_spill] sm:$0xff]  ;;  %v16674_v42 = vld [vmem:[#allocation16_spill] sm:$0xff] }
 0x3c7   : > { %16602 = vst [vmem:[#allocation87_spill] sm:$0xff] %v16601_v47  ;;  %v16604_v36 = vsel %vm16603_vm6, %v12948_v38, %v12921_v48  ;;  %v16608_v50 = vsel %vm16607_vm10, %v12992_v15, %v12925_v32  ;;  %v14041_v38 = vsub.s32 %v13760_v1, %v4501_v28  ;;  %v4566_v51 = vshrl.u32 %v13933_v25, 4  ;;  %v16675_v27 = vld [vmem:[#allocation5_spill] sm:$0xff] }
 0x3c8   : > { %vm14019_vm7 = vcmp.lt.s32.totalorder %v16604_v36, 16  ;;  %vm14028_vm9 = vcmp.lt.s32.totalorder %v16608_v50, 16  ;;  %v4534_v36 = vmul.u32 24, %v4533_v60  ;;  %v14067_v60 = vadd.s32 24, %v13966_v43 }
 0x3c9   : > { %v14070_v8 = vmul.u32.u64.low 2863311531, %v14007_v41  ;;  %v14071_v32 = vmul.u32.u64.high 2863311531, %v14007_v41, %v14070_v8  ;;  %v14076_v3 = vsub.s32 %v13768_v2, %v4556_v52  ;;  %vm16615_vm5 = vnez %v16406_v26 }
 0x3ca   : > { %v14081_v49 = vsub.s32 %v13771_v39, %v4534_v36  ;;  %v16616_v25 = vsel %vm16615_vm5, %v13051_v23, %v13010_v62  ;;  %vm16619_vm6 = vnez %v16411_v4  ;;  %v14104_v52 = vadd.s32 24, %v14041_v38  ;;  %v16624_v62 = vld [vmem:[#allocation6_spill] sm:$0xff]  ;;  %v16625_v23 = vld [vmem:[#allocation15_spill] sm:$0xff] }
 0x3cb   : > { %16613 = vst [vmem:[#allocation88_spill] sm:$0xff] %v14076_v3  ;;  %vm14090_vm14 = vcmp.lt.s32.totalorder %v16616_v25, 16  ;;  %v16620_v39 = vsel %vm16619_vm6, %v13068_v57, %v13028_v13  ;;  %vm16623_vm5 = vnez %v16409_v29  ;;  %v16629_v13 = vld [vmem:[#allocation8_spill] sm:$0xff]  ;;  %v16631_v57 = vld [vmem:[#allocation9_spill] sm:$0xff]  ;;  %vm4665_vm2 = vcmp.lt.s32.totalorder %v14076_v3, 0 }
 0x3cc   : > { %16614 = vst [vmem:[#allocation89_spill] sm:$0xff] %v14081_v49  ;;  %vm14099_vm0 = vcmp.lt.s32.totalorder %v16620_v39, 16  ;;  %vm16630_vm6 = vnez %v16629_v13  ;;  %v4567_v29 = vmul.u32 24, %v4566_v51  ;;  %v16670_v47 = vmov 0 }
 0x3ea   : > { %v10347_v50 = vpop.f32.mrb[0].mxu0 }
 0x3eb   : > { %v3804_v28 = vadd.f32 %v10347_v50, %v14012_v10  ;;  %v3556_v15 = vpop.f32.mrb[1].mxu0 }
 0x3ec   : > { %v3802_v1 = vadd.f32 %v14012_v10, %v3556_v15  ;;  %v10348_v48 = vpop.f32.mrb[2].mxu0 }
 0x3ed   : > { %vm3852_vm13 = vcmp.ge.f32.partialorder %v3804_v28, 0.0  ;;  %v3900_v50 = vmul.f32 0.2, %v3804_v28  ;;  %v3805_v22 = vadd.f32 %v10348_v48, %v14012_v10  ;;  %v3559_v59 = vpop.f32.mrb[3].mxu0 }
 0x3ee   : > { %vm3850_vm10 = vcmp.ge.f32.partialorder %v3802_v1, 0.0  ;;  %v3898_v8 = vmul.f32 0.2, %v3802_v1  ;;  %v3803_v15 = vadd.f32 %v14012_v10, %v3559_v59 }
 0x3ef   : > { %v3948_v37 = vsel %vm3852_vm13, %v3804_v28, %v3900_v50  ;;  %vm3853_vm8 = vcmp.ge.f32.partialorder %v3805_v22, 0.0  ;;  %v3901_v2 = vmul.f32 0.2, %v3805_v22  ;;  %v16626_v28 = vsel %vm16623_vm5, %v16624_v62, %v16625_v23  ;;  %v16632_v50 = vld [vmem:[#allocation18_spill] sm:$0xff] }
 0x3f0   : > { %v3946_v26 = vsel %vm3850_vm10, %v3802_v1, %v3898_v8  ;;  %vm3851_vm13 = vcmp.ge.f32.partialorder %v3803_v15, 0.0  ;;  %v3899_v36 = vmul.f32 0.2, %v3803_v15  ;;  %vm14111_vm15 = vcmp.lt.s32.totalorder %v16626_v28, 16 }
 0x3f1   : > { %v16633_v25 = vsel %vm16630_vm6, %v16631_v57, %v16632_v50  ;;  %vm4617_vm10 = vcmp.ne.s32.totalorder %v14076_v3, 0  ;;  %v3949_v1 = vsel %vm3853_vm8, %v3805_v22, %v3901_v2  ;;  %v4957_v8 = vsel %vm13973_vm1, %v3948_v37, 0.0 }
 0x3f2   : > { %vm14120_vm12 = vcmp.lt.s32.totalorder %v16633_v25, 16  ;;  %v4958_v62 = vsel %vm13982_vm4, %v3949_v1, 0.0  ;;  %v3947_v23 = vsel %vm3851_vm13, %v3803_v15, %v3899_v36  ;;  %v10351_v28 = vpop.f32.mrb[4].mxu0  ;;  %v4955_v13 = vsel %vm14019_vm7, %v3946_v26, 0.0 }
 0x3f3   : > { %v5009_v57 = vpack.c.bf16 %v4958_v62, %v4957_v8  ;;  %v4956_v22 = vsel %vm14028_vm9, %v3947_v23, 0.0  ;;  %v3808_v2 = vadd.f32 %v10351_v28, %v14012_v10  ;;  %v3572_v51 = vpop.f32.mrb[5].mxu0  ;;  %vm16636_vm8 = vcmp.ne.s32.totalorder %v13966_v43, 0  ;;  %v16651_v23 = vld [vmem:[#allocation10_spill] sm:$0xff]  ;;  %v16653_v28 = vld [vmem:[#allocation11_spill] sm:$0xff] }
 0x3f4   : > { %vm16637_vm1 = vcmp.lt.s32.totalorder %v13966_v43, 0  ;;  %v5008_v37 = vpack.c.bf16 %v4956_v22, %v4955_v13  ;;  %v3806_v9 = vadd.f32 %v14012_v10, %v3572_v51  ;;  %v10352_v61 = vpop.f32.mrb[6].mxu0  ;;  %vm16640_vm4 = vcmp.ne.s32.totalorder %v14041_v38, 0  ;;  %v16654_v13 = vld [vmem:[#allocation30_spill] sm:$0xff] }
 0x3f5   : > { %vm14141_vm5 = vmand %vm16637_vm1, %vm16636_vm8  ;;  %vm16641_vm7 = vcmp.lt.s32.totalorder %v14041_v38, 0  ;;  %v14155_v15 = vadd.s32 24, %v14076_v3  ;;  %v4544_v26 = vshrl.u32 %v14071_v32, 4  ;;  %vm16645_vm13 = vcmask 261120   ;;  %v3575_v25 = vpop.f32.mrb[7].mxu0 }
 0x3f6   : > { %vm14150_vm9 = vmand %vm16641_vm7, %vm16640_vm4  ;;  %5033 = vst.msk [vmem:[#allocation2 + $0x18] sm:$0xff] %vm16645_vm13, %v5009_v57  ;;  %vm3856_vm8 = vcmp.ge.f32.partialorder %v3808_v2, 0.0  ;;  %v3904_v36 = vmul.f32 0.2, %v3808_v2  ;;  %v3809_v50 = vadd.f32 %v10352_v61, %v14012_v10  ;;  %v16646_v1 = vmov 0 }
 0x3f7   : > { %16644 = vst [vmem:[#allocation6_spill] sm:$0xff] %v14155_v15  ;;  %vm14164_vm1 = vmand %vm4665_vm2, %vm4617_vm10  ;;  %v14169_v8 = vadd.s32 24, %v14081_v49  ;;  %vm3854_vm7 = vcmp.ge.f32.partialorder %v3806_v9, 0.0  ;;  %v3902_v32 = vmul.f32 0.2, %v3806_v9  ;;  %v3807_v62 = vadd.f32 %v14012_v10, %v3575_v25 }
 0x3f8   : > { %v16647_v1 = vsel %vm14164_vm1, 4294967295, %v16646_v1  ;;  %vm16650_vm4 = vmmov %vm16645_vm13  ;;  %vm16652_vm13 = vnez %v16651_v23  ;;  %vm16658_vm2 = vcmp.ne.s32.totalorder %v14081_v49, 0  ;;  %vm16659_vm10 = vcmp.lt.s32.totalorder %v14081_v49, 0  ;;  %v16698_v49 = vld [vmem:[#allocation27_spill] sm:$0xff] }
 0x3f9   : > { %16648 = vst [vmem:[#allocation15_spill] sm:$0xff] %v16647_v1  ;;  %16649 = vst [vmem:[#allocation8_spill] sm:$0xff] %v14169_v8  ;;  %v16655_v57 = vsel %vm16652_vm13, %v16653_v28, %v16654_v13  ;;  %v16660_v51 = vmov 0  ;;  %v3952_v25 = vsel %vm3856_vm8, %v3808_v2, %v3904_v36  ;;  %v3905_v23 = vmul.f32 0.2, %v3809_v50  ;;  %v16667_v28 = vld [vmem:[#allocation12_spill] sm:$0xff] }
 0x3fa   : > { %5032 = vst.msk [vmem:[#allocation2 + $0x10] sm:$0xff] %vm16650_vm4, %v5008_v37  ;;  %vm14178_vm6 = vcmp.lt.s32.totalorder %v16655_v57, 16  ;;  %vm14186_vm3 = vmand %vm16659_vm10, %vm16658_vm2  ;;  %v16663_v37 = vld [vmem:[#allocation80_spill] sm:$0xff]  ;;  %vm3857_vm4 = vcmp.ge.f32.partialorder %v3809_v50, 0.0  ;;  %vm16666_vm13 = vnez %v16665_v12  ;;  %v16668_v13 = vld [vmem:[#allocation31_spill] sm:$0xff]  ;;  %vm16673_vm2 = vnez %v16672_v0 }
 0x3fb   : > { %v16661_v51 = vsel %vm14186_vm3, 4294967295, %v16660_v51  ;;  %v14191_v61 = vsub.s32 %v16663_v37, %v4567_v29  ;;  %v16669_v57 = vsel %vm16666_vm13, %v16667_v28, %v16668_v13  ;;  %v16676_v55 = vsel %vm16673_vm2, %v16674_v42, %v16675_v27  ;;  %v16679_v37 = vld [vmem:[#allocation24_spill] sm:$0xff]  ;;  %v16681_v28 = vld [vmem:[#allocation19_spill] sm:$0xff]  ;;  %v16682_v13 = vld [vmem:[#allocation14_spill] sm:$0xff] }
 0x3fc   : > { %16662 = vst [vmem:[#allocation9_spill] sm:$0xff] %v16661_v51  ;;  %vm14198_vm11 = vcmp.lt.s32.totalorder %v16669_v57, 16  ;;  %vm14207_vm10 = vcmp.lt.s32.totalorder %v16676_v55, 16  ;;  %v3950_v2 = vsel %vm3854_vm7, %v3806_v9, %v3902_v32  ;;  %vm3855_vm8 = vcmp.ge.f32.partialorder %v3807_v62, 0.0  ;;  %v16701_v8 = vld [vmem:[#allocation21_spill] sm:$0xff]  ;;  %v16837_v1 = vld [vmem:[#allocation64_spill] sm:$0xff] }
 0x3fd   : > { %16664 = vst [vmem:[#allocation18_spill] sm:$0xff] %v14191_v61  ;;  %v16671_v47 = vsel %vm14198_vm11, 4294967295, %v16670_v47  ;;  %v3903_v36 = vmul.f32 0.2, %v3807_v62  ;;  %vm16680_vm13 = vnez %v16679_v37  ;;  %v3953_v27 = vsel %vm3857_vm4, %v3809_v50, %v3905_v23 }
 0x3fe   : > { %v16683_v0 = vsel %vm16680_vm13, %v16681_v28, %v16682_v13  ;;  %v4545_v32 = vmul.u32 24, %v4544_v26  ;;  %v4961_v37 = vsel %vm14090_vm14, %v3952_v25, 0.0  ;;  %v4962_v28 = vsel %vm14099_vm0, %v3953_v27, 0.0  ;;  %v5059_v27 = vld [vmem:[#allocation2 + $0x18] sm:$0xff] }
 0x3ff   : > { %vm14220_vm11 = vcmp.lt.s32.totalorder %v16683_v0, 16  ;;  %v3951_v13 = vsel %vm3855_vm8, %v3807_v62, %v3903_v36  ;;  %v10355_v0 = vpop.f32.mrb[8].mxu0  ;;  %v4959_v50 = vsel %vm14111_vm15, %v3950_v2, 0.0  ;;  %v5011_v23 = vpack.c.bf16 %v4962_v28, %v4961_v37  ;;  %v16690_v28 = vld [vmem:[#allocation25_spill] sm:$0xff] }
 0x400   : > { %v4960_v55 = vsel %vm14120_vm12, %v3951_v13, 0.0  ;;  %v3812_v26 = vadd.f32 %v10355_v0, %v14012_v10  ;;  %v3588_v9 = vpop.f32.mrb[9].mxu0  ;;  %v14249_v62 = vadd.s32 24, %v14191_v61  ;;  %vm16687_vm0 = vcmask 261120   ;;  %v16692_v13 = vld [vmem:[#allocation26_spill] sm:$0xff]  ;;  %v16693_v0 = vld [vmem:[#allocation20_spill] sm:$0xff] }
 0x401   : > { %v5010_v48 = vpack.c.bf16 %v4960_v55, %v4959_v50  ;;  %v3810_v25 = vadd.f32 %v14012_v10, %v3588_v9  ;;  %v10356_v59 = vpop.f32.mrb[10].mxu0  ;;  %5035 = vst.msk [vmem:[#allocation2 + $0x28] sm:$0xff] %vm16687_vm0, %v5011_v23  ;;  %v5058_v36 = vld [vmem:[#allocation2 + $0x10] sm:$0xff]  ;;  %v14253_v37 = vshrl.u32 %v5059_v27, 16  ;;  %vm16689_vm12 = vmmov %vm16687_vm0  ;;  %vm16691_vm8 = vnez %v16690_v28  ;;  %v16705_v28 = vld [vmem:[#allocation32_spill] sm:$0xff] }
 0x402   : > { %16686 = vst [vmem:[#allocation10_spill] sm:$0xff] %v14249_v62  ;;  %vm3860_vm15 = vcmp.ge.f32.partialorder %v3812_v26, 0.0  ;;  %v3908_v4 = vmul.f32 0.2, %v3812_v26  ;;  %v3813_v39 = vadd.f32 %v10356_v59, %v14012_v10  ;;  %v3591_v2 = vpop.f32.mrb[11].mxu0  ;;  %v16694_v50 = vsel %vm16691_vm8, %v16692_v13, %v16693_v0  ;;  %v16707_v13 = vld [vmem:[#allocation29_spill] sm:$0xff] }
 0x403   : > { %16688 = vst [vmem:[#allocation11_spill] sm:$0xff] %v14253_v37  ;;  %5034 = vst.msk [vmem:[#allocation2 + $0x20] sm:$0xff] %vm16689_vm12, %v5010_v48  ;;  %vm3858_vm2 = vcmp.ge.f32.partialorder %v3810_v25, 0.0  ;;  %v3906_v55 = vmul.f32 0.2, %v3810_v25  ;;  %v3811_v9 = vadd.f32 %v14012_v10, %v3591_v2  ;;  %vm14262_vm13 = vcmp.lt.s32.totalorder %v16694_v50, 16 }
 0x404   : > { %v14266_v59 = vshrl.u32 %v5058_v36, 16  ;;  %v3956_v42 = vsel %vm3860_vm15, %v3812_v26, %v3908_v4  ;;  %vm3861_vm0 = vcmp.ge.f32.partialorder %v3813_v39, 0.0  ;;  %v3909_v12 = vmul.f32 0.2, %v3813_v39  ;;  %v16700_v48 = vld [vmem:[#allocation28_spill] sm:$0xff]  ;;  %v16708_v0 = vld [vmem:[#allocation22_spill] sm:$0xff] }
 0x405   : > { %vm16699_vm12 = vnez %v16698_v49  ;;  %vm16706_vm8 = vnez %v16705_v28  ;;  %v14287_v26 = vsub.s32 %v14007_v41, %v4545_v32  ;;  %v3954_v49 = vsel %vm3858_vm2, %v3810_v25, %v3906_v55 }
 0x406   : > { %16697 = vst [vmem:[#allocation30_spill] sm:$0xff] %v14266_v59  ;;  %v16702_v51 = vsel %vm16699_vm12, %v16700_v48, %v16701_v8  ;;  %v16709_v50 = vsel %vm16706_vm8, %v16707_v13, %v16708_v0  ;;  %vm3859_vm15 = vcmp.ge.f32.partialorder %v3811_v9, 0.0  ;;  %v3907_v4 = vmul.f32 0.2, %v3811_v9  ;;  %v16712_v8 = vld [vmem:[#allocation34_spill] sm:$0xff]  ;;  %v16715_v48 = vld [vmem:[#allocation3_spill] sm:$0xff] }
 0x407   : > { %vm14273_vm7 = vcmp.lt.s32.totalorder %v16702_v51, 16  ;;  %vm14282_vm14 = vcmp.lt.s32.totalorder %v16709_v50, 16  ;;  %vm16713_vm12 = vnez %v16712_v8  ;;  %v16714_v51 = vld [vmem:[#allocation33_spill] sm:$0xff]  ;;  %v14298_v13 = vshll.u32 %v5058_v36, 16 }
 0x408   : > { %v16716_v15 = vsel %vm16713_vm12, %v16714_v51, %v16715_v48  ;;  %v4965_v0 = vsel %vm14178_vm6, %v3956_v42, 0.0  ;;  %v3957_v50 = vsel %vm3861_vm0, %v3813_v39, %v3909_v12  ;;  %v5101_v41 = vrot.slane %v14266_v59, 7  ;;  %v10359_v12 = vpop.f32.mrb[12].mxu0  ;;  %v16749_v59 = vld [vmem:[#allocation46_spill] sm:$0xff] }
 0x409   : > { %vm14294_vm4 = vcmp.lt.s32.totalorder %v16716_v15, 16  ;;  %16719 = vst [vmem:[#allocation80_spill] sm:$0xff] %v14298_v13  ;;  %vm16720_vm2 = vcmp.ne.s32.totalorder %v14191_v61, 0  ;;  %vm16721_vm8 = vcmp.lt.s32.totalorder %v14191_v61, 0  ;;  %v16722_v25 = vmov 0  ;;  %v3604_v51 = vpop.f32.mrb[13].mxu0 }
 0x40a   : > { %vm14308_vm3 = vmand %vm16721_vm8, %vm16720_vm2  ;;  %vm16725_vm12 = vnez %v16671_v47  ;;  %v4966_v22 = vsel %vm14207_vm10, %v3957_v50, 0.0  ;;  %v3955_v42 = vsel %vm3859_vm15, %v3811_v9, %v3907_v4  ;;  %v14316_v39 = vshll.u32 %v5059_v27, 16  ;;  %v16729_v50 = vld [vmem:[#allocation23_spill] sm:$0xff] }
 0x40b   : > { %v16723_v25 = vsel %vm14308_vm3, 4294967295, %v16722_v25  ;;  %v4963_v15 = vsel %vm16725_vm12, %v3954_v49, 0.0  ;;  %v5013_v36 = vpack.c.bf16 %v4966_v22, %v4965_v0  ;;  %v4964_v55 = vsel %vm14220_vm11, %v3955_v42, 0.0  ;;  %v10360_v49 = vpop.f32.mrb[14].mxu0  ;;  %v16732_v42 = vld [vmem:[#allocation38_spill] sm:$0xff]  ;;  %v5060_v27 = vld [vmem:[#allocation2 + $0x20] sm:$0xff] }
 0x40c   : > { %16724 = vst [vmem:[#allocation13_spill] sm:$0xff] %v16723_v25  ;;  %16726 = vst [vmem:[#allocation12_spill] sm:$0xff] %v14316_v39  ;;  %v3816_v8 = vadd.f32 %v10359_v12, %v14012_v10  ;;  %v5104_v48 = vor.u32 %v14298_v13, %v5101_v41  ;;  %v5012_v32 = vpack.c.bf16 %v4964_v55, %v4963_v15  ;;  %v16727_v29 = vrot.slane %v14253_v37, 7  ;;  %v3607_v0 = vpop.f32.mrb[15].mxu0  ;;  %v16734_v12 = vld [vmem:[#allocation35_spill] sm:$0xff]  ;;  %v16735_v55 = vld [vmem:[#allocation4_spill] sm:$0xff] }
 0x40d   : > { %v3814_v47 = vadd.f32 %v14012_v10, %v3604_v51  ;;  %vm16728_vm6 = vcmask 261120   ;;  %v3817_v4 = vadd.f32 %v10360_v49, %v14012_v10  ;;  %v16730_v15 = vrot.slane %v16729_v50, 7  ;;  %v10363_v23 = vpop.f32.mrb[16].mxu0 }
 0x40e   : > { %v5112_v9 = vor.u32 %v14316_v39, %v16727_v29  ;;  %5037 = vst.msk [vmem:[#allocation2 + $0x38] sm:$0xff] %vm16728_vm6, %v5013_v36  ;;  %vm3864_vm11 = vcmp.ge.f32.partialorder %v3816_v8, 0.0  ;;  %v3912_v57 = vmul.f32 0.2, %v3816_v8  ;;  %vm16731_vm10 = vsmask.f32 256  ;;  %vm16739_vm2 = vmmov %vm16728_vm6 }
 0x40f   : > { %v5105_v22 = vsel %vm16731_vm10, %v16730_v15, %v5104_v48  ;;  %vm16733_vm0 = vnez %v16732_v42  ;;  %v11802_v36 = vld [vmem:[%s16031_s3 + $0x8] sm:$0xff]   ;;  %5036 = vst.msk [vmem:[#allocation2 + $0x30] sm:$0xff] %vm16739_vm2, %v5012_v32  ;;  %vm3862_vm8 = vcmp.ge.f32.partialorder %v3814_v47, 0.0  ;;  %v3910_v49 = vmul.f32 0.2, %v3814_v47  ;;  %vm16740_vm12 = vmmov %vm16739_vm2 }
 0x410   : > { %v16736_v51 = vsel %vm16733_vm0, %v16734_v12, %v16735_v55  ;;  %v3815_v48 = vadd.f32 %v14012_v10, %v3607_v0  ;;  %10397 = vmatprep.mubr.msk.bf16.mxu1 %vm16740_vm12, %v5105_v22  ;;  %vm16741_vm6 = vmmov %vm16731_vm10  ;;  %v16742_v42 = vld [vmem:[#allocation40_spill] sm:$0xff]  ;;  %v16745_v55 = vld [vmem:[#allocation7_spill] sm:$0xff]  ;;  %v3960_v13 = vsel %vm3864_vm11, %v3816_v8, %v3912_v57  ;;  %vm3865_vm3 = vcmp.ge.f32.partialorder %v3817_v4, 0.0 }
 0x411   : > { %vm14340_vm15 = vcmp.lt.s32.totalorder %v16736_v51, 16  ;;  %v5113_v15 = vsel %vm16741_vm6, %v5101_v41, %v5112_v9  ;;  %vm16743_vm10 = vnez %v16742_v42  ;;  %v16744_v12 = vld [vmem:[#allocation36_spill] sm:$0xff]  ;;  %v3913_v32 = vmul.f32 0.2, %v3817_v4  ;;  %v16752_v22 = vld [vmem:[#allocation37_spill] sm:$0xff]  ;;  %v11818_v8 = vld [vmem:[%s16031_s3] sm:$0xff]  }
 0x412   : > { %v16746_v51 = vsel %vm16743_vm10, %v16744_v12, %v16745_v55  ;;  %10398 = vmatmul.mubr.msk.bf16.vlgmr.msra.gmra.mrb[0].mxu1 %vm16739_vm2, %v5113_v15  ;;  %vm16750_vm1 = vnez %v16749_v59  ;;  %v16751_v0 = vld [vmem:[#allocation48_spill] sm:$0xff]  ;;  %v14370_v9 = vshrl.u32 %v5060_v27, 16  ;;  %v3958_v12 = vsel %vm3862_vm8, %v3814_v47, %v3910_v49  ;;  %v16757_v57 = vld [vmem:[#allocation49_spill] sm:$0xff]  ;;  %v16759_v59 = vld [vmem:[#allocation50_spill] sm:$0xff] }
 0x413   : > { %vm14356_vm0 = vcmp.lt.s32.totalorder %v16746_v51, 16  ;;  %v16753_v50 = vsel %vm16750_vm1, %v16751_v0, %v16752_v22  ;;  %v5061_v42 = vld [vmem:[#allocation2 + $0x28] sm:$0xff]  ;;  %vm3863_vm6 = vcmp.ge.f32.partialorder %v3815_v48, 0.0  ;;  %v3911_v55 = vmul.f32 0.2, %v3815_v48  ;;  %10446 = vmatpush3.bf16.msra.mxu1 %v11818_v8  ;;  %v16760_v15 = vld [vmem:[#allocation39_spill] sm:$0xff]  ;;  %vm16778_vm8 = vmmov %vm16739_vm2 }
 0x414   : > { %vm14366_vm12 = vcmp.lt.s32.totalorder %v16753_v50, 16  ;;  %16756 = vst [vmem:[#allocation31_spill] sm:$0xff] %v14370_v9  ;;  %vm16758_vm11 = vnez %v16757_v57  ;;  %v14385_v0 = vadd.s32 24, %v14287_v26  ;;  %v4969_v47 = vsel %vm14262_vm13, %v3960_v13, 0.0  ;;  %10447 = vmatprep.subr.bf16.mxu1 %v11802_v36  ;;  %v14395_v8 = vld [vmem:[%s16031_s3 + $0x60] sm:$0xff]  }
 0x415   : > { %v16761_v51 = vsel %vm16758_vm11, %v16759_v59, %v16760_v15  ;;  %v3961_v49 = vsel %vm3865_vm3, %v3817_v4, %v3913_v32  ;;  %v5117_v22 = vrot.slane %v14370_v9, 7  ;;  %v14390_v61 = vshll.u32 %v5060_v27, 16  ;;  %16765 = vst [vmem:[#allocation16_spill] sm:$0xff] %v14395_v8  ;;  %vm16768_vm3 = vmmov %vm16739_vm2 }
 0x416   : > { %vm14380_vm1 = vcmp.lt.s32.totalorder %v16761_v51, 16  ;;  %v4967_v57 = vsel %vm14273_vm7, %v3958_v12, 0.0  ;;  %v4970_v59 = vsel %vm14282_vm14, %v3961_v49, 0.0  ;;  %v3959_v15 = vsel %vm3863_vm6, %v3815_v48, %v3911_v55  ;;  %v3620_v51 = vpop.f32.mrb[17].mxu0 }
 0x417   : > { %16764 = vst [vmem:[#allocation17_spill] sm:$0xff] %v14390_v61  ;;  %v14401_v13 = vshrl.u32 %v5061_v42, 16  ;;  %v5015_v4 = vpack.c.bf16 %v4970_v59, %v4969_v47  ;;  %v4968_v27 = vsel %vm14294_vm4, %v3959_v15, 0.0  ;;  %v3820_v32 = vadd.f32 %v10363_v23, %v14012_v10  ;;  %v10364_v12 = vpop.f32.mrb[18].mxu0  ;;  %10448 = vmatpush3.bf16.msra.mxu1 %v11802_v36  ;;  %v16773_v15 = vld [vmem:[#allocation52_spill] sm:$0xff]  ;;  %v16774_v23 = vld [vmem:[#allocation41_spill] sm:$0xff] }
 0x418   : > { %v5120_v9 = vor.u32 %v14390_v61, %v5117_v22  ;;  %v5014_v62 = vpack.c.bf16 %v4968_v27, %v4967_v57  ;;  %v3818_v2 = vadd.f32 %v14012_v10, %v3620_v51  ;;  %v14409_v49 = vshll.u32 %v5061_v42, 16  ;;  %v3623_v55 = vpop.f32.mrb[19].mxu0  ;;  %v16771_v57 = vld [vmem:[#allocation51_spill] sm:$0xff]  ;;  %v5062_v36 = vld [vmem:[#allocation2 + $0x30] sm:$0xff]  ;;  %10497 = vmatprep.subr.bf16.mxu1 %v14395_v8  ;;  %v16796_v61 = vld [vmem:[#allocation58_spill] sm:$0xff] }
 0x419   : > { %16766 = vst [vmem:[#allocation5_spill] sm:$0xff] %v14401_v13  ;;  %v16216_v3 = vrot.slane %v14401_v13, 7  ;;  %5039 = vst.msk [vmem:[#allocation2 + $0x48] sm:$0xff] %vm16768_vm3, %v5015_v4  ;;  %vm3868_vm7 = vcmp.ge.f32.partialorder %v3820_v32, 0.0  ;;  %v3916_v48 = vmul.f32 0.2, %v3820_v32  ;;  %v3821_v28 = vadd.f32 %v10364_v12, %v14012_v10 }
 0x41a   : > { %16767 = vst [vmem:[#allocation24_spill] sm:$0xff] %v14409_v49  ;;  %v16769_v47 = vrot.slane %v14253_v37, 7  ;;  %vm16770_vm4 = vsmask.f32 256  ;;  %vm16772_vm14 = vnez %v16771_v57  ;;  %5038 = vst.msk [vmem:[#allocation2 + $0x40] sm:$0xff] %vm16778_vm8, %v5014_v62  ;;  %vm3866_vm10 = vcmp.ge.f32.partialorder %v3818_v2, 0.0 }
 0x41b   : > { %v16775_v27 = vsel %vm16772_vm14, %v16773_v15, %v16774_v23  ;;  %v3914_v4 = vmul.f32 0.2, %v3818_v2  ;;  %v3819_v51 = vadd.f32 %v14012_v10, %v3623_v55  ;;  %v16779_v12 = vld [vmem:[#allocation53_spill] sm:$0xff]  ;;  %v16782_v57 = vld [vmem:[#allocation42_spill] sm:$0xff]  ;;  %vm4616_vm3 = vcmp.ne.s32.totalorder %v14287_v26, 0 }
 0x41c   : > { %v5121_v59 = vsel %vm16770_vm4, %v16769_v47, %v5120_v9  ;;  %vm14421_vm13 = vcmp.lt.s32.totalorder %v16775_v27, 16  ;;  %v5128_v9 = vor.u32 %v14409_v49, %v16216_v3  ;;  %vm16780_vm6 = vnez %v16779_v12  ;;  %v16781_v47 = vld [vmem:[#allocation54_spill] sm:$0xff]  ;;  %v16788_v27 = vld [vmem:[#allocation56_spill] sm:$0xff]  ;;  %v16789_v3 = vld [vmem:[#allocation43_spill] sm:$0xff] }
 0x41d   : > { %10401 = vmatprep.mubr.msk.bf16.mxu1 %vm16739_vm2, %v5121_v59  ;;  %v16783_v15 = vsel %vm16780_vm6, %v16781_v47, %v16782_v57  ;;  %v3964_v62 = vsel %vm3868_vm7, %v3820_v32, %v3916_v48  ;;  %vm3869_vm14 = vcmp.ge.f32.partialorder %v3821_v28, 0.0  ;;  %v3917_v55 = vmul.f32 0.2, %v3821_v28  ;;  %v16786_v59 = vld [vmem:[#allocation55_spill] sm:$0xff]  ;;  %v5063_v57 = vld [vmem:[#allocation2 + $0x38] sm:$0xff]  ;;  %v16794_v48 = vld [vmem:[#allocation57_spill] sm:$0xff] }
 0x41e   : > { %vm14437_vm11 = vcmp.lt.s32.totalorder %v16783_v15, 16  ;;  %vm16787_vm8 = vnez %v16786_v59  ;;  %v14453_v47 = vshrl.u32 %v5062_v36, 16  ;;  %v4973_v15 = vsel %vm14340_vm15, %v3964_v62, 0.0  ;;  %v16797_v59 = vld [vmem:[#allocation44_spill] sm:$0xff]  ;;  %v10367_v62 = vpop.f32.mrb[20].mxu0 }
 0x41f   : > { %v16790_v12 = vsel %vm16787_vm8, %v16788_v27, %v16789_v3  ;;  %v3962_v49 = vsel %vm3866_vm10, %v3818_v2, %v3914_v4  ;;  %vm3867_vm6 = vcmp.ge.f32.partialorder %v3819_v51, 0.0  ;;  %v3915_v32 = vmul.f32 0.2, %v3819_v51 }
 0x420   : > { %vm14449_vm2 = vcmp.lt.s32.totalorder %v16790_v12, 16  ;;  %16793 = vst [vmem:[#allocation19_spill] sm:$0xff] %v14453_v47  ;;  %vm16795_vm7 = vnez %v16794_v48  ;;  %v4971_v27 = vsel %vm14356_vm0, %v3962_v49, 0.0  ;;  %v3965_v12 = vsel %vm3869_vm14, %v3821_v28, %v3917_v55  ;;  %v5065_v55 = vld [vmem:[#allocation2 + $0x48] sm:$0xff] }
 0x421   : > { %v16798_v37 = vsel %vm16795_vm7, %v16796_v61, %v16797_v59  ;;  %vm16801_vm8 = vsmask.f32 256  ;;  %v5133_v29 = vrot.slane %v14453_v47, 7  ;;  %v4974_v2 = vsel %vm14366_vm12, %v3965_v12, 0.0  ;;  %v16807_v59 = vld [vmem:[#allocation60_spill] sm:$0xff]  ;;  %v16810_v12 = vld [vmem:[#allocation45_spill] sm:$0xff] }
 0x422   : > { %vm14462_vm4 = vcmp.lt.s32.totalorder %v16798_v37, 16  ;;  %v5129_v25 = vsel %vm16801_vm8, %v5117_v22, %v5128_v9  ;;  %v3963_v4 = vsel %vm3867_vm6, %v3819_v51, %v3915_v32  ;;  %vm16802_vm15 = vcmask 261120   ;;  %v3636_v22 = vpop.f32.mrb[21].mxu0  ;;  %vm16817_vm7 = vmmov %vm16801_vm8 }
 0x423   : > { %10402 = vmatmul.mubr.msk.bf16.gmra.mrb[4].mxu1 %vm16802_vm15, %v5129_v25  ;;  %v14473_v61 = vshll.u32 %v5062_v36, 16  ;;  %v14475_v37 = vshrl.u32 %v5063_v57, 16  ;;  %v5017_v48 = vpack.c.bf16 %v4974_v2, %v4973_v15  ;;  %v4972_v39 = vsel %vm14380_vm1, %v3963_v4, 0.0  ;;  %v10368_v51 = vpop.f32.mrb[22].mxu0  ;;  %vm16806_vm0 = vmmov %vm16802_vm15  ;;  %v5064_v36 = vld [vmem:[#allocation2 + $0x40] sm:$0xff] }
 0x424   : > { %v3824_v49 = vadd.f32 %v10367_v62, %v14012_v10  ;;  %v14480_v28 = vshll.u32 %v5063_v57, 16  ;;  %v5016_v9 = vpack.c.bf16 %v4972_v39, %v4971_v27  ;;  %v3822_v41 = vadd.f32 %v14012_v10, %v3636_v22  ;;  %v3639_v32 = vpop.f32.mrb[23].mxu0  ;;  %v16809_v57 = vld [vmem:[#allocation59_spill] sm:$0xff]  ;;  %vm16815_vm14 = vmmov %vm16806_vm0 }
 0x425   : > { %16803 = vst [vmem:[#allocation14_spill] sm:$0xff] %v14473_v61  ;;  %16804 = vst [vmem:[#allocation25_spill] sm:$0xff] %v14475_v37  ;;  %v5136_v25 = vor.u32 %v14473_v61, %v5133_v29  ;;  %v3825_v50 = vadd.f32 %v10368_v51, %v14012_v10  ;;  %vm16808_vm1 = vnez %v16807_v59  ;;  %v14496_v4 = vshrl.u32 %v5065_v55, 16  ;;  %v16818_v51 = vld [vmem:[#allocation62_spill] sm:$0xff]  ;;  %v16820_v59 = vld [vmem:[#allocation61_spill] sm:$0xff]  ;;  %v10371_v23 = vpop.f32.mrb[24].mxu0 }
 0x426   : > { %16805 = vst [vmem:[#allocation26_spill] sm:$0xff] %v14480_v28  ;;  %5041 = vst.msk [vmem:[#allocation2 + $0x58] sm:$0xff] %vm16806_vm0, %v5017_v48  ;;  %vm3872_vm12 = vcmp.ge.f32.partialorder %v3824_v49, 0.0  ;;  %v3920_v15 = vmul.f32 0.2, %v3824_v49  ;;  %v16811_v27 = vsel %vm16808_vm1, %v16809_v57, %v16810_v12  ;;  %vm3870_vm6 = vcmp.ge.f32.partialorder %v3822_v41, 0.0 }
 0x427   : > { %vm14492_vm10 = vcmp.lt.s32.totalorder %v16811_v27, 16  ;;  %16814 = vst [vmem:[#allocation20_spill] sm:$0xff] %v14496_v4  ;;  %5040 = vst.msk [vmem:[#allocation2 + $0x50] sm:$0xff] %vm16815_vm14, %v5016_v9  ;;  %v3918_v62 = vmul.f32 0.2, %v3822_v41  ;;  %v3823_v48 = vadd.f32 %v14012_v10, %v3639_v32  ;;  %v16816_v39 = vrot.slane %v14401_v13, 7 }
 0x428   : > { %vm16819_vm8 = vnez %v16818_v51  ;;  %v16821_v57 = vld [vmem:[#allocation47_spill] sm:$0xff]  ;;  %v3968_v61 = vsel %vm3872_vm12, %v3824_v49, %v3920_v15  ;;  %vm3873_vm0 = vcmp.ge.f32.partialorder %v3825_v50, 0.0  ;;  %v3921_v9 = vmul.f32 0.2, %v3825_v50  ;;  %vm16825_vm1 = vmmov %vm16815_vm14 }
 0x429   : > { %v5137_v22 = vsel %vm16817_vm7, %v16816_v39, %v5136_v25  ;;  %v16822_v12 = vsel %vm16819_vm8, %v16820_v59, %v16821_v57  ;;  %v16826_v32 = vrot.slane %v14475_v37, 7  ;;  %v16827_v25 = vld [vmem:[#allocation69_spill] sm:$0xff]  ;;  %v16829_v39 = vld [vmem:[#allocation66_spill] sm:$0xff]  ;;  %v16830_v51 = vld [vmem:[#allocation63_spill] sm:$0xff]  ;;  %v4977_v49 = vsel %vm14421_vm13, %v3968_v61, 0.0 }
 0x42a   : > { %vm14508_vm15 = vcmp.lt.s32.totalorder %v16822_v12, 16  ;;  %10405 = vmatprep.mubr.msk.bf16.mxu1 %vm16825_vm1, %v5137_v22  ;;  %vm16828_vm14 = vnez %v16827_v25  ;;  %v3966_v15 = vsel %vm3870_vm6, %v3822_v41, %v3918_v62  ;;  %vm3871_vm12 = vcmp.ge.f32.partialorder %v3823_v48, 0.0  ;;  %v16834_v22 = vld [vmem:[#allocation71_spill] sm:$0xff]  ;;  %v16836_v12 = vld [vmem:[#allocation70_spill] sm:$0xff] }
 0x42b   : > { %v5144_v47 = vor.u32 %v14480_v28, %v16826_v32  ;;  %v16831_v13 = vsel %vm16828_vm14, %v16829_v39, %v16830_v51  ;;  %v3919_v57 = vmul.f32 0.2, %v3823_v48  ;;  %vm16835_vm8 = vnez %v16834_v22 }
 0x42c   : > { %vm14521_vm7 = vcmp.lt.s32.totalorder %v16831_v13, 16  ;;  %v16838_v32 = vsel %vm16835_vm8, %v16836_v12, %v16837_v1  ;;  %v4975_v13 = vsel %vm14437_vm11, %v3966_v15, 0.0  ;;  %v3969_v39 = vsel %vm3873_vm0, %v3825_v50, %v3921_v9  ;;  %v3652_v15 = vpop.f32.mrb[25].mxu0 }
 0x42d   : > { %vm14532_vm1 = vcmp.lt.s32.totalorder %v16838_v32, 16  ;;  %vm16841_vm14 = vsmask.f32 256  ;;  %v14539_v42 = vshrl.u32 %v5064_v36, 16  ;;  %vm16843_vm13 = vcmp.lt.s32.totalorder %v14287_v26, 0 }
 0x42e   : > { %v5145_v51 = vsel %vm16841_vm14, %v5133_v29, %v5144_v47  ;;  %vm14545_vm6 = vmand %vm16843_vm13, %vm4616_vm3  ;;  %v16844_v61 = vmov 0  ;;  %v4978_v1 = vsel %vm14449_vm2, %v3969_v39, 0.0  ;;  %v3967_v41 = vsel %vm3871_vm12, %v3823_v48, %v3919_v57  ;;  %v10372_v48 = vpop.f32.mrb[26].mxu0 }
 0x42f   : > { %16842 = vst [vmem:[#allocation27_spill] sm:$0xff] %v14539_v42  ;;  %v16845_v61 = vsel %vm14545_vm6, 4294967295, %v16844_v61  ;;  %vm16846_vm8 = vcmask 261120   ;;  %v14552_v50 = vshll.u32 %v5064_v36, 16  ;;  %v16236_v47 = vrot.slane %v14496_v4, 7  ;;  %v3655_v32 = vpop.f32.mrb[27].mxu0 }
 0x430   : > { %10406 = vmatmul.mubr.msk.bf16.gmra.mrb[8].mxu1 %vm16846_vm8, %v5145_v51  ;;  %v5019_v29 = vpack.c.bf16 %v4978_v1, %v4977_v49  ;;  %v4976_v62 = vsel %vm14462_vm4, %v3967_v41, 0.0  ;;  %v3828_v9 = vadd.f32 %v10371_v23, %v14012_v10  ;;  %v5149_v22 = vrot.slane %v14539_v42, 7  ;;  %vm16849_vm11 = vmmov %vm16846_vm8  ;;  %v16852_v51 = vld [vmem:[#allocation72_spill] sm:$0xff]  ;;  %v16853_v1 = vld [vmem:[#allocation65_spill] sm:$0xff] }
 0x431   : > { %16847 = vst [vmem:[#allocation28_spill] sm:$0xff] %v14552_v50  ;;  %v5018_v12 = vpack.c.bf16 %v4976_v62, %v4975_v13  ;;  %v3826_v8 = vadd.f32 %v14012_v10, %v3652_v15  ;;  %v14560_v57 = vshll.u32 %v5065_v55, 16  ;;  %v3829_v49 = vadd.f32 %v10372_v48, %v14012_v10  ;;  %v16850_v13 = vld [vmem:[#allocation73_spill] sm:$0xff]  ;;  %vm16857_vm0 = vmmov %vm16846_vm8  ;;  %v16858_v15 = vld [vmem:[#allocation75_spill] sm:$0xff] }
 0x432   : > { %5043 = vst.msk [vmem:[#allocation2 + $0x68] sm:$0xff] %vm16849_vm11, %v5019_v29  ;;  %vm3876_vm3 = vcmp.ge.f32.partialorder %v3828_v9, 0.0  ;;  %v3924_v3 = vmul.f32 0.2, %v3828_v9  ;;  %v5152_v39 = vor.u32 %v14552_v50, %v5149_v22  ;;  %vm16851_vm4 = vnez %v16850_v13  ;;  %v16860_v48 = vld [vmem:[#allocation74_spill] sm:$0xff]  ;;  %v16861_v13 = vld [vmem:[#allocation67_spill] sm:$0xff] }
 0x433   : > { %16848 = vst [vmem:[#allocation21_spill] sm:$0xff] %v14560_v57  ;;  %v16854_v55 = vsel %vm16851_vm4, %v16852_v51, %v16853_v1  ;;  %5042 = vst.msk [vmem:[#allocation2 + $0x60] sm:$0xff] %vm16857_vm0, %v5018_v12  ;;  %vm3874_vm12 = vcmp.ge.f32.partialorder %v3826_v8, 0.0  ;;  %v3922_v23 = vmul.f32 0.2, %v3826_v8  ;;  %v3827_v29 = vadd.f32 %v14012_v10, %v3655_v32  ;;  %v14592_v1 = vld [vmem:[#allocation2 + $0x50] sm:$0xff] }
 0x434   : > { %vm14574_vm2 = vcmp.lt.s32.totalorder %v16854_v55, 16  ;;  %v5160_v62 = vor.u32 %v14560_v57, %v16236_v47  ;;  %vm16859_vm14 = vnez %v16858_v15  ;;  %v3972_v12 = vsel %vm3876_vm3, %v3828_v9, %v3924_v3  ;;  %v16867_v42 = vld [vmem:[#allocation77_spill] sm:$0xff]  ;;  %v16869_v47 = vld [vmem:[#allocation76_spill] sm:$0xff] }
 0x435   : > { %v16862_v36 = vsel %vm16859_vm14, %v16860_v48, %v16861_v13  ;;  %vm3877_vm8 = vcmp.ge.f32.partialorder %v3829_v49, 0.0  ;;  %v3925_v55 = vmul.f32 0.2, %v3829_v49  ;;  %v16865_v32 = vrot.slane %v14475_v37, 7  ;;  %v16870_v15 = vld [vmem:[#allocation68_spill] sm:$0xff] }
 0x436   : > { %vm14588_vm13 = vcmp.lt.s32.totalorder %v16862_v36, 16  ;;  %vm16866_vm11 = vsmask.f32 256  ;;  %vm16868_vm4 = vnez %v16867_v42  ;;  %v14606_v36 = vld [vmem:[#allocation2 + $0x58] sm:$0xff]  ;;  %v4981_v9 = vsel %vm14492_vm10, %v3972_v12, 0.0  ;;  %v16876_v42 = vld [vmem:[#allocation79_spill] sm:$0xff] }
 0x437   : > { %v5153_v50 = vsel %vm16866_vm11, %v16865_v32, %v5152_v39  ;;  %v16871_v57 = vsel %vm16868_vm4, %v16869_v47, %v16870_v15  ;;  %v3970_v3 = vsel %vm3874_vm12, %v3826_v8, %v3922_v23  ;;  %vm3875_vm3 = vcmp.ge.f32.partialorder %v3827_v29, 0.0  ;;  %v16877_v39 = vld [vmem:[#allocation78_spill] sm:$0xff]  ;;  %v10375_v23 = vpop.f32.mrb[28].mxu0 }
 0x438   : > { %vm14602_vm0 = vcmp.lt.s32.totalorder %v16871_v57, 16  ;;  %v3923_v13 = vmul.f32 0.2, %v3827_v29  ;;  %vm16874_vm14 = vcmask 261120   ;;  %vm16875_vm11 = vnez %v16556_v11 }
 0x439   : > { %10409 = vmatprep.mubr.msk.bf16.mxu1 %vm16874_vm14, %v5153_v50  ;;  %v16878_v32 = vsel %vm16875_vm11, %v16876_v42, %v16877_v39  ;;  %v4979_v57 = vsel %vm14508_vm15, %v3970_v3, 0.0  ;;  %v3973_v15 = vsel %vm3877_vm8, %v3829_v49, %v3925_v55  ;;  %vm16881_vm6 = vsmask.f32 256  ;;  %vm16882_vm10 = vmmov %vm16874_vm14 }
 0x43a   : > { %vm14616_vm4 = vcmp.lt.s32.totalorder %v16878_v32, 16  ;;  %v5161_v2 = vsel %vm16881_vm6, %v5149_v22, %v5160_v62  ;;  %v14624_v8 = vshrl.u32 %v14592_v1, 16  ;;  %v4982_v50 = vsel %vm14521_vm7, %v3973_v15, 0.0  ;;  %v3668_v62 = vpop.f32.mrb[29].mxu0  ;;  %vm16885_vm15 = vmmov %vm16882_vm10 }
 0x43b   : > { %v3971_v11 = vsel %vm3875_vm3, %v3827_v29, %v3923_v13  ;;  %10410 = vmatmul.mubr.msk.bf16.gmra.mrb[12].mxu1 %vm16882_vm10, %v5161_v2  ;;  %v14630_v12 = vshll.u32 %v14592_v1, 16  ;;  %v14633_v42 = vshrl.u32 %v14606_v36, 16  ;;  %v5021_v27 = vpack.c.bf16 %v4982_v50, %v4981_v9  ;;  %v10376_v3 = vpop.f32.mrb[30].mxu0  ;;  %vm16890_vm12 = vmmov %vm16882_vm10 }
 0x43c   : > { %v4980_v22 = vsel %vm14532_vm1, %v3971_v11, 0.0  ;;  %v3832_v49 = vadd.f32 %v10375_v23, %v14012_v10  ;;  %v5165_v59 = vrot.slane %v14624_v8, 7  ;;  %v3830_v29 = vadd.f32 %v14012_v10, %v3668_v62  ;;  %v3671_v32 = vpop.f32.mrb[31].mxu0 }
 0x43d   : > { %16883 = vst [vmem:[#allocation32_spill] sm:$0xff] %v14633_v42  ;;  %v5020_v55 = vpack.c.bf16 %v4980_v22, %v4979_v57  ;;  %v5173_v13 = vrot.slane %v14633_v42, 7  ;;  %v14642_v39 = vshll.u32 %v14606_v36, 16  ;;  %5045 = vst.msk [vmem:[#allocation2 + $0x78] sm:$0xff] %vm16885_vm15, %v5021_v27  ;;  %v3833_v25 = vadd.f32 %v10376_v3, %v14012_v10 }
 0x43e   : > { %vm3880_vm7 = vcmp.ge.f32.partialorder %v3832_v49, 0.0  ;;  %v3928_v9 = vmul.f32 0.2, %v3832_v49  ;;  %v5168_v15 = vor.u32 %v14630_v12, %v5165_v59  ;;  %vm16886_vm1 = vnez %v16560_v31 }
 0x43f   : > { %16884 = vst [vmem:[#allocation29_spill] sm:$0xff] %v14642_v39  ;;  %v16887_v57 = vsel %vm16886_vm1, %v13804_v44, %v13774_v7  ;;  %5044 = vst.msk [vmem:[#allocation2 + $0x70] sm:$0xff] %vm16890_vm12, %v5020_v55  ;;  %vm3878_vm8 = vcmp.ge.f32.partialorder %v3830_v29, 0.0  ;;  %v3926_v50 = vmul.f32 0.2, %v3830_v29  ;;  %v3831_v11 = vadd.f32 %v14012_v10, %v3671_v32  ;;  %v14670_v44 = vld [vmem:[#allocation2 + $0x60] sm:$0xff] }
 0x440   : > { %vm14652_vm6 = vcmp.lt.s32.totalorder %v16887_v57, 16  ;;  %v5176_v23 = vor.u32 %v14642_v39, %v5173_v13  ;;  %vm16891_vm3 = vnez %v16565_v46  ;;  %v3976_v27 = vsel %vm3880_vm7, %v3832_v49, %v3928_v9 }
 0x441   : > { %v16892_v31 = vsel %vm16891_vm3, %v13823_v63, %v13787_v21  ;;  %vm3881_vm11 = vcmp.ge.f32.partialorder %v3833_v25, 0.0  ;;  %v3929_v22 = vmul.f32 0.2, %v3833_v25  ;;  %v16895_v62 = vrot.slane %v14496_v4, 7  ;;  %v14684_v63 = vld [vmem:[#allocation2 + $0x68] sm:$0xff] }
 0x442   : > { %vm14666_vm14 = vcmp.lt.s32.totalorder %v16892_v31, 16  ;;  %vm16896_vm10 = vsmask.f32 256  ;;  %vm16897_vm15 = vnez %v16571_v24  ;;  %v4985_v49 = vsel %vm14574_vm2, %v3976_v27, 0.0  ;;  %vm16906_vm2 = vmmov %vm16890_vm12 }
 0x443   : > { %v5169_v55 = vsel %vm16896_vm10, %v16895_v62, %v5168_v15  ;;  %v16898_v46 = vsel %vm16897_vm15, %v13888_v35, %v13798_v56  ;;  %v3974_v3 = vsel %vm3878_vm8, %v3830_v29, %v3926_v50  ;;  %vm3879_vm7 = vcmp.ge.f32.partialorder %v3831_v11, 0.0 }
 0x444   : > { %vm14680_vm1 = vcmp.lt.s32.totalorder %v16898_v46, 16  ;;  %v3927_v9 = vmul.f32 0.2, %v3831_v11  ;;  %10413 = vmatprep.mubr.msk.bf16.mxu1 %vm16890_vm12, %v5169_v55  ;;  %vm16901_vm3 = vnez %v16575_v5  ;;  %v4983_v35 = vsel %vm14588_vm13, %v3974_v3, 0.0  ;;  %vm16909_vm13 = vmmov %vm16906_vm2 }
 0x445   : > { %v16902_v24 = vsel %vm16901_vm3, %v13899_v18, %v13807_v30  ;;  %v3977_v32 = vsel %vm3881_vm11, %v3833_v25, %v3929_v22  ;;  %vm16905_vm15 = vsmask.f32 256  ;;  %v14702_v29 = vshrl.u32 %v14670_v44, 16  ;;  %v10379_v30 = vpop.f32.mrb[32].mxu0  ;;  %vm16914_vm11 = vmmov %vm16906_vm2 }
 0x446   : > { %vm14694_vm10 = vcmp.lt.s32.totalorder %v16902_v24, 16  ;;  %v5177_v41 = vsel %vm16905_vm15, %v5165_v59, %v5176_v23  ;;  %v4986_v15 = vsel %vm14602_vm0, %v3977_v32, 0.0  ;;  %v3975_v5 = vsel %vm3879_vm7, %v3831_v11, %v3927_v9  ;;  %v3684_v50 = vpop.f32.mrb[33].mxu0 }
 0x447   : > { %10414 = vmatmul.mubr.msk.bf16.gmra.mrb[16].mxu1 %vm16906_vm2, %v5177_v41  ;;  %v14708_v18 = vshll.u32 %v14670_v44, 16  ;;  %v14711_v57 = vshrl.u32 %v14684_v63, 16  ;;  %v5023_v51 = vpack.c.bf16 %v4986_v15, %v4985_v49  ;;  %v4984_v59 = vsel %vm14616_vm4, %v3975_v5, 0.0  ;;  %v10380_v31 = vpop.f32.mrb[34].mxu0 }
 0x448   : > { %v3836_v25 = vadd.f32 %v10379_v30, %v14012_v10  ;;  %v5181_v48 = vrot.slane %v14702_v29, 7  ;;  %v5022_v23 = vpack.c.bf16 %v4984_v59, %v4983_v35  ;;  %v3834_v11 = vadd.f32 %v14012_v10, %v3684_v50  ;;  %v3687_v55 = vpop.f32.mrb[35].mxu0 }
 0x449   : > { %16907 = vst [vmem:[#allocation22_spill] sm:$0xff] %v14711_v57  ;;  %v5189_v27 = vrot.slane %v14711_v57, 7  ;;  %v14720_v22 = vshll.u32 %v14684_v63, 16  ;;  %5047 = vst.msk [vmem:[#allocation2 + $0x88] sm:$0xff] %vm16909_vm13, %v5023_v51  ;;  %v3837_v47 = vadd.f32 %v10380_v31, %v14012_v10  ;;  %vm16910_vm4 = vnez %v16578_v20 }
 0x44a   : > { %vm3884_vm0 = vcmp.ge.f32.partialorder %v3836_v25, 0.0  ;;  %v3932_v62 = vmul.f32 0.2, %v3836_v25  ;;  %v5184_v46 = vor.u32 %v14708_v18, %v5181_v48  ;;  %v16911_v49 = vsel %vm16910_vm4, %v13910_v53, %v13811_v58  ;;  %5046 = vst.msk [vmem:[#allocation2 + $0x80] sm:$0xff] %vm16914_vm11, %v5022_v23  ;;  %v14748_v53 = vld [vmem:[#allocation2 + $0x70] sm:$0xff] }
 0x44b   : > { %16908 = vst [vmem:[#allocation34_spill] sm:$0xff] %v14720_v22  ;;  %vm14730_vm8 = vcmp.lt.s32.totalorder %v16911_v49, 16  ;;  %vm3882_vm7 = vcmp.ge.f32.partialorder %v3834_v11, 0.0  ;;  %v3930_v9 = vmul.f32 0.2, %v3834_v11  ;;  %v3835_v24 = vadd.f32 %v14012_v10, %v3687_v55 }
 0x44c   : > { %v5192_v35 = vor.u32 %v14720_v22, %v5189_v27  ;;  %vm16915_vm12 = vnez %v16582_v19  ;;  %v3980_v32 = vsel %vm3884_vm0, %v3836_v25, %v3932_v62  ;;  %vm3885_vm15 = vcmp.ge.f32.partialorder %v3837_v47, 0.0 }
 0x44d   : > { %v16916_v20 = vsel %vm16915_vm12, %v13936_v45, %v13820_v14  ;;  %v3933_v41 = vmul.f32 0.2, %v3837_v47  ;;  %vm16919_vm2 = vsmask.f32 256  ;;  %vm16920_vm13 = vnez %v16584_v17  ;;  %v14762_v14 = vld [vmem:[#allocation2 + $0x78] sm:$0xff]  ;;  %v16925_v17 = vld [vmem:[#allocation81_spill] sm:$0xff] }
 0x44e   : > { %vm14744_vm3 = vcmp.lt.s32.totalorder %v16916_v20, 16  ;;  %v5185_v15 = vsel %vm16919_vm2, %v5173_v13, %v5184_v46  ;;  %v16921_v19 = vsel %vm16920_vm13, %v13939_v16, %v13837_v54  ;;  %v4989_v5 = vsel %vm14652_vm6, %v3980_v32, 0.0  ;;  %vm16930_vm6 = vmmov %vm16914_vm11  ;;  %v16935_v32 = vld [vmem:[#allocation84_spill] sm:$0xff] }
 0x44f   : > { %vm14758_vm4 = vcmp.lt.s32.totalorder %v16921_v19, 16  ;;  %v3978_v30 = vsel %vm3882_vm7, %v3834_v11, %v3930_v9  ;;  %vm3883_vm0 = vcmp.ge.f32.partialorder %v3835_v24, 0.0  ;;  %v3931_v51 = vmul.f32 0.2, %v3835_v24  ;;  %10417 = vmatprep.mubr.msk.bf16.mxu1 %vm16914_vm11, %v5185_v15  ;;  %v16938_v15 = vld [vmem:[#allocation82_spill] sm:$0xff] }
 0x450   : > { %vm16924_vm12 = vnez %v16587_v33  ;;  %v4987_v54 = vsel %vm14666_vm14, %v3978_v30, 0.0  ;;  %v3981_v59 = vsel %vm3885_vm15, %v3837_v47, %v3933_v41  ;;  %vm16929_vm13 = vsmask.f32 256  ;;  %vm16934_vm14 = vmmov %vm16930_vm6  ;;  %v16937_v41 = vld [vmem:[#allocation85_spill] sm:$0xff] }
 0x451   : > { %v16926_v13 = vsel %vm16924_vm12, %v13948_v40, %v16925_v17  ;;  %v5193_v2 = vsel %vm16929_vm13, %v5181_v48, %v5192_v35  ;;  %v14780_v25 = vshrl.u32 %v14748_v53, 16  ;;  %v4990_v50 = vsel %vm14680_vm1, %v3981_v59, 0.0  ;;  %v10383_v40 = vpop.f32.mrb[36].mxu0  ;;  %vm16942_vm15 = vmmov %vm16930_vm6  ;;  %v16946_v59 = vld [vmem:[#allocation83_spill] sm:$0xff] }
 0x452   : > { %vm14772_vm2 = vcmp.lt.s32.totalorder %v16926_v13, 16  ;;  %v3979_v33 = vsel %vm3883_vm0, %v3835_v24, %v3931_v51  ;;  %10418 = vmatmul.mubr.msk.bf16.gmra.mrb[20].mxu1 %vm16930_vm6, %v5193_v2  ;;  %v14786_v23 = vshll.u32 %v14748_v53, 16  ;;  %v14789_v11 = vshrl.u32 %v14762_v14, 16  ;;  %v3700_v62 = vpop.f32.mrb[37].mxu0  ;;  %v16943_v13 = vld [vmem:[#allocation87_spill] sm:$0xff] }
 0x453   : > { %v5025_v7 = vpack.c.bf16 %v4990_v50, %v4989_v5  ;;  %v4988_v48 = vsel %vm14694_vm10, %v3979_v33, 0.0  ;;  %v3840_v31 = vadd.f32 %v10383_v40, %v14012_v10  ;;  %v5197_v21 = vrot.slane %v14780_v25, 7  ;;  %v10384_v46 = vpop.f32.mrb[38].mxu0  ;;  %v14826_v33 = vld [vmem:[#allocation2 + $0x80] sm:$0xff] }
 0x454   : > { %16931 = vst [vmem:[#allocation33_spill] sm:$0xff] %v14786_v23  ;;  %16932 = vst [vmem:[#allocation3_spill] sm:$0xff] %v14789_v11  ;;  %v5024_v47 = vpack.c.bf16 %v4988_v48, %v4987_v54  ;;  %v3838_v55 = vadd.f32 %v14012_v10, %v3700_v62  ;;  %v5205_v49 = vrot.slane %v14789_v11, 7  ;;  %v14798_v9 = vshll.u32 %v14762_v14, 16  ;;  %v3703_v35 = vpop.f32.mrb[39].mxu0  ;;  %v16945_v54 = vld [vmem:[#allocation86_spill] sm:$0xff] }
 0x455   : > { %5049 = vst.msk [vmem:[#allocation2 + $0x98] sm:$0xff] %vm16934_vm14, %v5025_v7  ;;  %vm3888_vm1 = vcmp.ge.f32.partialorder %v3840_v31, 0.0  ;;  %v3936_v24 = vmul.f32 0.2, %v3840_v31  ;;  %v3841_v56 = vadd.f32 %v10384_v46, %v14012_v10  ;;  %v5200_v20 = vor.u32 %v14786_v23, %v5197_v21  ;;  %v14840_v46 = vld [vmem:[#allocation2 + $0x88] sm:$0xff] }
 0x456   : > { %16933 = vst [vmem:[#allocation38_spill] sm:$0xff] %v14798_v9  ;;  %vm16936_vm10 = vnez %v16935_v32  ;;  %5048 = vst.msk [vmem:[#allocation2 + $0x90] sm:$0xff] %vm16942_vm15, %v5024_v47  ;;  %vm3886_vm0 = vcmp.ge.f32.partialorder %v3838_v55, 0.0  ;;  %v3934_v30 = vmul.f32 0.2, %v3838_v55  ;;  %v3839_v51 = vadd.f32 %v14012_v10, %v3703_v35 }
 0x457   : > { %v16939_v19 = vsel %vm16936_vm10, %v16937_v41, %v16938_v15  ;;  %v5208_v17 = vor.u32 %v14798_v9, %v5205_v49  ;;  %vm16944_vm11 = vnez %v16943_v13  ;;  %v3984_v40 = vsel %vm3888_vm1, %v3840_v31, %v3936_v24  ;;  %16954 = vst [vmem:[#allocation35_spill] sm:$0xff] %v14840_v46  ;;  %vm16955_vm10 = vmmov %vm16942_vm15 }
 0x458   : > { %vm14808_vm7 = vcmp.lt.s32.totalorder %v16939_v19, 16  ;;  %v16947_v2 = vsel %vm16944_vm11, %v16945_v54, %v16946_v59  ;;  %vm3889_vm13 = vcmp.ge.f32.partialorder %v3841_v56, 0.0  ;;  %v3937_v7 = vmul.f32 0.2, %v3841_v56 }
 0x459   : > { %vm14822_vm12 = vcmp.lt.s32.totalorder %v16947_v2, 16  ;;  %vm16950_vm6 = vsmask.f32 256  ;;  %v16951_v62 = vsel %vm14141_vm5, %v14067_v60, %v13966_v43  ;;  %v4993_v31 = vsel %vm14730_vm8, %v3984_v40, 0.0  ;;  %vm16961_vm8 = vmmov %vm16955_vm10 }
 0x45a   : > { %v5201_v48 = vsel %vm16950_vm6, %v5189_v27, %v5200_v20  ;;  %vm14836_vm14 = vcmp.lt.s32.totalorder %v16951_v62, 16  ;;  %v3982_v24 = vsel %vm3886_vm0, %v3838_v55, %v3934_v30  ;;  %vm3887_vm1 = vcmp.ge.f32.partialorder %v3839_v51, 0.0  ;;  %vm16959_vm15 = vmmov %vm16950_vm6  ;;  %v16969_v62 = vld [vmem:[#allocation6_spill] sm:$0xff] }
 0x45b   : > { %v3935_v35 = vmul.f32 0.2, %v3839_v51  ;;  %10421 = vmatprep.mubr.msk.bf16.mxu1 %vm16955_vm10, %v5201_v48  ;;  %v16956_v6 = vsel %vm14150_vm9, %v14104_v52, %v14041_v38  ;;  %v4991_v60 = vsel %vm14744_vm3, %v3982_v24, 0.0  ;;  %v3985_v27 = vsel %vm3889_vm13, %v3841_v56, %v3937_v7  ;;  %v10387_v38 = vpop.f32.mrb[40].mxu0  ;;  %vm16965_vm9 = vmmov %vm16961_vm8  ;;  %v16967_v48 = vld [vmem:[#allocation15_spill] sm:$0xff] }
 0x45c   : > { %vm14850_vm5 = vcmp.lt.s32.totalorder %v16956_v6, 16  ;;  %v5209_v3 = vsel %vm16959_vm15, %v5197_v21, %v5208_v17  ;;  %v14858_v55 = vshrl.u32 %v14826_v33, 16  ;;  %v4994_v20 = vsel %vm14758_vm4, %v3985_v27, 0.0  ;;  %v3716_v41 = vpop.f32.mrb[41].mxu0  ;;  %vm16966_vm4 = vmmov %vm16961_vm8 }
 0x45d   : > { %v3983_v34 = vsel %vm3887_vm1, %v3839_v51, %v3935_v35  ;;  %10422 = vmatmul.mubr.msk.bf16.gmra.mrb[24].mxu1 %vm16961_vm8, %v5209_v3  ;;  %v14864_v52 = vshll.u32 %v14826_v33, 16  ;;  %v14867_v32 = vshrl.u32 %v14840_v46, 16  ;;  %v5027_v58 = vpack.c.bf16 %v4994_v20, %v4993_v31  ;;  %v10388_v30 = vpop.f32.mrb[42].mxu0  ;;  %v16970_v31 = vld [vmem:[#allocation88_spill] sm:$0xff]  ;;  %v14895_v6 = vld [vmem:[#allocation2 + $0x90] sm:$0xff] }
 0x45e   : > { %16960 = vst [vmem:[#allocation4_spill] sm:$0xff] %v14858_v55  ;;  %v4992_v21 = vsel %vm14772_vm2, %v3983_v34, 0.0  ;;  %v3844_v56 = vadd.f32 %v10387_v38, %v14012_v10  ;;  %v5213_v45 = vrot.slane %v14858_v55, 7  ;;  %v3842_v19 = vadd.f32 %v14012_v10, %v3716_v41  ;;  %v3719_v54 = vpop.f32.mrb[43].mxu0  ;;  %16974 = vst [vmem:[#allocation46_spill] sm:$0xff] %v14895_v6  ;;  %v16975_v3 = vld [vmem:[#allocation9_spill] sm:$0xff] }
 0x45f   : > { %16962 = vst [vmem:[#allocation40_spill] sm:$0xff] %v14864_v52  ;;  %16963 = vst [vmem:[#allocation36_spill] sm:$0xff] %v14867_v32  ;;  %v5026_v15 = vpack.c.bf16 %v4992_v21, %v4991_v60  ;;  %v5221_v51 = vrot.slane %v14867_v32, 7  ;;  %v14876_v17 = vshll.u32 %v14840_v46, 16  ;;  %v3845_v16 = vadd.f32 %v10388_v30, %v14012_v10  ;;  %v16977_v20 = vld [vmem:[#allocation8_spill] sm:$0xff]  ;;  %v16978_v34 = vld [vmem:[#allocation89_spill] sm:$0xff] }
 0x460   : > { %5051 = vst.msk [vmem:[#allocation2 + $0xa8] sm:$0xff] %vm16965_vm9, %v5027_v58  ;;  %vm3892_vm3 = vcmp.ge.f32.partialorder %v3844_v56, 0.0  ;;  %v3940_v13 = vmul.f32 0.2, %v3844_v56  ;;  %v5216_v59 = vor.u32 %v14864_v52, %v5213_v45  ;;  %vm3890_vm2 = vcmp.ge.f32.partialorder %v3842_v19, 0.0  ;;  %v16982_v21 = vld [vmem:[#allocation13_spill] sm:$0xff] }
 0x461   : > { %16964 = vst [vmem:[#allocation7_spill] sm:$0xff] %v14876_v17  ;;  %5050 = vst.msk [vmem:[#allocation2 + $0xa0] sm:$0xff] %vm16966_vm4, %v5026_v15  ;;  %v3938_v2 = vmul.f32 0.2, %v3842_v19  ;;  %v3843_v40 = vadd.f32 %v14012_v10, %v3719_v54  ;;  %v5224_v7 = vor.u32 %v14876_v17, %v5221_v51  ;;  %vm16968_vm0 = vnez %v16967_v48  ;;  %v16984_v41 = vld [vmem:[#allocation10_spill] sm:$0xff]  ;;  %v10391_v5 = vpop.f32.mrb[44].mxu0 }
 0x462   : > { %v16971_v24 = vsel %vm16968_vm0, %v16969_v62, %v16970_v31  ;;  %v3988_v60 = vsel %vm3892_vm3, %v3844_v56, %v3940_v13  ;;  %vm3893_vm13 = vcmp.ge.f32.partialorder %v3845_v16, 0.0  ;;  %v3941_v27 = vmul.f32 0.2, %v3845_v16  ;;  %v16985_v15 = vld [vmem:[#allocation18_spill] sm:$0xff]  ;;  %vm16990_vm3 = vmmov %vm16966_vm4 }
 0x463   : > { %vm14891_vm11 = vcmp.lt.s32.totalorder %v16971_v24, 16  ;;  %v5217_v10 = vsel %vm16950_vm6, %v5205_v49, %v5216_v59  ;;  %vm16976_vm1 = vnez %v16975_v3  ;;  %vm16983_vm15 = vnez %v16982_v21  ;;  %v14918_v13 = vld [vmem:[#allocation2 + $0x98] sm:$0xff]  ;;  %vm16991_vm4 = vmmov %vm16950_vm6 }
 0x464   : > { %v16979_v38 = vsel %vm16976_vm1, %v16977_v20, %v16978_v34  ;;  %v16986_v56 = vsel %vm16983_vm15, %v16984_v41, %v16985_v15  ;;  %16989 = vst [vmem:[#allocation48_spill] sm:$0xff] %v14918_v13  ;;  %v4997_v49 = vsel %vm14808_vm7, %v3988_v60, 0.0  ;;  %v3986_v54 = vsel %vm3890_vm2, %v3842_v19, %v3938_v2  ;;  %10425 = vmatprep.mubr.msk.bf16.mxu1 %vm16990_vm3, %v5217_v10  ;;  %vm16993_vm0 = vmmov %vm16990_vm3 }
 0x465   : > { %vm14905_vm10 = vcmp.lt.s32.totalorder %v16979_v38, 16  ;;  %vm14914_vm8 = vcmp.lt.s32.totalorder %v16986_v56, 16  ;;  %vm3891_vm9 = vcmp.ge.f32.partialorder %v3843_v40, 0.0  ;;  %v3939_v59 = vmul.f32 0.2, %v3843_v40  ;;  %vm16997_vm7 = vmmov %vm16993_vm0 }
 0x466   : > { %v4995_v48 = vsel %vm14822_vm12, %v3986_v54, 0.0  ;;  %v3989_v62 = vsel %vm3893_vm13, %v3845_v16, %v3941_v27  ;;  %v5225_v31 = vsel %vm16991_vm4, %v5213_v45, %v5224_v7  ;;  %v14927_v24 = vshrl.u32 %v14895_v6, 16  ;;  %v11819_v16 = vld [vmem:[%s16030_s2] ss:$0 sm:$0xff]  ;;  %v3732_v7 = vpop.f32.mrb[45].mxu0  ;;  %vm17000_vm13 = vmmov %vm16991_vm4 }
 0x467   : > { %v4998_v3 = vsel %vm14836_vm14, %v3989_v62, 0.0  ;;  %v3987_v20 = vsel %vm3891_vm9, %v3843_v40, %v3939_v59  ;;  %10426 = vmatmul.mubr.msk.bf16.gmra.mrb[28].mxu1 %vm16993_vm0, %v5225_v31  ;;  %v14933_v19 = vshll.u32 %v14895_v6, 16  ;;  %v14936_v2 = vshrl.u32 %v14918_v13, 16  ;;  %v10392_v10 = vpop.f32.mrb[46].mxu0  ;;  %vm16998_vm14 = vmmov %vm16993_vm0  ;;  %v17033_v6 = vld [vmem:[#allocation80_spill] sm:$0xff] }
 0x468   : > { %16992 = vst [vmem:[#allocation37_spill] sm:$0xff] %v14927_v24  ;;  %v5029_v50 = vpack.c.bf16 %v4998_v3, %v4997_v49  ;;  %v4996_v45 = vsel %vm14850_vm5, %v3987_v20, 0.0  ;;  %v3848_v47 = vadd.f32 %v11819_v16, %v10391_v5  ;;  %v5229_v40 = vrot.slane %v14927_v24, 7  ;;  %v3735_v41 = vpop.f32.mrb[47].mxu0  ;;  %v14952_v59 = vld [vmem:[#allocation2 + $0xa0] sm:$0xff]  ;;  %v14957_v3 = vld [vmem:[#allocation2 + $0xa8] sm:$0xff]  ;;  %vm17004_vm9 = vmmov %vm16993_vm0 }
 0x469   : > { %16994 = vst [vmem:[#allocation49_spill] sm:$0xff] %v14933_v19  ;;  %16995 = vst [vmem:[#allocation50_spill] sm:$0xff] %v14936_v2  ;;  %v5028_v60 = vpack.c.bf16 %v4996_v45, %v4995_v48  ;;  %v3846_v27 = vadd.f32 %v11819_v16, %v3732_v7  ;;  %v5237_v34 = vrot.slane %v14936_v2, 7  ;;  %v14946_v38 = vshll.u32 %v14918_v13, 16 }
 0x46a   : > { %5053 = vst.msk [vmem:[#allocation2 + $0xb8] sm:$0xff] %vm16997_vm7, %v5029_v50  ;;  %vm3896_vm12 = vcmp.ge.f32.partialorder %v3848_v47, 0.0  ;;  %v3944_v43 = vmul.f32 0.2, %v3848_v47  ;;  %v3849_v21 = vadd.f32 %v11819_v16, %v10392_v10  ;;  %v5232_v15 = vor.u32 %v14933_v19, %v5229_v40  ;;  %16999 = vst [vmem:[#allocation51_spill] sm:$0xff] %v14952_v59 }
 0x46b   : > { %16996 = vst [vmem:[#allocation39_spill] sm:$0xff] %v14946_v38  ;;  %5052 = vst.msk [vmem:[#allocation2 + $0xb0] sm:$0xff] %vm16998_vm14, %v5028_v60  ;;  %vm3894_vm5 = vcmp.ge.f32.partialorder %v3846_v27, 0.0  ;;  %v3942_v56 = vmul.f32 0.2, %v3846_v27  ;;  %v3847_v49 = vadd.f32 %v11819_v16, %v3735_v41  ;;  %v5240_v54 = vor.u32 %v14946_v38, %v5237_v34 }
 0x46c   : > { %v3992_v48 = vsel %vm3896_vm12, %v3848_v47, %v3944_v43  ;;  %vm3897_vm2 = vcmp.ge.f32.partialorder %v3849_v21, 0.0  ;;  %v3945_v62 = vmul.f32 0.2, %v3849_v21  ;;  %v5233_v31 = vsel %vm17000_vm13, %v5221_v51, %v5232_v15  ;;  %17001 = vst [vmem:[#allocation52_spill] sm:$0xff] %v14957_v3  ;;  %vm17005_vm3 = vmmov %vm16991_vm4 }
 0x46d   : > { %v3990_v20 = vsel %vm3894_vm5, %v3846_v27, %v3942_v56  ;;  %vm3895_vm6 = vcmp.ge.f32.partialorder %v3847_v49, 0.0  ;;  %v3943_v5 = vmul.f32 0.2, %v3847_v49  ;;  %vm17002_vm1 = vnez %v16845_v61  ;;  %10429 = vmatprep.mubr.msk.bf16.mxu1 %vm17004_vm9, %v5233_v31  ;;  %vm17006_vm4 = vmmov %vm16993_vm0 }
 0x46e   : > { %v17003_v50 = vsel %vm17002_vm1, %v14385_v0, %v14287_v26  ;;  %v5001_v45 = vsel %vm14891_vm11, %v3992_v48, 0.0  ;;  %v3993_v16 = vsel %vm3897_vm2, %v3849_v21, %v3945_v62  ;;  %v5241_v47 = vsel %vm17005_vm3, %v5229_v40, %v5240_v54  ;;  %vm17009_vm11 = vmmov %vm16993_vm0 }
 0x46f   : > { %vm4856_vm15 = vcmp.lt.s32.totalorder %v17003_v50, 16  ;;  %v14969_v51 = vshrl.u32 %v14952_v59, 16  ;;  %v4999_v7 = vsel %vm14905_vm10, %v3990_v20, 0.0  ;;  %v5002_v61 = vsel %vm14914_vm8, %v3993_v16, 0.0  ;;  %10430 = vmatmul.mubr.msk.bf16.gmra.mrb[32].mxu1 %vm17006_vm4, %v5241_v47  ;;  %vm17012_vm10 = vmmov %vm16993_vm0 }
 0x470   : > { %v3991_v60 = vsel %vm3895_vm6, %v3847_v49, %v3943_v5  ;;  %v14977_v26 = vshrl.u32 %v14957_v3, 16  ;;  %v5031_v0 = vpack.c.bf16 %v5002_v61, %v5001_v45  ;;  %v14981_v40 = vshll.u32 %v14952_v59, 16  ;;  %vm17013_vm8 = vmmov %vm17005_vm3  ;;  %v15009_v5 = vld [vmem:[#allocation2] sm:$0xff] }
 0x471   : > { %v5000_v35 = vsel %vm4856_vm15, %v3991_v60, 0.0  ;;  %v5245_v27 = vrot.slane %v14969_v51, 7  ;;  %v14985_v43 = vshll.u32 %v14957_v3, 16  ;;  %v14987_v30 = vld [vmem:[#allocation2 + $0xb8] sm:$0xff]  ;;  %vm17014_vm7 = vmmov %vm17005_vm3  ;;  %v16248_v47 = vshrl.u32 %v15009_v5, 16 }
 0x472   : > { %v5030_v10 = vpack.c.bf16 %v5000_v35, %v4999_v7  ;;  %v5253_v58 = vrot.slane %v14977_v26, 7  ;;  %17008 = vst [vmem:[#allocation53_spill] sm:$0xff] %v14987_v30  ;;  %5055 = vst.msk [vmem:[#allocation2 + $0xc8] sm:$0xff] %vm17009_vm11, %v5031_v0  ;;  %v14991_v41 = vld [vmem:[#allocation2 + $0xb0] sm:$0xff]  ;;  %v14994_v15 = vshrl.u32 %v14987_v30, 16  ;;  %v15014_v45 = vshll.u32 %v14987_v30, 16 }
 0x473   : > { %17007 = vst [vmem:[#allocation41_spill] sm:$0xff] %v14985_v43  ;;  %v5248_v21 = vor.u32 %v14981_v40, %v5245_v27  ;;  %17010 = vst [vmem:[#allocation54_spill] sm:$0xff] %v14991_v41  ;;  %v14999_v49 = vshrl.u32 %v14991_v41, 16  ;;  %v15005_v62 = vshll.u32 %v14991_v41, 16  ;;  %v16251_v7 = vshll.u32 %v15009_v5, 16 }
 0x474   : > { %17011 = vst [vmem:[#allocation42_spill] sm:$0xff] %v14994_v15  ;;  %5054 = vst.msk [vmem:[#allocation2 + $0xc0] sm:$0xff] %vm17012_vm10, %v5030_v10  ;;  %v5256_v56 = vor.u32 %v14985_v43, %v5253_v58  ;;  %v5269_v20 = vrot.slane %v14994_v15, 7  ;;  %v17026_v10 = vld [vmem:[#allocation23_spill] sm:$0xff]  ;;  %vm5599_vm15 = vsmask.f32 4352 }
 0x475   : > { %v5249_v54 = vsel %vm17013_vm8, %v5237_v34, %v5248_v21  ;;  %v5261_v48 = vrot.slane %v14999_v49, 7  ;;  %vm17015_vm12 = vmmov %vm16993_vm0  ;;  %17016 = vst [vmem:[#allocation55_spill] sm:$0xff] %v15014_v45  ;;  %v5608_v30 = vrot.slane %v17026_v10, 3  ;;  %v17032_v10 = vld [vmem:[#allocation30_spill] sm:$0xff] }
 0x476   : > { %10433 = vmatprep.mubr.msk.bf16.mxu1 %vm16993_vm0, %v5249_v54  ;;  %v5257_v31 = vsel %vm17014_vm7, %v5245_v27, %v5256_v56  ;;  %vm17017_vm14 = vmmov %vm17005_vm3  ;;  %v5272_v61 = vor.u32 %v15014_v45, %v5269_v20  ;;  %v15031_v27 = vld [vmem:[#allocation2 + $0x8] sm:$0xff]  ;;  %v5603_v56 = vrot.slane %v16248_v47, 3  ;;  %v5606_v54 = vrot.slane %v16251_v7, 4 }
 0x477   : > { %10434 = vmatmul.mubr.msk.bf16.gmra.mrb[36].mxu1 %vm17015_vm12, %v5257_v31  ;;  %v5264_v50 = vor.u32 %v15005_v62, %v5261_v48  ;;  %vm17019_vm5 = vmmov %vm16993_vm0  ;;  %v17027_v41 = vshll.u32 %v15031_v27, 16  ;;  %v5614_v13 = vrot.slane %v17032_v10, 3 }
 0x478   : > { %vm17024_vm2 = vmmov %vm17005_vm3  ;;  %v5607_v59 = vor.u32 %v5606_v54, %v5603_v56 }
 0x479   : > { %v5265_v34 = vsel %vm17017_vm14, %v5253_v58, %v5264_v50  ;;  %v15017_v16 = vld [vmem:[#allocation2 + $0xc8] sm:$0xff]  ;;  %v5273_v31 = vsel %vm17024_vm2, %v5261_v48, %v5272_v61  ;;  %vm17025_vm13 = vmmov %vm16993_vm0 }
 0x47a   : > { %17018 = vst [vmem:[#allocation56_spill] sm:$0xff] %v15017_v16  ;;  %10437 = vmatprep.mubr.msk.bf16.mxu1 %vm17019_vm5, %v5265_v34  ;;  %v15026_v0 = vshrl.u32 %v15017_v16, 16  ;;  %v15050_v3 = vshll.u32 %v15017_v16, 16  ;;  %vm17029_vm6 = vmmov %vm17024_vm2  ;;  %v17035_v16 = vld [vmem:[#allocation11_spill] sm:$0xff] }
 0x47b   : > { %v15023_v60 = vld [vmem:[#allocation2 + $0xc0] sm:$0xff]  ;;  %vm17030_vm1 = vmmov %vm16993_vm0  ;;  %v5618_v46 = vrot.slane %v17035_v16, 3  ;;  %v17042_v16 = vld [vmem:[#allocation24_spill] sm:$0xff] }
 0x47c   : > { %17020 = vst [vmem:[#allocation43_spill] sm:$0xff] %v15023_v60  ;;  %17021 = vst [vmem:[#allocation57_spill] sm:$0xff] %v15026_v0  ;;  %v15029_v35 = vshrl.u32 %v15023_v60, 16  ;;  %v15036_v21 = vshll.u32 %v15023_v60, 16  ;;  %v5285_v50 = vrot.slane %v15026_v0, 7  ;;  %v5611_v60 = vrot.slane %v17027_v41, 4 }
 0x47d   : > { %17028 = vst [vmem:[#allocation60_spill] sm:$0xff] %v15050_v3  ;;  %vm17031_vm9 = vmmov %vm17024_vm2  ;;  %v5615_v41 = vrot.slane %v17033_v6, 4 }
 0x47e   : > { %17022 = vst [vmem:[#allocation58_spill] sm:$0xff] %v15029_v35  ;;  %v5277_v58 = vrot.slane %v15029_v35, 7  ;;  %17023 = vst [vmem:[#allocation44_spill] sm:$0xff] %v15036_v21  ;;  %v5288_v48 = vor.u32 %v15050_v3, %v5285_v50  ;;  %v5612_v61 = vor.u32 %v5611_v60, %v5608_v30  ;;  %v17038_v60 = vld [vmem:[#allocation31_spill] sm:$0xff]  ;;  %v17039_v50 = vld [vmem:[#allocation17_spill] sm:$0xff] }
 0x47f   : > { %10438 = vmatmul.mubr.msk.bf16.gmra.mrb[40].mxu1 %vm17025_vm13, %v5273_v31  ;;  %vm17034_vm3 = vmmov %vm16993_vm0 }
 0x480   : > { %v5280_v34 = vor.u32 %v15036_v21, %v5277_v58  ;;  %v5613_v31 = vsel %vm5599_vm15, %v5607_v59, %v5612_v61  ;;  %v5289_v7 = vsel %vm17031_vm9, %v5277_v58, %v5288_v48  ;;  %vm17037_vm4 = vmmov %vm16993_vm0  ;;  %v11804_v59 = vld [vmem:[%s16031_s3 + $0x68] sm:$0xff]   ;;  %v5622_v58 = vrot.slane %v17038_v60, 3  ;;  %v17041_v48 = vld [vmem:[#allocation5_spill] sm:$0xff] }
 0x481   : > { %vm17040_vm11 = vmmov %vm16993_vm0 }
 0x482   : > { %v5281_v47 = vsel %vm17029_vm6, %v5269_v20, %v5280_v34  ;;  %v17036_v20 = vld [vmem:[#allocation12_spill] sm:$0xff]  ;;  %v5623_v34 = vrot.slane %v17039_v50, 4  ;;  %vm17044_vm10 = vmmov %vm16993_vm0 }
 0x483   : > { %10441 = vmatprep.mubr.msk.bf16.mxu1 %vm17030_vm1, %v5281_v47  ;;  %v5619_v56 = vrot.slane %v17036_v20, 4  ;;  %v5616_v47 = vor.u32 %v5615_v41, %v5614_v13  ;;  %v5626_v20 = vrot.slane %v17041_v48, 3  ;;  %v17043_v13 = vld [vmem:[#allocation16_spill] sm:$0xff]  ;;  %vm17047_vm8 = vmmov %vm16993_vm0  ;;  %v5634_v48 = vrot.slane %v14475_v37, 3  ;;  %v17051_v37 = vld [vmem:[#allocation21_spill] sm:$0xff] }
 0x484   : > { %vm17050_vm7 = vmmov %vm16993_vm0  ;;  %v5643_v50 = vrot.slane %v17051_v37, 4  ;;  %v5650_v37 = vrot.slane %v14633_v42, 3  ;;  %v5659_v42 = vrot.slane %v14720_v22, 4  ;;  %v5666_v22 = vrot.slane %v14789_v11, 3 }
 0x485   : > { %v5620_v54 = vor.u32 %v5619_v56, %v5618_v46  ;;  %v5617_v30 = vsel %vm5599_vm15, %v5612_v61, %v5616_v47  ;;  %v15078_v46 = vld [vmem:[%s16031_s3 + $0x10] sm:$0xff]   ;;  %v5624_v61 = vor.u32 %v5623_v34, %v5622_v58  ;;  %v17048_v34 = vld [vmem:[#allocation27_spill] sm:$0xff]  ;;  %vm17052_vm12 = vmmov %vm16993_vm0  ;;  %v5675_v11 = vrot.slane %v14876_v17, 4 }
 0x486   : > { %vm17053_vm14 = vmmov %vm16993_vm0 }
 0x487   : > { %10442 = vmatmul.mubr.msk.bf16.gmra.mrb[44].mxu1 %vm17034_vm3, %v5289_v7  ;;  %v5621_v7 = vsel %vm5599_vm15, %v5616_v47, %v5620_v54  ;;  %v15082_v56 = vsel %vm5599_vm15, %v5620_v54, %v5624_v61  ;;  %v17045_v47 = vld [vmem:[#allocation19_spill] sm:$0xff]  ;;  %vm17054_vm5 = vmmov %vm16993_vm0 }
 0x488   : > { %10449 = vmatprep.mubr.msk.bf16.mxu1 %vm17037_vm4, %v5613_v31  ;;  %v5627_v31 = vrot.slane %v17042_v16, 4  ;;  %v17046_v16 = vld [vmem:[#allocation14_spill] sm:$0xff]  ;;  %vm17055_vm2 = vmmov %vm16993_vm0 }
 0x489   : > { %vm17056_vm13 = vmmov %vm16993_vm0 }
 0x48a   : > { %v5628_v41 = vor.u32 %v5627_v31, %v5626_v20  ;;  %v5635_v20 = vrot.slane %v14480_v28, 4  ;;  %v5638_v31 = vrot.slane %v17048_v34, 3  ;;  %v5642_v28 = vrot.slane %v14496_v4, 3  ;;  %vm17057_vm6 = vmmov %vm16993_vm0 }
 0x48b   : > { %v5651_v4 = vrot.slane %v14642_v39, 4  ;;  %v5658_v39 = vrot.slane %v14711_v57, 3  ;;  %v5667_v57 = vrot.slane %v14798_v9, 4  ;;  %vm17058_vm1 = vmmov %vm16993_vm0  ;;  %v5674_v9 = vrot.slane %v14867_v32, 3 }
 0x48c   : > { %v5636_v54 = vor.u32 %v5635_v20, %v5634_v48  ;;  %v5647_v20 = vrot.slane %v14630_v12, 4  ;;  %vm17059_vm9 = vmmov %vm16993_vm0  ;;  %v5679_v32 = vrot.slane %v14933_v19, 4 }
 0x48d   : > { %vm17060_vm3 = vmmov %vm16993_vm0 }
 0x48e   : > { %vm17062_vm4 = vmmov %vm16993_vm0 }
 0x48f   : > { %10450 = vmatmul.mubr.msk.bf16.vlgmr.msra.gmra.mrb[0].mxu1 %vm17040_vm11, %v5617_v30  ;;  %v5630_v30 = vrot.slane %v17045_v47, 3  ;;  %vm17063_vm11 = vmmov %vm16993_vm0 }
 0x490   : > { %10498 = vmatpush3.bf16.msra.mxu1 %v17043_v13  ;;  %10453 = vmatprep.mubr.msk.bf16.mxu1 %vm17044_vm10, %v5621_v7  ;;  %v5631_v13 = vrot.slane %v17046_v16, 4  ;;  %v15089_v7 = vsel %vm5599_vm15, %v5624_v61, %v5628_v41  ;;  %v17049_v16 = vld [vmem:[#allocation28_spill] sm:$0xff]  ;;  %vm17065_vm10 = vmmov %vm16993_vm0 }
 0x491   : > { %10499 = vmatprep.subr.bf16.mxu1 %v11804_v59  ;;  %v5639_v47 = vrot.slane %v17049_v16, 4 }
 0x493   : > { %v5640_v48 = vor.u32 %v5639_v47, %v5638_v31  ;;  %v5655_v31 = vrot.slane %v14708_v18, 4 }
 0x494   : > { %10500 = vmatpush3.bf16.msra.mxu1 %v11804_v59  ;;  %v5632_v59 = vor.u32 %v5631_v13, %v5630_v30  ;;  %v5646_v13 = vrot.slane %v14624_v8, 3 }
 0x495   : > { %10549 = vmatprep.subr.bf16.mxu1 %v15078_v46  ;;  %v15110_v30 = vsel %vm5599_vm15, %v5636_v54, %v5640_v48 }
 0x496   : > { %v15096_v58 = vsel %vm5599_vm15, %v5628_v41, %v5632_v59  ;;  %v15103_v61 = vsel %vm5599_vm15, %v5632_v59, %v5636_v54  ;;  %v5644_v41 = vor.u32 %v5643_v50, %v5642_v28  ;;  %v5648_v28 = vor.u32 %v5647_v20, %v5646_v13 }
 0x497   : > { %10454 = vmatmul.mubr.msk.bf16.gmra.mrb[4].mxu1 %vm17047_vm8, %v15082_v56  ;;  %v5652_v50 = vor.u32 %v5651_v4, %v5650_v37  ;;  %v5654_v54 = vrot.slane %v14702_v29, 3  ;;  %v5660_v4 = vor.u32 %v5659_v42, %v5658_v39  ;;  %v5662_v13 = vrot.slane %v14780_v25, 3  ;;  %vm17066_vm8 = vmmov %vm16993_vm0 }
 0x498   : > { %10457 = vmatprep.mubr.msk.bf16.mxu1 %vm16993_vm0, %v15089_v7  ;;  %v15117_v59 = vsel %vm5599_vm15, %v5640_v48, %v5644_v41  ;;  %v15124_v47 = vsel %vm5599_vm15, %v5644_v41, %v5648_v28  ;;  %v5663_v20 = vrot.slane %v14786_v23, 4  ;;  %v5668_v39 = vor.u32 %v5667_v57, %v5666_v22  ;;  %v15165_v57 = vld [vmem:[#allocation2 + $0xd0] sm:$0xff] }
 0x499   : > { %v15131_v48 = vsel %vm5599_vm15, %v5648_v28, %v5652_v50  ;;  %v5656_v37 = vor.u32 %v5655_v31, %v5654_v54  ;;  %v5670_v54 = vrot.slane %v14858_v55, 3  ;;  %v5671_v31 = vrot.slane %v14864_v52, 4 }
 0x49a   : > { %v5664_v42 = vor.u32 %v5663_v20, %v5662_v13  ;;  %v16296_v13 = vshrl.u32 %v15165_v57, 16  ;;  %v15169_v20 = vshll.u32 %v15165_v57, 16  ;;  %v5682_v55 = vrot.slane %v14936_v2, 3 }
 0x49b   : > { %v15138_v41 = vsel %vm5599_vm15, %v5652_v50, %v5656_v37  ;;  %v15145_v28 = vsel %vm5599_vm15, %v5656_v37, %v5660_v4  ;;  %v5672_v22 = vor.u32 %v5671_v31, %v5670_v54  ;;  %v5683_v54 = vrot.slane %v14946_v38, 4 }
 0x49c   : > { %v15152_v50 = vsel %vm5599_vm15, %v5660_v4, %v5664_v42  ;;  %v15159_v37 = vsel %vm5599_vm15, %v5664_v42, %v5668_v39  ;;  %v5676_v4 = vor.u32 %v5675_v11, %v5674_v9  ;;  %17061 = vst [vmem:[#allocation59_spill] sm:$0xff] %v15169_v20  ;;  %v5678_v42 = vrot.slane %v14927_v24, 3 }
 0x49d   : > { %v5673_v52 = vsel %vm5599_vm15, %v5668_v39, %v5672_v22  ;;  %v8325_v11 = vrot.slane %v16296_v13, 4  ;;  %v8326_v9 = vrot.slane %v15169_v20, 5  ;;  %v5684_v31 = vor.u32 %v5683_v54, %v5682_v55 }
 0x49e   : > { %v5677_v17 = vsel %vm5599_vm15, %v5672_v22, %v5676_v4  ;;  %v5680_v39 = vor.u32 %v5679_v32, %v5678_v42  ;;  %v5686_v23 = vrot.slane %v14969_v51, 3  ;;  %v5687_v22 = vrot.slane %v14981_v40, 4 }
 0x49f   : > { %10458 = vmatmul.mubr.msk.bf16.gmra.mrb[8].mxu1 %vm17050_vm7, %v15096_v58  ;;  %v15182_v24 = vor.u32 %v8326_v9, %v8325_v11  ;;  %v5690_v2 = vrot.slane %v14977_v26, 3  ;;  %v5691_v13 = vrot.slane %v14985_v43, 4  ;;  %v5695_v54 = vrot.slane %v15005_v62, 4  ;;  %vm17067_vm7 = vmmov %vm16993_vm0 }
 0x4a0   : > { %10461 = vmatprep.mubr.msk.bf16.mxu1 %vm17052_vm12, %v15103_v61  ;;  %v5681_v19 = vsel %vm5599_vm15, %v5676_v4, %v5680_v39  ;;  %v5685_v38 = vsel %vm5599_vm15, %v5680_v39, %v5684_v31  ;;  %v5688_v32 = vor.u32 %v5687_v22, %v5686_v23  ;;  %v5694_v4 = vrot.slane %v14999_v49, 3  ;;  %vm17068_vm12 = vmmov %vm16993_vm0 }
 0x4a1   : > { %17064 = vst [vmem:[#allocation45_spill] sm:$0xff] %v15182_v24  ;;  %v5692_v55 = vor.u32 %v5691_v13, %v5690_v2  ;;  %v5698_v9 = vrot.slane %v14994_v15, 3  ;;  %v5699_v39 = vrot.slane %v15014_v45, 4  ;;  %v5702_v2 = vrot.slane %v15029_v35, 3 }
 0x4a2   : > { %v5689_v42 = vsel %vm5599_vm15, %v5684_v31, %v5688_v32  ;;  %v5696_v24 = vor.u32 %v5695_v54, %v5694_v4  ;;  %v5703_v13 = vrot.slane %v15036_v21, 4  ;;  %v15271_v4 = vld [vmem:[#allocation2 + $0x10] sm:$0xff] }
 0x4a3   : > { %v5693_v11 = vsel %vm5599_vm15, %v5688_v32, %v5692_v55  ;;  %v5700_v43 = vor.u32 %v5699_v39, %v5698_v9  ;;  %v6370_v54 = vrot.slane %v15271_v4, 4  ;;  %v11808_v39 = vld [vmem:[%s16031_s3 + $0x48] sm:$0xff]  }
 0x4a4   : > { %v5697_v23 = vsel %vm5599_vm15, %v5692_v55, %v5696_v24  ;;  %v5704_v22 = vor.u32 %v5703_v13, %v5702_v2  ;;  %v11806_v55 = vld [vmem:[%s16031_s3 + $0x18] sm:$0xff]   ;;  %v15287_v13 = vld [vmem:[%s16031_s3 + $0x70] sm:$0xff]  }
 0x4a5   : > { %v5701_v31 = vsel %vm5599_vm15, %v5696_v24, %v5700_v43  ;;  %v11807_v24 = vld [vmem:[%s16031_s3 + $0x40] sm:$0xff]  }
 0x4a6   : > { %v5705_v32 = vsel %vm5599_vm15, %v5700_v43, %v5704_v22  ;;  %v15246_v43 = vld [vmem:[#allocation2 + $0xd8] sm:$0xff] }
 0x4a7   : > { %10462 = vmatmul.mubr.msk.bf16.gmra.mrb[12].mxu1 %vm17053_vm14, %v15110_v30  ;;  %vm17069_vm14 = vmmov %vm16993_vm0  ;;  %17089 = vst [vmem:[#allocation62_spill] sm:$0xff] %v15246_v43 }
 0x4a8   : > { %10465 = vmatprep.mubr.msk.bf16.mxu1 %vm17054_vm5, %v15117_v59  ;;  %vm17070_vm5 = vmmov %vm16993_vm0 }
 0x4af   : > { %10466 = vmatmul.mubr.msk.bf16.gmra.mrb[16].mxu1 %vm17055_vm2, %v15124_v47  ;;  %vm17071_vm2 = vmmov %vm16993_vm0 }
 0x4b0   : > { %10469 = vmatprep.mubr.msk.bf16.mxu1 %vm17056_vm13, %v15131_v48  ;;  %vm17072_vm13 = vmmov %vm16993_vm0 }
 0x4b7   : > { %10470 = vmatmul.mubr.msk.bf16.gmra.mrb[20].mxu1 %vm17057_vm6, %v15138_v41  ;;  %vm17073_vm6 = vmmov %vm16993_vm0 }
 0x4b8   : > { %10473 = vmatprep.mubr.msk.bf16.mxu1 %vm17058_vm1, %v15145_v28  ;;  %vm17074_vm1 = vmmov %vm16993_vm0 }
 0x4bf   : > { %10474 = vmatmul.mubr.msk.bf16.gmra.mrb[24].mxu1 %vm17059_vm9, %v15152_v50  ;;  %vm17075_vm9 = vmmov %vm16993_vm0 }
 0x4c0   : > { %10477 = vmatprep.mubr.msk.bf16.mxu1 %vm17060_vm3, %v15159_v37  ;;  %vm17076_vm3 = vmmov %vm16993_vm0 }
 0x4c7   : > { %10478 = vmatmul.mubr.msk.bf16.gmra.mrb[28].mxu1 %vm17062_vm4, %v5673_v52  ;;  %vm17077_vm4 = vmmov %vm16993_vm0 }
 0x4c8   : > { %10481 = vmatprep.mubr.msk.bf16.mxu1 %vm17063_vm11, %v5677_v17  ;;  %vm17078_vm11 = vmmov %vm16993_vm0 }
 0x4cf   : > { %10482 = vmatmul.mubr.msk.bf16.gmra.mrb[32].mxu1 %vm17065_vm10, %v5681_v19  ;;  %vm17079_vm10 = vmmov %vm16993_vm0 }
 0x4d0   : > { %10485 = vmatprep.mubr.msk.bf16.mxu1 %vm17066_vm8, %v5685_v38  ;;  %vm17080_vm8 = vmmov %vm16993_vm0 }
 0x4d7   : > { %10486 = vmatmul.mubr.msk.bf16.gmra.mrb[36].mxu1 %vm16993_vm0, %v5689_v42 }
 0x4d8   : > { %10489 = vmatprep.mubr.msk.bf16.mxu1 %vm17067_vm7, %v5693_v11  ;;  %vm17081_vm7 = vmmov %vm16993_vm0 }
 0x4df   : > { %10490 = vmatmul.mubr.msk.bf16.gmra.mrb[40].mxu1 %vm17068_vm12, %v5697_v23  ;;  %vm17082_vm12 = vmmov %vm16993_vm0 }
 0x4e0   : > { %10493 = vmatprep.mubr.msk.bf16.mxu1 %vm17069_vm14, %v5701_v31  ;;  %vm17083_vm14 = vmmov %vm16993_vm0 }
 0x4e7   : > { %10494 = vmatmul.mubr.msk.bf16.gmra.mrb[44].mxu1 %vm17070_vm5, %v5705_v32  ;;  %vm17084_vm5 = vmmov %vm16993_vm0 }
 0x4e8   : > { %10501 = vmatprep.mubr.msk.bf16.mxu1 %vm17071_vm2, %v15082_v56  ;;  %vm17085_vm2 = vmmov %vm16993_vm0  ;;  %v6021_v56 = vrot.slane %v15050_v3, 4  ;;  %v17121_v3 = vld [vmem:[#allocation53_spill] sm:$0xff] }
 0x4e9   : > { %v6412_v21 = vrot.slane %v17121_v3, 4 }
 0x4ef   : > { %10502 = vmatmul.mubr.msk.bf16.vlgmr.msra.gmra.mrb[0].mxu1 %vm17072_vm13, %v15089_v7  ;;  %vm17086_vm13 = vmmov %vm16993_vm0  ;;  %v16300_v7 = vshll.u32 %v15246_v43, 16 }
 0x4f0   : > { %10550 = vmatpush3.bf16.msra.mxu1 %v15078_v46  ;;  %10505 = vmatprep.mubr.msk.bf16.mxu1 %vm17073_vm6, %v15096_v58  ;;  %vm17087_vm6 = vmmov %vm16993_vm0  ;;  %v6020_v46 = vrot.slane %v15026_v0, 3 }
 0x4f1   : > { %10551 = vmatprep.subr.bf16.mxu1 %v11806_v55 }
 0x4f2   : > { %v6022_v58 = vor.u32 %v6021_v56, %v6020_v46  ;;  %v15306_v56 = vld [vmem:[#allocation2 + $0x30] sm:$0xff] }
 0x4f4   : > { %10552 = vmatpush3.bf16.msra.mxu1 %v11806_v55 }
 0x4f5   : > { %10601 = vmatprep.subr.bf16.mxu1 %v11807_v24 }
 0x4f7   : > { %10506 = vmatmul.mubr.msk.bf16.gmra.mrb[4].mxu1 %vm17074_vm1, %v15103_v61  ;;  %vm17088_vm1 = vmmov %vm16993_vm0 }
 0x4f8   : > { %10509 = vmatprep.mubr.msk.bf16.mxu1 %vm17075_vm9, %v15110_v30  ;;  %vm17090_vm9 = vmmov %vm16993_vm0 }
 0x4ff   : > { %10510 = vmatmul.mubr.msk.bf16.gmra.mrb[8].mxu1 %vm17076_vm3, %v15117_v59  ;;  %vm17092_vm3 = vmmov %vm16993_vm0  ;;  %v6039_v59 = vrot.slane %v16300_v7, 4  ;;  %v17117_v7 = vld [vmem:[#allocation52_spill] sm:$0xff] }
 0x500   : > { %10513 = vmatprep.mubr.msk.bf16.mxu1 %vm17077_vm4, %v15124_v47  ;;  %v6023_v47 = vsel %vm5599_vm15, %v5704_v22, %v6022_v58  ;;  %vm17093_vm4 = vmmov %vm16993_vm0 }
 0x507   : > { %10514 = vmatmul.mubr.msk.bf16.gmra.mrb[12].mxu1 %vm17078_vm11, %v15131_v48  ;;  %vm17094_vm11 = vmmov %vm16993_vm0 }
 0x508   : > { %10517 = vmatprep.mubr.msk.bf16.mxu1 %vm17079_vm10, %v15138_v41  ;;  %vm6366_vm10 = vcmask 1043456  }
 0x50f   : > { %10518 = vmatmul.mubr.msk.bf16.gmra.mrb[16].mxu1 %vm17080_vm8, %v15145_v28  ;;  %v6367_v28 = vrot.slane %v15009_v5, 4  ;;  %vm17095_vm8 = vmmov %vm16993_vm0 }
 0x510   : > { %10521 = vmatprep.mubr.msk.bf16.mxu1 %vm16993_vm0, %v15152_v50  ;;  %v6368_v50 = vrot.slane %v15031_v27, 4 }
 0x517   : > { %10522 = vmatmul.mubr.msk.bf16.gmra.mrb[20].mxu1 %vm17081_vm7, %v15159_v37  ;;  %vm17097_vm7 = vmmov %vm16993_vm0 }
 0x518   : > { %10525 = vmatprep.mubr.msk.bf16.mxu1 %vm17082_vm12, %v5673_v52  ;;  %v17091_v52 = vshrl.u32 %v15165_v57, 16  ;;  %vm17098_vm12 = vmmov %vm16993_vm0 }
 0x51f   : > { %10526 = vmatmul.mubr.msk.bf16.gmra.mrb[24].mxu1 %vm17083_vm14, %v5677_v17  ;;  %v6027_v17 = vrot.slane %v17091_v52, 3  ;;  %vm17099_vm14 = vmmov %vm16993_vm0  ;;  %v6378_v52 = vrot.slane %v15306_v56, 4 }
 0x520   : > { %10529 = vmatprep.mubr.msk.bf16.mxu1 %vm17084_vm5, %v5681_v19  ;;  %v6030_v19 = vrot.slane %v15169_v20, 4  ;;  %vm17100_vm5 = vmmov %vm16993_vm0 }
 0x522   : > { %v6031_v61 = vor.u32 %v6030_v19, %v6027_v17  ;;  %v15309_v17 = vld [vmem:[#allocation2 + $0x38] sm:$0xff] }
 0x523   : > { %v6380_v19 = vrot.slane %v15309_v17, 4 }
 0x524   : > { %v6032_v48 = vsel %vm5599_vm15, %v6022_v58, %v6031_v61 }
 0x527   : > { %10530 = vmatmul.mubr.msk.bf16.gmra.mrb[28].mxu1 %vm17085_vm2, %v5685_v38  ;;  %v16301_v38 = vshrl.u32 %v15246_v43, 16  ;;  %vm17101_vm2 = vmmov %vm16993_vm0 }
 0x528   : > { %10533 = vmatprep.mubr.msk.bf16.mxu1 %vm17086_vm13, %v5689_v42  ;;  %v6369_v42 = vsel %vm6366_vm10, %v6367_v28, %v6368_v50  ;;  %vm17102_vm13 = vmmov %vm16993_vm0 }
 0x529   : > { %v6036_v30 = vrot.slane %v16301_v38, 3  ;;  %v6408_v38 = vrot.slane %v17117_v7, 4 }
 0x52b   : > { %v6040_v41 = vor.u32 %v6039_v59, %v6036_v30  ;;  %v15322_v30 = vld [vmem:[#allocation2 + $0x40] sm:$0xff] }
 0x52c   : > { %v6382_v59 = vrot.slane %v15322_v30, 4 }
 0x52d   : > { %v6041_v37 = vsel %vm5599_vm15, %v6031_v61, %v6040_v41  ;;  %vm17096_vm15 = vmmov %vm16993_vm0  ;;  %v15318_v61 = vsel %vm6366_vm10, %v6378_v52, %v6380_v19 }
 0x52e   : > { %v15329_v41 = vsel %vm6366_vm10, %v6380_v19, %v6382_v59 }
 0x52f   : > { %10534 = vmatmul.mubr.msk.bf16.gmra.mrb[32].mxu1 %vm17087_vm6, %v5693_v11  ;;  %v15274_v11 = vld [vmem:[#allocation2 + $0x18] sm:$0xff]  ;;  %vm17103_vm6 = vmmov %vm16993_vm0 }
 0x530   : > { %10537 = vmatprep.mubr.msk.bf16.mxu1 %vm17088_vm1, %v5697_v23  ;;  %v6372_v9 = vrot.slane %v15274_v11, 4  ;;  %v6371_v23 = vsel %vm6366_vm10, %v6368_v50, %v6370_v54  ;;  %v6386_v50 = vrot.slane %v14592_v1, 4  ;;  %vm17104_vm1 = vmmov %vm16993_vm0 }
 0x532   : > { %v6373_v2 = vsel %vm6366_vm10, %v6370_v54, %v6372_v9 }
 0x537   : > { %10538 = vmatmul.mubr.msk.bf16.gmra.mrb[36].mxu1 %vm17090_vm9, %v5701_v31  ;;  %v15289_v31 = vld [vmem:[#allocation2 + $0x20] sm:$0xff]  ;;  %vm17105_vm9 = vmmov %vm16993_vm0 }
 0x538   : > { %10541 = vmatprep.mubr.msk.bf16.mxu1 %vm17092_vm3, %v5705_v32  ;;  %v6374_v22 = vrot.slane %v15289_v31, 4  ;;  %v15292_v32 = vld [vmem:[#allocation2 + $0x28] sm:$0xff]  ;;  %vm17106_vm3 = vmmov %vm16993_vm0 }
 0x539   : > { %v6376_v55 = vrot.slane %v15292_v32, 4 }
 0x53b   : > { %v15302_v46 = vsel %vm6366_vm10, %v6374_v22, %v6376_v55  ;;  %v15313_v58 = vsel %vm6366_vm10, %v6376_v55, %v6378_v52  ;;  %v17110_v55 = vld [vmem:[#allocation35_spill] sm:$0xff] }
 0x53c   : > { %v6400_v52 = vrot.slane %v17110_v55, 4 }
 0x53f   : > { %10542 = vmatmul.mubr.msk.bf16.gmra.mrb[40].mxu1 %vm17093_vm4, %v6023_v47  ;;  %v15325_v47 = vld [vmem:[#allocation2 + $0x48] sm:$0xff]  ;;  %vm17107_vm4 = vmmov %vm16993_vm0 }
 0x540   : > { %10545 = vmatprep.mubr.msk.bf16.mxu1 %vm17094_vm11, %v6032_v48  ;;  %v6384_v48 = vrot.slane %v15325_v47, 4  ;;  %vm17108_vm11 = vmmov %vm16993_vm0 }
 0x542   : > { %v15334_v28 = vsel %vm6366_vm10, %v6382_v59, %v6384_v48 }
 0x547   : > { %10546 = vmatmul.mubr.msk.bf16.gmra.mrb[44].mxu1 %vm17095_vm8, %v6041_v37  ;;  %v6388_v37 = vrot.slane %v14606_v36, 4  ;;  %vm17109_vm8 = vmmov %vm16993_vm0 }
 0x548   : > { %10553 = vmatprep.mubr.msk.bf16.mxu1 %vm16993_vm0, %v6369_v42  ;;  %v15341_v42 = vsel %vm6366_vm10, %v6384_v48, %v6386_v50  ;;  %v17112_v48 = vld [vmem:[#allocation46_spill] sm:$0xff] }
 0x549   : > { %v15346_v54 = vsel %vm6366_vm10, %v6386_v50, %v6388_v37  ;;  %v6402_v50 = vrot.slane %v17112_v48, 4 }
 0x54f   : > { %10554 = vmatmul.mubr.msk.bf16.vlgmr.msra.gmra.mrb[0].mxu1 %vm17096_vm15, %v6371_v23  ;;  %v6394_v23 = vrot.slane %v14748_v53, 4  ;;  %vm17111_vm15 = vmmov %vm16993_vm0 }
 0x550   : > { %10602 = vmatpush3.bf16.msra.mxu1 %v11807_v24  ;;  %10557 = vmatprep.mubr.msk.bf16.mxu1 %vm17097_vm7, %v6373_v2  ;;  %v15297_v24 = vsel %vm6366_vm10, %v6372_v9, %v6374_v22  ;;  %v6390_v9 = vrot.slane %v14670_v44, 4  ;;  %v6396_v2 = vrot.slane %v14762_v14, 4  ;;  %v6398_v22 = vrot.slane %v14826_v33, 4  ;;  %vm17114_vm7 = vmmov %vm16993_vm0 }
 0x551   : > { %10603 = vmatprep.subr.bf16.mxu1 %v11808_v39 }
 0x552   : > { %v15353_v1 = vsel %vm6366_vm10, %v6388_v37, %v6390_v9  ;;  %v15377_v19 = vsel %vm6366_vm10, %v6396_v2, %v6398_v22  ;;  %v15382_v59 = vsel %vm6366_vm10, %v6398_v22, %v6400_v52  ;;  %v17113_v37 = vld [vmem:[#allocation48_spill] sm:$0xff] }
 0x554   : > { %10604 = vmatpush3.bf16.msra.mxu1 %v11808_v39  ;;  %v6392_v39 = vrot.slane %v14684_v63, 4  ;;  %v15370_v63 = vsel %vm6366_vm10, %v6394_v23, %v6396_v2  ;;  %v17116_v2 = vld [vmem:[#allocation51_spill] sm:$0xff] }
 0x555   : > { %10653 = vmatprep.subr.bf16.mxu1 %v15287_v13  ;;  %v6406_v22 = vrot.slane %v17116_v2, 4 }
 0x556   : > { %v15358_v36 = vsel %vm6366_vm10, %v6390_v9, %v6392_v39  ;;  %v15365_v44 = vsel %vm6366_vm10, %v6392_v39, %v6394_v23  ;;  %v6404_v9 = vrot.slane %v17113_v37, 4  ;;  %v15389_v39 = vsel %vm6366_vm10, %v6400_v52, %v6402_v50 }
 0x557   : > { %10558 = vmatmul.mubr.msk.bf16.gmra.mrb[4].mxu1 %vm17098_vm12, %v15297_v24  ;;  %vm17115_vm12 = vmmov %vm16993_vm0  ;;  %v15406_v52 = vsel %vm6366_vm10, %v6406_v22, %v6408_v38 }
 0x558   : > { %10561 = vmatprep.mubr.msk.bf16.mxu1 %vm17099_vm14, %v15302_v46  ;;  %v15394_v23 = vsel %vm6366_vm10, %v6402_v50, %v6404_v9  ;;  %v15401_v20 = vsel %vm6366_vm10, %v6404_v9, %v6406_v22  ;;  %vm17118_vm14 = vmmov %vm16993_vm0  ;;  %v17120_v50 = vld [vmem:[#allocation54_spill] sm:$0xff]  ;;  %v17124_v22 = vld [vmem:[#allocation43_spill] sm:$0xff] }
 0x559   : > { %v6410_v0 = vrot.slane %v17120_v50, 4  ;;  %v6414_v45 = vrot.slane %v17124_v22, 4 }
 0x55b   : > { %v15413_v35 = vsel %vm6366_vm10, %v6408_v38, %v6410_v0  ;;  %v15418_v9 = vsel %vm6366_vm10, %v6410_v0, %v6412_v21  ;;  %v6415_v15 = vsel %vm6366_vm10, %v6412_v21, %v6414_v45  ;;  %v11810_v38 = vld [vmem:[%s16031_s3 + $0x78] sm:$0xff]   ;;  %v11811_v0 = vld [vmem:[%s16031_s3 + $0x20] sm:$0xff]   ;;  %v11829_v21 = vld [vmem:[#allocation2 + $0x50] sm:$0xff] }
 0x55f   : > { %10562 = vmatmul.mubr.msk.bf16.gmra.mrb[8].mxu1 %vm17100_vm5, %v15313_v58  ;;  %vm17119_vm5 = vmmov %vm16993_vm0 }
 0x560   : > { %10565 = vmatprep.mubr.msk.bf16.mxu1 %vm17101_vm2, %v15318_v61  ;;  %vm17122_vm2 = vmmov %vm16993_vm0 }
 0x567   : > { %10566 = vmatmul.mubr.msk.bf16.gmra.mrb[12].mxu1 %vm17102_vm13, %v15329_v41  ;;  %vm17123_vm13 = vmmov %vm16993_vm0 }
 0x568   : > { %10569 = vmatprep.mubr.msk.bf16.mxu1 %vm17103_vm6, %v15334_v28  ;;  %vm17125_vm6 = vmmov %vm16993_vm0 }
 0x56f   : > { %10570 = vmatmul.mubr.msk.bf16.gmra.mrb[16].mxu1 %vm17104_vm1, %v15341_v42  ;;  %vm17126_vm1 = vmmov %vm16993_vm0 }
 0x570   : > { %10573 = vmatprep.mubr.msk.bf16.mxu1 %vm17105_vm9, %v15346_v54  ;;  %vm17127_vm9 = vmmov %vm16993_vm0 }
 0x577   : > { %10574 = vmatmul.mubr.msk.bf16.gmra.mrb[20].mxu1 %vm17106_vm3, %v15353_v1  ;;  %vm17128_vm3 = vmmov %vm16993_vm0 }
 0x578   : > { %10577 = vmatprep.mubr.msk.bf16.mxu1 %vm17107_vm4, %v15358_v36  ;;  %vm17129_vm4 = vmmov %vm16993_vm0 }
 0x57f   : > { %10578 = vmatmul.mubr.msk.bf16.gmra.mrb[24].mxu1 %vm17108_vm11, %v15365_v44  ;;  %vm17130_vm11 = vmmov %vm16993_vm0 }
 0x580   : > { %10581 = vmatprep.mubr.msk.bf16.mxu1 %vm17109_vm8, %v15370_v63  ;;  %vm17131_vm8 = vmmov %vm16993_vm0 }
 0x587   : > { %10582 = vmatmul.mubr.msk.bf16.gmra.mrb[28].mxu1 %vm16993_vm0, %v15377_v19 }
 0x588   : > { %10585 = vmatprep.mubr.msk.bf16.mxu1 %vm17111_vm15, %v15382_v59  ;;  %vm17132_vm15 = vmmov %vm16993_vm0 }
 0x58f   : > { %10586 = vmatmul.mubr.msk.bf16.gmra.mrb[32].mxu1 %vm17114_vm7, %v15389_v39  ;;  %vm17133_vm7 = vmmov %vm16993_vm0 }
 0x590   : > { %10589 = vmatprep.mubr.msk.bf16.mxu1 %vm17115_vm12, %v15394_v23  ;;  %vm17134_vm12 = vmmov %vm16993_vm0 }
 0x597   : > { %10590 = vmatmul.mubr.msk.bf16.gmra.mrb[36].mxu1 %vm17118_vm14, %v15401_v20  ;;  %vm17135_vm14 = vmmov %vm16993_vm0 }
 0x598   : > { %10593 = vmatprep.mubr.msk.bf16.mxu1 %vm17119_vm5, %v15406_v52  ;;  %vm17136_vm5 = vmmov %vm16993_vm0 }
 0x59f   : > { %10594 = vmatmul.mubr.msk.bf16.gmra.mrb[40].mxu1 %vm17122_vm2, %v15413_v35  ;;  %vm17137_vm2 = vmmov %vm16993_vm0 }
 0x5a0   : > { %10597 = vmatprep.mubr.msk.bf16.mxu1 %vm17123_vm13, %v15418_v9  ;;  %vm17138_vm13 = vmmov %vm16993_vm0 }
 0x5a7   : > { %10598 = vmatmul.mubr.msk.bf16.gmra.mrb[44].mxu1 %vm17125_vm6, %v6415_v15  ;;  %vm17139_vm6 = vmmov %vm16993_vm0 }
 0x5a8   : > { %10605 = vmatprep.mubr.msk.bf16.mxu1 %vm17126_vm1, %v15271_v4  ;;  %v11830_v4 = vld [vmem:[#allocation2 + $0x58] sm:$0xff]  ;;  %vm17140_vm1 = vmmov %vm16993_vm0 }
 0x5af   : > { %10606 = vmatmul.mubr.msk.bf16.vlgmr.msra.gmra.mrb[0].mxu1 %vm17127_vm9, %v15274_v11  ;;  %v11831_v11 = vld [vmem:[#allocation2 + $0x60] sm:$0xff]  ;;  %vm17141_vm9 = vmmov %vm16993_vm0 }
 0x5b0   : > { %10654 = vmatpush3.bf16.msra.mxu1 %v15287_v13  ;;  %10609 = vmatprep.mubr.msk.bf16.mxu1 %vm17128_vm3, %v15289_v31  ;;  %v11832_v13 = vld [vmem:[#allocation2 + $0x68] sm:$0xff]  ;;  %vm17142_vm3 = vmmov %vm16993_vm0  ;;  %v17169_v31 = vshrl.u32 %v15009_v5, 16 }
 0x5b1   : > { %10655 = vmatprep.subr.bf16.mxu1 %v11810_v38 }
 0x5b4   : > { %10656 = vmatpush3.bf16.msra.mxu1 %v11810_v38  ;;  %v17184_v38 = vld [vmem:[#allocation19_spill] sm:$0xff] }
 0x5b5   : > { %10705 = vmatprep.subr.bf16.mxu1 %v11811_v0 }
 0x5b7   : > { %10610 = vmatmul.mubr.msk.bf16.gmra.mrb[4].mxu1 %vm17129_vm4, %v15292_v32  ;;  %vm17143_vm4 = vmmov %vm16993_vm0  ;;  %v7425_v32 = vrot.slane %v17169_v31, 4 }
 0x5b8   : > { %10613 = vmatprep.mubr.msk.bf16.mxu1 %vm17130_vm11, %v15306_v56  ;;  %vm17144_vm11 = vmmov %vm16993_vm0  ;;  %v17172_v56 = vld [vmem:[#allocation23_spill] sm:$0xff] }
 0x5bf   : > { %10614 = vmatmul.mubr.msk.bf16.gmra.mrb[8].mxu1 %vm17131_vm8, %v15309_v17  ;;  %vm17145_vm8 = vmmov %vm16993_vm0  ;;  %v17173_v17 = vshll.u32 %v15031_v27, 16 }
 0x5c0   : > { %10617 = vmatprep.mubr.msk.bf16.mxu1 %vm16993_vm0, %v15322_v30 }
 0x5c7   : > { %10618 = vmatmul.mubr.msk.bf16.gmra.mrb[12].mxu1 %vm17132_vm15, %v15325_v47  ;;  %vm17146_vm15 = vmmov %vm16993_vm0  ;;  %v7432_v47 = vrot.slane %v17032_v10, 4 }
 0x5c8   : > { %10621 = vmatprep.mubr.msk.bf16.mxu1 %vm17133_vm7, %v11829_v21  ;;  %vm17148_vm7 = vmmov %vm16993_vm0  ;;  %v17185_v21 = vld [vmem:[#allocation14_spill] sm:$0xff] }
 0x5cf   : > { %10622 = vmatmul.mubr.msk.bf16.gmra.mrb[16].mxu1 %vm17134_vm12, %v11830_v4  ;;  %vm17149_vm12 = vmmov %vm16993_vm0  ;;  %v7449_v4 = vrot.slane %v17185_v21, 5 }
 0x5d0   : > { %10625 = vmatprep.mubr.msk.bf16.mxu1 %vm17135_vm14, %v11831_v11  ;;  %vm17150_vm14 = vmmov %vm16993_vm0 }
 0x5d7   : > { %10626 = vmatmul.mubr.msk.bf16.gmra.mrb[20].mxu1 %vm17136_vm5, %v11832_v13  ;;  %vm17151_vm5 = vmmov %vm16993_vm0  ;;  %v17186_v13 = vld [vmem:[#allocation25_spill] sm:$0xff] }
 0x5d8   : > { %10629 = vmatprep.mubr.msk.bf16.mxu1 %vm17137_vm2, %v14748_v53  ;;  %v17147_v53 = vld [vmem:[#allocation56_spill] sm:$0xff]  ;;  %vm17152_vm2 = vmmov %vm16993_vm0 }
 0x5df   : > { %10630 = vmatmul.mubr.msk.bf16.gmra.mrb[24].mxu1 %vm17138_vm13, %v14762_v14  ;;  %v11812_v14 = vld [vmem:[%s16031_s3 + $0x28] sm:$0xff]   ;;  %vm17153_vm13 = vmmov %vm16993_vm0 }
 0x5e0   : > { %10633 = vmatprep.mubr.msk.bf16.mxu1 %vm17139_vm6, %v14826_v33  ;;  %v11813_v33 = vld [vmem:[%s16031_s3 + $0x50] sm:$0xff]   ;;  %vm17154_vm6 = vmmov %vm16993_vm0 }
 0x5e7   : > { %10634 = vmatmul.mubr.msk.bf16.gmra.mrb[28].mxu1 %vm17140_vm1, %v17110_v55  ;;  %vm17155_vm1 = vmmov %vm16993_vm0  ;;  %v7440_v55 = vrot.slane %v17038_v60, 4 }
 0x5e8   : > { %10637 = vmatprep.mubr.msk.bf16.mxu1 %vm17141_vm9, %v17112_v48  ;;  %vm17156_vm9 = vmmov %vm16993_vm0 }
 0x5ef   : > { %10638 = vmatmul.mubr.msk.bf16.gmra.mrb[32].mxu1 %vm17142_vm3, %v17113_v37  ;;  %vm17157_vm3 = vmmov %vm16993_vm0  ;;  %v17181_v37 = vld [vmem:[#allocation5_spill] sm:$0xff] }
 0x5f0   : > { %10641 = vmatprep.mubr.msk.bf16.mxu1 %vm17143_vm4, %v17116_v2  ;;  %vm17158_vm4 = vmmov %vm16993_vm0 }
 0x5f7   : > { %10642 = vmatmul.mubr.msk.bf16.gmra.mrb[36].mxu1 %vm17144_vm11, %v17117_v7  ;;  %vm17159_vm11 = vmmov %vm16993_vm0  ;;  %v7121_v7 = vrot.slane %v15165_v57, 4  ;;  %v7123_v57 = vrot.slane %v15246_v43, 4  ;;  %v17225_v43 = vld [vmem:[#allocation50_spill] sm:$0xff] }
 0x5f8   : > { %10645 = vmatprep.mubr.msk.bf16.mxu1 %vm17145_vm8, %v17120_v50  ;;  %vm17160_vm8 = vmmov %vm16993_vm0 }
 0x5f9   : > { %v7124_v30 = vsel %vm6366_vm10, %v7121_v7, %v7123_v57 }
 0x5ff   : > { %10646 = vmatmul.mubr.msk.bf16.gmra.mrb[40].mxu1 %vm16993_vm0, %v17121_v3  ;;  %v7119_v3 = vrot.slane %v17147_v53, 4 }
 0x600   : > { %10649 = vmatprep.mubr.msk.bf16.mxu1 %vm17146_vm15, %v17124_v22  ;;  %vm17161_vm15 = vmmov %vm16993_vm0 }
 0x607   : > { %10650 = vmatmul.mubr.msk.bf16.gmra.mrb[44].mxu1 %vm17148_vm7, %v17147_v53  ;;  %vm17162_vm7 = vmmov %vm16993_vm0  ;;  %v7452_v53 = vrot.slane %v17186_v13, 4 }
 0x608   : > { %10657 = vmatprep.mubr.msk.bf16.mxu1 %vm17149_vm12, %v15297_v24  ;;  %vm17163_vm12 = vmmov %vm16993_vm0 }
 0x60f   : > { %10658 = vmatmul.mubr.msk.bf16.vlgmr.msra.gmra.mrb[0].mxu1 %vm17150_vm14, %v15302_v46  ;;  %vm17164_vm14 = vmmov %vm16993_vm0  ;;  %v7120_v46 = vsel %vm6366_vm10, %v6414_v45, %v7119_v3 }
 0x610   : > { %10706 = vmatpush3.bf16.msra.mxu1 %v11811_v0  ;;  %10661 = vmatprep.mubr.msk.bf16.mxu1 %vm17151_vm5, %v15313_v58  ;;  %vm17165_vm5 = vmmov %vm16993_vm0  ;;  %v7429_v58 = vrot.slane %v17173_v17, 5  ;;  %v7448_v0 = vrot.slane %v17184_v38, 4 }
 0x611   : > { %10707 = vmatprep.subr.bf16.mxu1 %v11812_v14 }
 0x614   : > { %10708 = vmatpush3.bf16.msra.mxu1 %v11812_v14  ;;  %v17187_v14 = vld [vmem:[#allocation26_spill] sm:$0xff] }
 0x615   : > { %10757 = vmatprep.subr.bf16.mxu1 %v11813_v33 }
 0x617   : > { %10662 = vmatmul.mubr.msk.bf16.gmra.mrb[4].mxu1 %vm17152_vm2, %v15318_v61  ;;  %vm17166_vm2 = vmmov %vm16993_vm0 }
 0x618   : > { %10665 = vmatprep.mubr.msk.bf16.mxu1 %vm17153_vm13, %v15329_v41  ;;  %vm17167_vm13 = vmmov %vm16993_vm0  ;;  %v7433_v41 = vrot.slane %v17033_v6, 5 }
 0x61f   : > { %10666 = vmatmul.mubr.msk.bf16.gmra.mrb[8].mxu1 %vm17154_vm6, %v15334_v28  ;;  %vm17168_vm6 = vmmov %vm16993_vm0  ;;  %v17176_v28 = vld [vmem:[#allocation11_spill] sm:$0xff] }
 0x620   : > { %10669 = vmatprep.mubr.msk.bf16.mxu1 %vm17155_vm1, %v15341_v42  ;;  %vm17171_vm1 = vmmov %vm16993_vm0  ;;  %v7436_v27 = vrot.slane %v17176_v28, 4  ;;  %v17177_v42 = vld [vmem:[#allocation12_spill] sm:$0xff] }
 0x627   : > { %10670 = vmatmul.mubr.msk.bf16.gmra.mrb[12].mxu1 %vm17156_vm9, %v15346_v54  ;;  %vm17174_vm9 = vmmov %vm16993_vm0  ;;  %v7437_v54 = vrot.slane %v17177_v42, 5 }
 0x628   : > { %10673 = vmatprep.mubr.msk.bf16.mxu1 %vm17157_vm3, %v15353_v1  ;;  %vm7424_vm3 = vsmask.f32 3328  ;;  %v7434_v1 = vor.u32 %v7433_v41, %v7432_v47  ;;  %v17197_v41 = vld [vmem:[#allocation29_spill] sm:$0xff] }
 0x62f   : > { %10674 = vmatmul.mubr.msk.bf16.gmra.mrb[16].mxu1 %vm17158_vm4, %v15358_v36  ;;  %vm17175_vm4 = vmmov %vm16993_vm0  ;;  %v7438_v36 = vor.u32 %v7437_v54, %v7436_v27  ;;  %v7469_v27 = vrot.slane %v17197_v41, 5 }
 0x630   : > { %10677 = vmatprep.mubr.msk.bf16.mxu1 %vm17159_vm11, %v15365_v44  ;;  %vm17178_vm11 = vmmov %vm16993_vm0  ;;  %v11814_v44 = vld [vmem:[%s16031_s3 + $0x58] sm:$0xff]  }
 0x631   : > { %v7439_v48 = vsel %vm7424_vm3, %v7434_v1, %v7438_v36 }
 0x637   : > { %10678 = vmatmul.mubr.msk.bf16.gmra.mrb[20].mxu1 %vm17160_vm8, %v15370_v63  ;;  %vm17183_vm8 = vmmov %vm16993_vm0 }
 0x638   : > { %10681 = vmatprep.mubr.msk.bf16.mxu1 %vm16993_vm0, %v15377_v19  ;;  %v17179_v19 = vld [vmem:[#allocation17_spill] sm:$0xff] }
 0x63f   : > { %10682 = vmatmul.mubr.msk.bf16.gmra.mrb[24].mxu1 %vm17161_vm15, %v15382_v59  ;;  %v7441_v59 = vrot.slane %v17179_v19, 5  ;;  %vm17188_vm15 = vmmov %vm16993_vm0 }
 0x640   : > { %10685 = vmatprep.mubr.msk.bf16.mxu1 %vm17162_vm7, %v15389_v39  ;;  %v7444_v39 = vrot.slane %v17181_v37, 4  ;;  %vm17189_vm7 = vmmov %vm16993_vm0 }
 0x641   : > { %v7442_v50 = vor.u32 %v7441_v59, %v7440_v55  ;;  %v17202_v59 = vld [vmem:[#allocation22_spill] sm:$0xff] }
 0x643   : > { %v15567_v22 = vsel %vm7424_vm3, %v7438_v36, %v7442_v50 }
 0x647   : > { %10686 = vmatmul.mubr.msk.bf16.gmra.mrb[28].mxu1 %vm17163_vm12, %v15394_v23  ;;  %v17182_v23 = vld [vmem:[#allocation24_spill] sm:$0xff]  ;;  %vm17192_vm12 = vmmov %vm16993_vm0 }
 0x648   : > { %10689 = vmatprep.mubr.msk.bf16.mxu1 %vm17164_vm14, %v15401_v20  ;;  %v17170_v20 = vshll.u32 %v15009_v5, 16  ;;  %v7445_v2 = vrot.slane %v17182_v23, 5  ;;  %vm17194_vm14 = vmmov %vm16993_vm0 }
 0x64a   : > { %v7426_v24 = vrot.slane %v17170_v20, 5  ;;  %v7457_v20 = vrot.slane %v17049_v16, 5 }
 0x64c   : > { %v7427_v61 = vor.u32 %v7426_v24, %v7425_v32  ;;  %v7456_v32 = vrot.slane %v17048_v34, 4 }
 0x64e   : > { %v7458_v17 = vor.u32 %v7457_v20, %v7456_v32  ;;  %v17210_v20 = vld [vmem:[#allocation38_spill] sm:$0xff] }
 0x64f   : > { %10690 = vmatmul.mubr.msk.bf16.gmra.mrb[32].mxu1 %vm17165_vm5, %v15406_v52  ;;  %v15563_v52 = vld [vmem:[%s16031_s3 + $0x80] sm:$0xff]   ;;  %vm17198_vm5 = vmmov %vm16993_vm0 }
 0x650   : > { %10693 = vmatprep.mubr.msk.bf16.mxu1 %vm17166_vm2, %v15413_v35  ;;  %v7122_v35 = vsel %vm6366_vm10, %v7119_v3, %v7121_v7  ;;  %vm17180_vm10 = vmmov %vm16993_vm0  ;;  %v7450_v3 = vor.u32 %v7449_v4, %v7448_v0  ;;  %v7480_v4 = vrot.slane %v14780_v25, 4 }
 0x651   : > { %vm17200_vm2 = vmmov %vm16993_vm0 }
 0x657   : > { %10694 = vmatmul.mubr.msk.bf16.gmra.mrb[36].mxu1 %vm17167_vm13, %v15418_v9  ;;  %v7446_v9 = vor.u32 %v7445_v2, %v7444_v39  ;;  %v17203_v39 = vld [vmem:[#allocation34_spill] sm:$0xff]  ;;  %vm17204_vm13 = vmmov %vm16993_vm0 }
 0x658   : > { %10697 = vmatprep.mubr.msk.bf16.mxu1 %vm17168_vm6, %v6415_v15  ;;  %v7428_v15 = vrot.slane %v17172_v56, 4  ;;  %v17191_v56 = vld [vmem:[#allocation21_spill] sm:$0xff]  ;;  %v7477_v2 = vrot.slane %v17203_v39, 5  ;;  %vm17207_vm6 = vmmov %vm16993_vm0 }
 0x659   : > { %v15574_v11 = vsel %vm7424_vm3, %v7442_v50, %v7446_v9  ;;  %v15581_v31 = vsel %vm7424_vm3, %v7446_v9, %v7450_v3 }
 0x65a   : > { %v7430_v5 = vor.u32 %v7429_v58, %v7428_v15  ;;  %v7461_v15 = vrot.slane %v17191_v56, 5 }
 0x65c   : > { %v7431_v45 = vsel %vm7424_vm3, %v7427_v61, %v7430_v5  ;;  %v7435_v63 = vsel %vm7424_vm3, %v7430_v5, %v7434_v1  ;;  %v7464_v61 = vrot.slane %v14624_v8, 4  ;;  %v7465_v5 = vrot.slane %v14630_v12, 5 }
 0x65e   : > { %v7466_v54 = vor.u32 %v7465_v5, %v7464_v61  ;;  %v17213_v61 = vld [vmem:[#allocation4_spill] sm:$0xff] }
 0x65f   : > { %10698 = vmatmul.mubr.msk.bf16.gmra.mrb[40].mxu1 %vm17171_vm1, %v7120_v46  ;;  %v17190_v46 = vld [vmem:[#allocation20_spill] sm:$0xff]  ;;  %vm17211_vm1 = vmmov %vm16993_vm0  ;;  %v7488_v5 = vrot.slane %v17213_v61, 4 }
 0x660   : > { %10701 = vmatprep.mubr.msk.bf16.mxu1 %vm17174_vm9, %v7122_v35  ;;  %v7460_v35 = vrot.slane %v17190_v46, 4  ;;  %vm17215_vm9 = vmmov %vm16993_vm0 }
 0x662   : > { %v7462_v58 = vor.u32 %v7461_v15, %v7460_v35  ;;  %v7485_v35 = vrot.slane %v17210_v20, 5 }
 0x664   : > { %v15609_v36 = vsel %vm7424_vm3, %v7462_v58, %v7466_v54 }
 0x665   : > { %17199 = vst [vmem:[#allocation69_spill] sm:$0xff] %v15609_v36 }
 0x667   : > { %10702 = vmatmul.mubr.msk.bf16.gmra.mrb[44].mxu1 %vm17175_vm4, %v7124_v30  ;;  %v15602_v30 = vsel %vm7424_vm3, %v7458_v17, %v7462_v58  ;;  %vm17219_vm4 = vmmov %vm16993_vm0 }
 0x668   : > { %10709 = vmatprep.mubr.msk.bf16.mxu1 %vm17178_vm11, %v7431_v45  ;;  %17195 = vst [vmem:[#allocation47_spill] sm:$0xff] %v15602_v30  ;;  %v17196_v45 = vld [vmem:[#allocation32_spill] sm:$0xff]  ;;  %vm17223_vm11 = vmmov %vm16993_vm0 }
 0x669   : > { %v7468_v47 = vrot.slane %v17196_v45, 4 }
 0x66b   : > { %v7470_v1 = vor.u32 %v7469_v27, %v7468_v47  ;;  %v17214_v47 = vld [vmem:[#allocation40_spill] sm:$0xff] }
 0x66c   : > { %v7489_v27 = vrot.slane %v17214_v47, 5 }
 0x66d   : > { %v15616_v55 = vsel %vm7424_vm3, %v7466_v54, %v7470_v1 }
 0x66e   : > { %17201 = vst [vmem:[#allocation66_spill] sm:$0xff] %v15616_v55 }
 0x66f   : > { %10710 = vmatmul.mubr.msk.bf16.vlgmr.msra.gmra.mrb[0].mxu1 %vm17180_vm10, %v7435_v63  ;;  %v7473_v63 = vrot.slane %v14708_v18, 5  ;;  %vm17227_vm10 = vmmov %vm16993_vm0 }
 0x670   : > { %10758 = vmatpush3.bf16.msra.mxu1 %v11813_v33  ;;  %10713 = vmatprep.mubr.msk.bf16.mxu1 %vm17183_vm8, %v7439_v48  ;;  %v7453_v33 = vrot.slane %v17187_v14, 5  ;;  %v7476_v48 = vrot.slane %v17202_v59, 4  ;;  %vm17229_vm8 = vmmov %vm16993_vm0 }
 0x671   : > { %10759 = vmatprep.subr.bf16.mxu1 %v11814_v44 }
 0x672   : > { %v7454_v7 = vor.u32 %v7453_v33, %v7452_v53  ;;  %v7478_v9 = vor.u32 %v7477_v2, %v7476_v48  ;;  %v17206_v53 = vld [vmem:[#allocation33_spill] sm:$0xff]  ;;  %v7490_v2 = vor.u32 %v7489_v27, %v7488_v5 }
 0x673   : > { %v7481_v33 = vrot.slane %v17206_v53, 5 }
 0x674   : > { %10760 = vmatpush3.bf16.msra.mxu1 %v11814_v44  ;;  %v15588_v24 = vsel %vm7424_vm3, %v7450_v3, %v7454_v7  ;;  %v15595_v57 = vsel %vm7424_vm3, %v7454_v7, %v7458_v17  ;;  %v7472_v44 = vrot.slane %v14702_v29, 4  ;;  %v17209_v7 = vld [vmem:[#allocation3_spill] sm:$0xff] }
 0x675   : > { %10809 = vmatprep.subr.bf16.mxu1 %v15563_v52  ;;  %17193 = vst [vmem:[#allocation61_spill] sm:$0xff] %v15595_v57  ;;  %v7484_v32 = vrot.slane %v17209_v7, 4  ;;  %v7482_v15 = vor.u32 %v7481_v33, %v7480_v4  ;;  %v17221_v4 = vld [vmem:[#allocation37_spill] sm:$0xff] }
 0x676   : > { %v7474_v50 = vor.u32 %v7473_v63, %v7472_v44  ;;  %v17218_v63 = vld [vmem:[#allocation7_spill] sm:$0xff]  ;;  %v7496_v33 = vrot.slane %v17221_v4, 4 }
 0x677   : > { %10714 = vmatmul.mubr.msk.bf16.gmra.mrb[4].mxu1 %vm16993_vm0, %v15567_v22  ;;  %v7486_v17 = vor.u32 %v7485_v35, %v7484_v32  ;;  %v15637_v58 = vsel %vm7424_vm3, %v7478_v9, %v7482_v15  ;;  %v7493_v48 = vrot.slane %v17218_v63, 5  ;;  %v17222_v32 = vld [vmem:[#allocation49_spill] sm:$0xff] }
 0x678   : > { %10717 = vmatprep.mubr.msk.bf16.mxu1 %vm17188_vm15, %v15574_v11  ;;  %v15623_v0 = vsel %vm7424_vm3, %v7470_v1, %v7474_v50  ;;  %v15630_v3 = vsel %vm7424_vm3, %v7474_v50, %v7478_v9  ;;  %17212 = vst [vmem:[#allocation70_spill] sm:$0xff] %v15637_v58  ;;  %v17217_v1 = vld [vmem:[#allocation36_spill] sm:$0xff]  ;;  %v7497_v35 = vrot.slane %v17222_v32, 5  ;;  %vm17233_vm15 = vmmov %vm16993_vm0 }
 0x679   : > { %17205 = vst [vmem:[#allocation63_spill] sm:$0xff] %v15623_v0  ;;  %17208 = vst [vmem:[#allocation71_spill] sm:$0xff] %v15630_v3  ;;  %v15644_v54 = vsel %vm7424_vm3, %v7482_v15, %v7486_v17  ;;  %v7492_v44 = vrot.slane %v17217_v1, 4  ;;  %v15651_v9 = vsel %vm7424_vm3, %v7486_v17, %v7490_v2 }
 0x67a   : > { %17216 = vst [vmem:[#allocation64_spill] sm:$0xff] %v15644_v54  ;;  %17220 = vst [vmem:[#allocation73_spill] sm:$0xff] %v15651_v9  ;;  %v7498_v5 = vor.u32 %v7497_v35, %v7496_v33  ;;  %v7512_v33 = vrot.slane %v14999_v49, 4  ;;  %v7513_v35 = vrot.slane %v15005_v62, 5 }
 0x67b   : > { %v7494_v50 = vor.u32 %v7493_v48, %v7492_v44  ;;  %v7504_v44 = vrot.slane %v14969_v51, 4  ;;  %v7505_v48 = vrot.slane %v14981_v40, 5 }
 0x67d   : > { %v15658_v15 = vsel %vm7424_vm3, %v7490_v2, %v7494_v50  ;;  %v15665_v27 = vsel %vm7424_vm3, %v7494_v50, %v7498_v5 }
 0x67e   : > { %17224 = vst [vmem:[#allocation72_spill] sm:$0xff] %v15658_v15  ;;  %17228 = vst [vmem:[#allocation65_spill] sm:$0xff] %v15665_v27 }
 0x67f   : > { %10718 = vmatmul.mubr.msk.bf16.gmra.mrb[8].mxu1 %vm17189_vm7, %v15581_v31  ;;  %vm17236_vm7 = vmmov %vm16993_vm0 }
 0x680   : > { %10721 = vmatprep.mubr.msk.bf16.mxu1 %vm17192_vm12, %v15588_v24  ;;  %vm17239_vm12 = vmmov %vm16993_vm0 }
 0x687   : > { %10722 = vmatmul.mubr.msk.bf16.gmra.mrb[12].mxu1 %vm17194_vm14, %v15595_v57  ;;  %vm17240_vm14 = vmmov %vm16993_vm0 }
 0x688   : > { %10725 = vmatprep.mubr.msk.bf16.mxu1 %vm17198_vm5, %v15602_v30  ;;  %vm17241_vm5 = vmmov %vm16993_vm0 }
 0x68f   : > { %10726 = vmatmul.mubr.msk.bf16.gmra.mrb[16].mxu1 %vm17200_vm2, %v15609_v36  ;;  %v17235_v36 = vld [vmem:[#allocation55_spill] sm:$0xff]  ;;  %vm17242_vm2 = vsmask.f32 7424 }
 0x690   : > { %10729 = vmatprep.mubr.msk.bf16.mxu1 %vm17204_vm13, %v15616_v55  ;;  %v7517_v30 = vrot.slane %v17235_v36, 5  ;;  %vm17243_vm13 = vmmov %vm16993_vm0 }
 0x697   : > { %10730 = vmatmul.mubr.msk.bf16.gmra.mrb[20].mxu1 %vm17207_vm6, %v15623_v0  ;;  %vm17244_vm6 = vmmov %vm17242_vm2 }
 0x698   : > { %10733 = vmatprep.mubr.msk.bf16.mxu1 %vm17211_vm1, %v15630_v3  ;;  %v17226_v3 = vld [vmem:[#allocation39_spill] sm:$0xff]  ;;  %vm17245_vm1 = vmmov %vm16993_vm0 }
 0x699   : > { %v7501_v0 = vrot.slane %v17226_v3, 5 }
 0x69f   : > { %10734 = vmatmul.mubr.msk.bf16.gmra.mrb[24].mxu1 %vm17215_vm9, %v15637_v58  ;;  %v7500_v58 = vrot.slane %v17225_v43, 4  ;;  %vm17246_vm9 = vmmov %vm17242_vm2 }
 0x6a0   : > { %10737 = vmatprep.mubr.msk.bf16.mxu1 %vm17219_vm4, %v15644_v54  ;;  %v17231_v54 = vld [vmem:[#allocation41_spill] sm:$0xff]  ;;  %vm17247_vm4 = vmmov %vm16993_vm0 }
 0x6a1   : > { %v7502_v17 = vor.u32 %v7501_v0, %v7500_v58  ;;  %v7509_v55 = vrot.slane %v17231_v54, 5  ;;  %v7506_v0 = vor.u32 %v7505_v48, %v7504_v44  ;;  %v17237_v44 = vld [vmem:[#allocation58_spill] sm:$0xff] }
 0x6a2   : > { %v7520_v48 = vrot.slane %v17237_v44, 4 }
 0x6a3   : > { %v15672_v2 = vsel %vm7424_vm3, %v7498_v5, %v7502_v17  ;;  %v15679_v50 = vsel %vm7424_vm3, %v7502_v17, %v7506_v0 }
 0x6a4   : > { %17230 = vst [vmem:[#allocation75_spill] sm:$0xff] %v15672_v2  ;;  %17232 = vst [vmem:[#allocation74_spill] sm:$0xff] %v15679_v50 }
 0x6a7   : > { %10738 = vmatmul.mubr.msk.bf16.gmra.mrb[28].mxu1 %vm17223_vm11, %v15651_v9  ;;  %v7508_v9 = vrot.slane %v14977_v26, 4  ;;  %vm17248_vm11 = vmmov %vm17242_vm2 }
 0x6a8   : > { %10741 = vmatprep.mubr.msk.bf16.mxu1 %vm17227_vm10, %v15658_v15  ;;  %vm17249_vm10 = vmmov %vm16993_vm0 }
 0x6a9   : > { %v7510_v58 = vor.u32 %v7509_v55, %v7508_v9  ;;  %v7514_v55 = vor.u32 %v7513_v35, %v7512_v33 }
 0x6ab   : > { %v15686_v5 = vsel %vm7424_vm3, %v7506_v0, %v7510_v58  ;;  %v15693_v17 = vsel %vm7424_vm3, %v7510_v58, %v7514_v55 }
 0x6af   : > { %10742 = vmatmul.mubr.msk.bf16.gmra.mrb[32].mxu1 %vm17229_vm8, %v15665_v27  ;;  %v17234_v27 = vld [vmem:[#allocation42_spill] sm:$0xff]  ;;  %vm17250_vm8 = vmmov %vm17242_vm2 }
 0x6b0   : > { %10745 = vmatprep.mubr.msk.bf16.mxu1 %vm16993_vm0, %v15672_v2  ;;  %v7516_v15 = vrot.slane %v17234_v27, 4  ;;  %v17238_v2 = vld [vmem:[#allocation44_spill] sm:$0xff] }
 0x6b1   : > { %v7521_v57 = vrot.slane %v17238_v2, 5 }
 0x6b2   : > { %v7518_v9 = vor.u32 %v7517_v30, %v7516_v15  ;;  %v7888_v15 = vrot.slane %v17177_v42, 1  ;;  %v11816_v42 = vld [vmem:[%s16031_s3 + $0x88] sm:$0xff]  }
 0x6b3   : > { %v15705_v33 = vor.u32 %v7521_v57, %v7520_v48 }
 0x6b4   : > { %v15700_v0 = vsel %vm7424_vm3, %v7514_v55, %v7518_v9  ;;  %v7890_v55 = vor.u32 %v7888_v15, %v17176_v28 }
 0x6b5   : > { %v15711_v58 = vsel %vm7424_vm3, %v7518_v9, %v15705_v33 }
 0x6b7   : > { %10746 = vmatmul.mubr.msk.bf16.gmra.mrb[36].mxu1 %vm17233_vm15, %v15679_v50  ;;  %v7886_v50 = vrot.slane %v17033_v6, 1  ;;  %v7891_v6 = vrot.slane %v17179_v19, 1  ;;  %v7897_v19 = vrot.slane %v17185_v21, 1  ;;  %v7903_v21 = vrot.slane %v17049_v16, 1  ;;  %vm17251_vm15 = vmmov %vm17242_vm2 }
 0x6b8   : > { %10749 = vmatprep.mubr.msk.bf16.mxu1 %vm17236_vm7, %v15686_v5  ;;  %vm17252_vm7 = vmmov %vm16993_vm0 }
 0x6b9   : > { %v7887_v30 = vor.u32 %v7886_v50, %v17032_v10  ;;  %v7893_v57 = vor.u32 %v7891_v6, %v17038_v60  ;;  %v7894_v10 = vrot.slane %v17182_v23, 1  ;;  %v7892_v50 = vsel %vm17244_vm6, %v7890_v55, %v7891_v6  ;;  %vm17258_vm6 = vmmov %vm16993_vm0 }
 0x6ba   : > { %v7899_v60 = vor.u32 %v7897_v19, %v17184_v38  ;;  %v7900_v23 = vrot.slane %v17187_v14, 1  ;;  %v7906_v38 = vrot.slane %v17191_v56, 1 }
 0x6bb   : > { %v7889_v35 = vsel %vm17242_vm2, %v7887_v30, %v7888_v15  ;;  %v7895_v9 = vsel %vm17246_vm9, %v7893_v57, %v7894_v10  ;;  %v7896_v28 = vor.u32 %v7894_v10, %v17181_v37  ;;  %v7915_v57 = vrot.slane %v14708_v18, 1  ;;  %vm17260_vm9 = vmmov %vm16993_vm0 }
 0x6bc   : > { %v7901_v30 = vsel %vm17250_vm8, %v7899_v60, %v7900_v23  ;;  %v7902_v15 = vor.u32 %v7900_v23, %v17186_v13  ;;  %v7908_v6 = vor.u32 %v7906_v38, %v17190_v46  ;;  %v7921_v10 = vrot.slane %v17206_v53, 1  ;;  %vm17264_vm8 = vmmov %vm16993_vm0 }
 0x6bd   : > { %v7898_v48 = vsel %vm17248_vm11, %v7896_v28, %v7897_v19  ;;  %vm17262_vm11 = vmmov %vm16993_vm0  ;;  %v7933_v19 = vrot.slane %v17222_v32, 1  ;;  %v7939_v28 = vrot.slane %v14981_v40, 1 }
 0x6be   : > { %v7904_v37 = vsel %vm17251_vm15, %v7902_v15, %v7903_v21  ;;  %v7923_v18 = vor.u32 %v7921_v10, %v14780_v25  ;;  %v7930_v25 = vrot.slane %v17218_v63, 1  ;;  %v17283_v15 = vld [vmem:[#allocation60_spill] sm:$0xff] }
 0x6bf   : > { %10750 = vmatmul.mubr.msk.bf16.gmra.mrb[40].mxu1 %vm17239_vm12, %v15693_v17  ;;  %vm17253_vm12 = vmmov %vm17242_vm2  ;;  %v7941_v32 = vor.u32 %v7939_v28, %v14969_v51  ;;  %v7948_v51 = vrot.slane %v17235_v36, 1 }
 0x6c0   : > { %10753 = vmatprep.mubr.msk.bf16.mxu1 %vm17240_vm14, %v15700_v0  ;;  %vm17254_vm14 = vmmov %vm16993_vm0  ;;  %v7932_v60 = vor.u32 %v7930_v25, %v17217_v1 }
 0x6c7   : > { %10754 = vmatmul.mubr.msk.bf16.gmra.mrb[44].mxu1 %vm17241_vm5, %v15711_v58  ;;  %vm17255_vm5 = vmmov %vm17242_vm2 }
 0x6c8   : > { %10761 = vmatprep.mubr.msk.bf16.mxu1 %vm17243_vm13, %v7889_v35  ;;  %v7909_v35 = vrot.slane %v14630_v12, 1  ;;  %vm17256_vm2 = vmmov %vm16993_vm0  ;;  %v7917_v12 = vor.u32 %v7915_v57, %v14702_v29  ;;  %v7924_v29 = vrot.slane %v17210_v20, 1 }
 0x6c9   : > { %vm17257_vm13 = vmmov %vm17255_vm5 }
 0x6ca   : > { %v7911_v16 = vor.u32 %v7909_v35, %v14624_v8  ;;  %v7910_v13 = vsel %vm17255_vm5, %v7908_v6, %v7909_v35  ;;  %v7918_v8 = vrot.slane %v17203_v39, 1  ;;  %vm17266_vm15 = vmmov %vm17256_vm2  ;;  %v17301_v6 = vld [vmem:[#allocation66_spill] sm:$0xff] }
 0x6cf   : > { %10762 = vmatmul.mubr.msk.bf16.vlgmr.msra.gmra.mrb[0].mxu1 %vm17245_vm1, %v7892_v50  ;;  %vm17259_vm1 = vmmov %vm17255_vm5  ;;  %v7927_v50 = vrot.slane %v17214_v47, 1  ;;  %v7935_v47 = vor.u32 %v7933_v19, %v17221_v4  ;;  %v7942_v4 = vrot.slane %v17231_v54, 1 }
 0x6d0   : > { %10810 = vmatpush3.bf16.msra.mxu1 %v15563_v52  ;;  %10765 = vmatprep.mubr.msk.bf16.mxu1 %vm17247_vm4, %v7895_v9  ;;  %v7905_v52 = vor.u32 %v7903_v21, %v17048_v34  ;;  %v7912_v34 = vrot.slane %v17197_v41, 1  ;;  %vm17261_vm4 = vmmov %vm17259_vm1  ;;  %v7926_v9 = vor.u32 %v7924_v29, %v17209_v7  ;;  %v7951_v21 = vrot.slane %v17238_v2, 1 }
 0x6d1   : > { %10811 = vmatprep.subr.bf16.mxu1 %v11816_v42  ;;  %v7919_v41 = vsel %vm17261_vm4, %v7917_v12, %v7918_v8  ;;  %v7929_v53 = vor.u32 %v7927_v50, %v17213_v61  ;;  %vm17270_vm5 = vmmov %vm17256_vm2  ;;  %v7936_v61 = vrot.slane %v17226_v3, 1  ;;  %v17319_v12 = vld [vmem:[#allocation74_spill] sm:$0xff] }
 0x6d2   : > { %v7907_v14 = vsel %vm17253_vm12, %v7905_v52, %v7906_v38  ;;  %v7913_v56 = vsel %vm17257_vm13, %v7911_v16, %v7912_v34  ;;  %v7914_v55 = vor.u32 %v7912_v34, %v17196_v45  ;;  %vm17268_vm12 = vmmov %vm17256_vm2  ;;  %v7950_v52 = vor.u32 %v7948_v51, %v17234_v27  ;;  %v17288_v38 = vld [vmem:[#allocation57_spill] sm:$0xff] }
 0x6d3   : > { %vm17272_vm13 = vmmov %vm17270_vm5  ;;  %v7938_v23 = vor.u32 %v7936_v61, %v17225_v43  ;;  %v17296_v27 = vld [vmem:[#allocation61_spill] sm:$0xff] }
 0x6d4   : > { %10812 = vmatpush3.bf16.msra.mxu1 %v11816_v42  ;;  %v7916_v46 = vsel %vm17259_vm1, %v7914_v55, %v7915_v57  ;;  %v7920_v42 = vor.u32 %v7918_v8, %v17202_v59  ;;  %v17300_v16 = vld [vmem:[#allocation69_spill] sm:$0xff]  ;;  %v17317_v57 = vld [vmem:[#allocation75_spill] sm:$0xff]  ;;  %v8321_v55 = vrot.slane %v17288_v38, 4  ;;  %v8322_v8 = vrot.slane %v17283_v15, 5 }
 0x6d5   : > { %v17311_v34 = vld [vmem:[#allocation73_spill] sm:$0xff] }
 0x6d7   : > { %10766 = vmatmul.mubr.msk.bf16.gmra.mrb[4].mxu1 %vm17249_vm10, %v7898_v48  ;;  %vm17263_vm10 = vmmov %vm17259_vm1  ;;  %v7945_v48 = vrot.slane %v15005_v62, 1  ;;  %v7953_v62 = vor.u32 %v7951_v21, %v17237_v44  ;;  %v17298_v44 = vld [vmem:[#allocation47_spill] sm:$0xff] }
 0x6d8   : > { %10769 = vmatprep.mubr.msk.bf16.mxu1 %vm16993_vm0, %v7901_v30  ;;  %v7922_v45 = vsel %vm17263_vm10, %v7920_v42, %v7921_v10  ;;  %vm17265_vm0 = vmmov %vm17259_vm1  ;;  %v7944_v30 = vor.u32 %v7942_v4, %v14977_v26 }
 0x6d9   : > { %v7925_v39 = vsel %vm17265_vm0, %v7923_v18, %v7924_v29  ;;  %vm17274_vm1 = vmmov %vm17270_vm5  ;;  %v7947_v40 = vor.u32 %v7945_v48, %v14999_v49  ;;  %v7954_v49 = vrot.slane %v17283_v15, 1  ;;  %v17328_v29 = vld [vmem:[#allocation45_spill] sm:$0xff] }
 0x6da   : > { %vm17276_vm4 = vmmov %vm17274_vm1 }
 0x6db   : > { %vm17278_vm10 = vmmov %vm17274_vm1 }
 0x6df   : > { %10770 = vmatmul.mubr.msk.bf16.gmra.mrb[8].mxu1 %vm17252_vm7, %v7904_v37  ;;  %vm17267_vm7 = vmmov %vm17265_vm0  ;;  %v7956_v37 = vor.u32 %v7954_v49, %v17288_v38 }
 0x6e0   : > { %10773 = vmatprep.mubr.msk.bf16.mxu1 %vm17254_vm14, %v7907_v14  ;;  %v7928_v59 = vsel %vm17267_vm7, %v7926_v9, %v7927_v50  ;;  %vm17269_vm14 = vmmov %vm17265_vm0  ;;  %v17289_v14 = vld [vmem:[#allocation59_spill] sm:$0xff] }
 0x6e1   : > { %v7931_v20 = vsel %vm17269_vm14, %v7929_v53, %v7930_v25  ;;  %v7957_v2 = vrot.slane %v17289_v14, 1 }
 0x6e7   : > { %10774 = vmatmul.mubr.msk.bf16.gmra.mrb[12].mxu1 %vm17256_vm2, %v7910_v13  ;;  %vm17271_vm2 = vmmov %vm17265_vm0  ;;  %v17313_v13 = vld [vmem:[#allocation72_spill] sm:$0xff] }
 0x6e8   : > { %10777 = vmatprep.mubr.msk.bf16.mxu1 %vm17258_vm6, %v7913_v56  ;;  %v7934_v7 = vsel %vm17271_vm2, %v7932_v60, %v7933_v19  ;;  %vm17273_vm6 = vmmov %vm17265_vm0  ;;  %v17315_v56 = vld [vmem:[#allocation65_spill] sm:$0xff] }
 0x6e9   : > { %v7937_v63 = vsel %vm17273_vm6, %v7935_v47, %v7936_v61 }
 0x6ef   : > { %10778 = vmatmul.mubr.msk.bf16.gmra.mrb[16].mxu1 %vm17260_vm9, %v7916_v46  ;;  %vm17275_vm9 = vmmov %vm17265_vm0  ;;  %v8323_v46 = vor.u32 %v8322_v8, %v8321_v55 }
 0x6f0   : > { %10781 = vmatprep.mubr.msk.bf16.mxu1 %vm17262_vm11, %v7919_v41  ;;  %v7940_v1 = vsel %vm17275_vm9, %v7938_v23, %v7939_v28  ;;  %vm17277_vm11 = vmmov %vm17265_vm0  ;;  %v17325_v41 = vld [vmem:[#allocation62_spill] sm:$0xff] }
 0x6f1   : > { %v7943_v3 = vsel %vm17277_vm11, %v7941_v32, %v7942_v4  ;;  %v17326_v10 = vshrl.u32 %v17325_v41, 16 }
 0x6f3   : > { %v8329_v18 = vrot.slane %v17326_v10, 4 }
 0x6f7   : > { %10782 = vmatmul.mubr.msk.bf16.gmra.mrb[20].mxu1 %vm17264_vm8, %v7922_v45  ;;  %vm17279_vm8 = vmmov %vm17265_vm0  ;;  %v8328_v45 = vsel %vm7424_vm3, %v8323_v46, %v17328_v29 }
 0x6f8   : > { %10785 = vmatprep.mubr.msk.bf16.mxu1 %vm17266_vm15, %v7925_v39  ;;  %v7946_v43 = vsel %vm17279_vm8, %v7944_v30, %v7945_v48  ;;  %vm17280_vm0 = vmmov %vm17274_vm1  ;;  %v15873_v39 = vld [vmem:[%s16032_s4] ss:$0 sm:$0xff] }
 0x6f9   : > { %vm17281_vm15 = vmmov %vm17271_vm2 }
 0x6fa   : > { %v7949_v54 = vsel %vm17281_vm15, %v7947_v40, %v7948_v51  ;;  %vm17282_vm7 = vmmov %vm17280_vm0 }
 0x6fb   : > { %vm17285_vm14 = vmmov %vm17280_vm0 }
 0x6fc   : > { %vm17291_vm6 = vmmov %vm17280_vm0 }
 0x6fd   : > { %vm17293_vm9 = vmmov %vm17280_vm0 }
 0x6fe   : > { %vm17295_vm11 = vmmov %vm17280_vm0 }
 0x6ff   : > { %10786 = vmatmul.mubr.msk.bf16.gmra.mrb[24].mxu1 %vm17268_vm12, %v7928_v59  ;;  %vm17284_vm12 = vmmov %vm17271_vm2 }
 0x700   : > { %10789 = vmatprep.mubr.msk.bf16.mxu1 %vm17270_vm5, %v7931_v20  ;;  %v7952_v26 = vsel %vm17284_vm12, %v7950_v52, %v7951_v21  ;;  %vm17286_vm5 = vmmov %vm17271_vm2 }
 0x701   : > { %v7955_v36 = vsel %vm17286_vm5, %v7953_v62, %v7954_v49  ;;  %vm17287_vm2 = vmmov %vm17280_vm0 }
 0x702   : > { %vm17299_vm8 = vmmov %vm17280_vm0 }
 0x703   : > { %vm17302_vm15 = vmmov %vm17280_vm0 }
 0x704   : > { %vm17306_vm12 = vmmov %vm17280_vm0 }
 0x707   : > { %10790 = vmatmul.mubr.msk.bf16.gmra.mrb[28].mxu1 %vm17272_vm13, %v7934_v7  ;;  %vm17290_vm13 = vmmov %vm17286_vm5 }
 0x708   : > { %10793 = vmatprep.mubr.msk.bf16.mxu1 %vm17274_vm1, %v7937_v63  ;;  %v7958_v35 = vsel %vm17290_vm13, %v7956_v37, %v7957_v2  ;;  %vm17292_vm1 = vmmov %vm17280_vm0 }
 0x709   : > { %vm17310_vm5 = vmmov %vm17280_vm0 }
 0x70a   : > { %vm17314_vm13 = vmmov %vm17280_vm0 }
 0x70f   : > { %10794 = vmatmul.mubr.msk.bf16.gmra.mrb[32].mxu1 %vm17276_vm4, %v7940_v1  ;;  %vm17294_vm4 = vmmov %vm17280_vm0 }
 0x710   : > { %10797 = vmatprep.mubr.msk.bf16.mxu1 %vm17278_vm10, %v7943_v3  ;;  %vm17297_vm10 = vmmov %vm17280_vm0 }
 0x717   : > { %10798 = vmatmul.mubr.msk.bf16.gmra.mrb[36].mxu1 %vm17280_vm0, %v7946_v43 }
 0x718   : > { %10801 = vmatprep.mubr.msk.bf16.mxu1 %vm17282_vm7, %v7949_v54  ;;  %vm17304_vm7 = vmmov %vm17280_vm0 }
 0x71f   : > { %10802 = vmatmul.mubr.msk.bf16.gmra.mrb[40].mxu1 %vm17285_vm14, %v7952_v26  ;;  %vm17308_vm14 = vmmov %vm17280_vm0 }
 0x720   : > { %10805 = vmatprep.mubr.msk.bf16.mxu1 %vm17287_vm2, %v7955_v36  ;;  %vm17312_vm2 = vmmov %vm17280_vm0 }
 0x727   : > { %10806 = vmatmul.mubr.msk.bf16.gmra.mrb[44].mxu1 %vm17291_vm6, %v7958_v35  ;;  %vm17316_vm6 = vmmov %vm17280_vm0 }
 0x728   : > { %10813 = vmatprep.mubr.msk.bf16.mxu1 %vm17292_vm1, %v15567_v22  ;;  %v17303_v22 = vld [vmem:[#allocation63_spill] sm:$0xff]  ;;  %vm17318_vm1 = vmmov %vm17280_vm0 }
 0x72f   : > { %10814 = vmatmul.mubr.msk.bf16.vlgmr.msra.gmra.mrb[0].mxu1 %vm17293_vm9, %v15574_v11  ;;  %v17305_v11 = vld [vmem:[#allocation71_spill] sm:$0xff]  ;;  %vm17320_vm9 = vmmov %vm17280_vm0 }
 0x730   : > { %10817 = vmatprep.mubr.msk.bf16.mxu1 %vm17294_vm4, %v15581_v31  ;;  %v17307_v31 = vld [vmem:[#allocation70_spill] sm:$0xff]  ;;  %vm17321_vm4 = vmmov %vm17280_vm0 }
 0x737   : > { %10818 = vmatmul.mubr.msk.bf16.gmra.mrb[4].mxu1 %vm17295_vm11, %v15588_v24  ;;  %v17309_v24 = vld [vmem:[#allocation64_spill] sm:$0xff]  ;;  %vm17322_vm11 = vmmov %vm17280_vm0 }
 0x738   : > { %10821 = vmatprep.mubr.msk.bf16.mxu1 %vm17297_vm10, %v17296_v27  ;;  %vm17323_vm10 = vmmov %vm17280_vm0 }
 0x73f   : > { %10822 = vmatmul.mubr.msk.bf16.gmra.mrb[8].mxu1 %vm17299_vm8, %v17298_v44  ;;  %vm17324_vm8 = vmmov %vm17280_vm0 }
 0x740   : > { %10825 = vmatprep.mubr.msk.bf16.mxu1 %vm17280_vm0, %v17300_v16 }
 0x747   : > { %10826 = vmatmul.mubr.msk.bf16.gmra.mrb[12].mxu1 %vm17302_vm15, %v17301_v6  ;;  %vm17329_vm15 = vmmov %vm17280_vm0 }
 0x748   : > { %10829 = vmatprep.mubr.msk.bf16.mxu1 %vm17304_vm7, %v17303_v22  ;;  %vm17330_vm7 = vmmov %vm17280_vm0 }
 0x74f   : > { %10830 = vmatmul.mubr.msk.bf16.gmra.mrb[16].mxu1 %vm17306_vm12, %v17305_v11 }
 0x750   : > { %10833 = vmatprep.mubr.msk.bf16.mxu1 %vm17308_vm14, %v17307_v31 }
 0x757   : > { %10834 = vmatmul.mubr.msk.bf16.gmra.mrb[20].mxu1 %vm17310_vm5, %v17309_v24  ;;  %vm17331_vm5 = vmmov %vm17280_vm0 }
 0x758   : > { %10837 = vmatprep.mubr.msk.bf16.mxu1 %vm17312_vm2, %v17311_v34 }
 0x75f   : > { %10838 = vmatmul.mubr.msk.bf16.gmra.mrb[24].mxu1 %vm17314_vm13, %v17313_v13  ;;  %vm17332_vm13 = vmmov %vm17280_vm0 }
 0x760   : > { %10841 = vmatprep.mubr.msk.bf16.mxu1 %vm17316_vm6, %v17315_v56  ;;  %vm17333_vm6 = vmmov %vm17280_vm0 }
 0x767   : > { %10842 = vmatmul.mubr.msk.bf16.gmra.mrb[28].mxu1 %vm17318_vm1, %v17317_v57  ;;  %vm17334_vm1 = vmmov %vm17280_vm0 }
 0x768   : > { %10845 = vmatprep.mubr.msk.bf16.mxu1 %vm17320_vm9, %v17319_v12 }
 0x76f   : > { %10846 = vmatmul.mubr.msk.bf16.gmra.mrb[32].mxu1 %vm17321_vm4, %v15686_v5  ;;  %v17327_v5 = vshll.u32 %v17325_v41, 16 }
 0x770   : > { %10849 = vmatprep.mubr.msk.bf16.mxu1 %vm17322_vm11, %v15693_v17  ;;  %v8324_v17 = vsel %vm7424_vm3, %v15705_v33, %v8323_v46 }
 0x771   : > { %v8330_v42 = vrot.slane %v17327_v5, 5 }
 0x777   : > { %10850 = vmatmul.mubr.msk.bf16.gmra.mrb[36].mxu1 %vm17323_vm10, %v15700_v0  ;;  %v8331_v0 = vor.u32 %v8330_v42, %v8329_v18  ;;  %vm17335_vm10 = vmmov %vm17280_vm0 }
 0x778   : > { %10853 = vmatprep.mubr.msk.bf16.mxu1 %vm17324_vm8, %v15711_v58 }
 0x779   : > { %v8332_v58 = vsel %vm7424_vm3, %v17328_v29, %v8331_v0 }
 0x77f   : > { %10854 = vmatmul.mubr.msk.bf16.gmra.mrb[40].mxu1 %vm17280_vm0, %v8324_v17 }
 0x780   : > { %10857 = vmatprep.mubr.msk.bf16.mxu1 %vm17329_vm15, %v8328_v45  ;;  %vm17336_vm15 = vmmov %vm17280_vm0 }
 0x787   : > { %10858 = vmatmul.mubr.msk.bf16.gmra.mrb[44].mxu1 %vm17330_vm7, %v8332_v58  ;;  %vm17337_vm7 = vmmov %vm17280_vm0 }
 0x802   : > { %v10815_v33 = vpop.f32.mrb[0].mxu1 }
 0x803   : > { %v8636_v50 = vadd.f32 %v10815_v33, %v15873_v39  ;;  %v8388_v53 = vpop.f32.mrb[1].mxu1 }
 0x804   : > { %v8634_v9 = vadd.f32 %v15873_v39, %v8388_v53  ;;  %v10816_v25 = vpop.f32.mrb[2].mxu1 }
 0x805   : > { %vm8684_vm3 = vcmp.ge.f32.partialorder %v8636_v50, 0.0  ;;  %v8732_v59 = vmul.f32 0.2, %v8636_v50  ;;  %v8637_v20 = vadd.f32 %v10816_v25, %v15873_v39  ;;  %v8391_v19 = vpop.f32.mrb[3].mxu1 }
 0x806   : > { %vm8682_vm12 = vcmp.ge.f32.partialorder %v8634_v9, 0.0  ;;  %v8730_v47 = vmul.f32 0.2, %v8634_v9  ;;  %v8635_v60 = vadd.f32 %v15873_v39, %v8391_v19 }
 0x807   : > { %v8780_v61 = vsel %vm8684_vm3, %v8636_v50, %v8732_v59  ;;  %vm8685_vm14 = vcmp.ge.f32.partialorder %v8637_v20, 0.0  ;;  %v8733_v7 = vmul.f32 0.2, %v8637_v20 }
 0x808   : > { %8828 = vst.msk [vmem:[%s15881_s20 + $0x10] sm:$0xff] %vm17331_vm5, %v8780_v61  ;;  %v8778_v63 = vsel %vm8682_vm12, %v8634_v9, %v8730_v47  ;;  %vm8683_vm2 = vcmp.ge.f32.partialorder %v8635_v60, 0.0  ;;  %v8731_v28 = vmul.f32 0.2, %v8635_v60  ;;  %vm17338_vm5 = vmmov %vm17280_vm0 }
 0x809   : > { %8826 = vst.msk [vmem:[%s15881_s20] sm:$0xff] %vm17332_vm13, %v8778_v63  ;;  %v8781_v32 = vsel %vm8685_vm14, %v8637_v20, %v8733_v7  ;;  %vm17339_vm13 = vmmov %vm17280_vm0 }
 0x80a   : > { %8829 = vst.msk [vmem:[%s15881_s20 + $0x18] sm:$0xff] %vm17333_vm6, %v8781_v32  ;;  %v8779_v23 = vsel %vm8683_vm2, %v8635_v60, %v8731_v28  ;;  %v10819_v4 = vpop.f32.mrb[4].mxu1  ;;  %vm17340_vm6 = vmmov %vm17280_vm0 }
 0x80b   : > { %8827 = vst.msk [vmem:[%s15881_s20 + $0x8] sm:$0xff] %vm17334_vm1, %v8779_v23  ;;  %v8640_v1 = vadd.f32 %v10819_v4, %v15873_v39  ;;  %v8404_v3 = vpop.f32.mrb[5].mxu1  ;;  %vm17341_vm1 = vmmov %vm17280_vm0 }
 0x80c   : > { %v8638_v48 = vadd.f32 %v15873_v39, %v8404_v3  ;;  %v10820_v40 = vpop.f32.mrb[6].mxu1 }
 0x80d   : > { %vm8688_vm9 = vcmp.ge.f32.partialorder %v8640_v1, 0.0  ;;  %v8736_v30 = vmul.f32 0.2, %v8640_v1  ;;  %v8641_v51 = vadd.f32 %v10820_v40, %v15873_v39  ;;  %v8407_v43 = vpop.f32.mrb[7].mxu1 }
 0x80e   : > { %vm8686_vm4 = vcmp.ge.f32.partialorder %v8638_v48, 0.0  ;;  %v8734_v54 = vmul.f32 0.2, %v8638_v48  ;;  %v8639_v21 = vadd.f32 %v15873_v39, %v8407_v43 }
 0x80f   : > { %v8784_v62 = vsel %vm8688_vm9, %v8640_v1, %v8736_v30  ;;  %vm8689_vm11 = vcmp.ge.f32.partialorder %v8641_v51, 0.0  ;;  %v8737_v52 = vmul.f32 0.2, %v8641_v51 }
 0x810   : > { %8832 = vst.msk [vmem:[%s15881_s20 + $0x30] sm:$0xff] %vm17335_vm10, %v8784_v62  ;;  %v8782_v15 = vsel %vm8686_vm4, %v8638_v48, %v8734_v54  ;;  %vm8687_vm8 = vcmp.ge.f32.partialorder %v8639_v21, 0.0  ;;  %v8735_v49 = vmul.f32 0.2, %v8639_v21  ;;  %vm17342_vm10 = vmmov %vm17280_vm0 }
 0x811   : > { %8830 = vst.msk [vmem:[%s15881_s20 + $0x20] sm:$0xff] %vm17280_vm0, %v8782_v15  ;;  %v8785_v26 = vsel %vm8689_vm11, %v8641_v51, %v8737_v52 }
 0x812   : > { %8833 = vst.msk [vmem:[%s15881_s20 + $0x38] sm:$0xff] %vm17336_vm15, %v8785_v26  ;;  %v8783_v36 = vsel %vm8687_vm8, %v8639_v21, %v8735_v49  ;;  %v10823_v38 = vpop.f32.mrb[8].mxu1  ;;  %vm17343_vm15 = vmmov %vm17280_vm0 }
 0x813   : > { %8831 = vst.msk [vmem:[%s15881_s20 + $0x28] sm:$0xff] %vm17337_vm7, %v8783_v36  ;;  %v8644_v37 = vadd.f32 %v10823_v38, %v15873_v39  ;;  %v8420_v14 = vpop.f32.mrb[9].mxu1  ;;  %vm17344_vm7 = vmmov %vm17280_vm0 }
 0x814   : > { %v8642_v2 = vadd.f32 %v15873_v39, %v8420_v14  ;;  %v10824_v35 = vpop.f32.mrb[10].mxu1 }
 0x815   : > { %vm8692_vm3 = vcmp.ge.f32.partialorder %v8644_v37, 0.0  ;;  %v8740_v27 = vmul.f32 0.2, %v8644_v37  ;;  %v8645_v44 = vadd.f32 %v10824_v35, %v15873_v39  ;;  %v8423_v16 = vpop.f32.mrb[11].mxu1 }
 0x816   : > { %vm8690_vm12 = vcmp.ge.f32.partialorder %v8642_v2, 0.0  ;;  %v8738_v6 = vmul.f32 0.2, %v8642_v2  ;;  %v8643_v22 = vadd.f32 %v15873_v39, %v8423_v16 }
 0x817   : > { %v8788_v11 = vsel %vm8692_vm3, %v8644_v37, %v8740_v27  ;;  %vm8693_vm14 = vcmp.ge.f32.partialorder %v8645_v44, 0.0  ;;  %v8741_v31 = vmul.f32 0.2, %v8645_v44 }
 0x818   : > { %8836 = vst.msk [vmem:[%s15881_s20 + $0x50] sm:$0xff] %vm17338_vm5, %v8788_v11  ;;  %v8786_v24 = vsel %vm8690_vm12, %v8642_v2, %v8738_v6  ;;  %vm8691_vm2 = vcmp.ge.f32.partialorder %v8643_v22, 0.0  ;;  %v8739_v34 = vmul.f32 0.2, %v8643_v22  ;;  %vm17345_vm5 = vmmov %vm17280_vm0 }
 0x819   : > { %8834 = vst.msk [vmem:[%s15881_s20 + $0x40] sm:$0xff] %vm17339_vm13, %v8786_v24  ;;  %v8789_v13 = vsel %vm8693_vm14, %v8645_v44, %v8741_v31  ;;  %vm17346_vm13 = vmmov %vm17280_vm0 }
 0x81a   : > { %8837 = vst.msk [vmem:[%s15881_s20 + $0x58] sm:$0xff] %vm17340_vm6, %v8789_v13  ;;  %v8787_v56 = vsel %vm8691_vm2, %v8643_v22, %v8739_v34  ;;  %v10827_v57 = vpop.f32.mrb[12].mxu1  ;;  %vm17347_vm6 = vmmov %vm17280_vm0 }
 0x81b   : > { %8835 = vst.msk [vmem:[%s15881_s20 + $0x48] sm:$0xff] %vm17341_vm1, %v8787_v56  ;;  %v8648_v12 = vadd.f32 %v10827_v57, %v15873_v39  ;;  %v8436_v55 = vpop.f32.mrb[13].mxu1  ;;  %vm17348_vm1 = vmmov %vm17280_vm0 }
 0x81c   : > { %v8646_v8 = vadd.f32 %v15873_v39, %v8436_v55  ;;  %v10828_v46 = vpop.f32.mrb[14].mxu1 }
 0x81d   : > { %vm8696_vm9 = vcmp.ge.f32.partialorder %v8648_v12, 0.0  ;;  %v8744_v41 = vmul.f32 0.2, %v8648_v12  ;;  %v8649_v10 = vadd.f32 %v10828_v46, %v15873_v39  ;;  %v8439_v18 = vpop.f32.mrb[15].mxu1 }
 0x81e   : > { %vm8694_vm4 = vcmp.ge.f32.partialorder %v8646_v8, 0.0  ;;  %v8742_v5 = vmul.f32 0.2, %v8646_v8  ;;  %v8647_v42 = vadd.f32 %v15873_v39, %v8439_v18 }
 0x81f   : > { %v8792_v17 = vsel %vm8696_vm9, %v8648_v12, %v8744_v41  ;;  %vm8697_vm11 = vcmp.ge.f32.partialorder %v8649_v10, 0.0  ;;  %v8745_v29 = vmul.f32 0.2, %v8649_v10 }
 0x820   : > { %8840 = vst.msk [vmem:[%s15881_s20 + $0x70] sm:$0xff] %vm17342_vm10, %v8792_v17  ;;  %v8790_v45 = vsel %vm8694_vm4, %v8646_v8, %v8742_v5  ;;  %vm8695_vm8 = vcmp.ge.f32.partialorder %v8647_v42, 0.0  ;;  %v8743_v0 = vmul.f32 0.2, %v8647_v42  ;;  %vm17349_vm10 = vmmov %vm17280_vm0 }
 0x821   : > { %8838 = vst.msk [vmem:[%s15881_s20 + $0x60] sm:$0xff] %vm17280_vm0, %v8790_v45  ;;  %v8793_v58 = vsel %vm8697_vm11, %v8649_v10, %v8745_v29 }
 0x822   : > { %8841 = vst.msk [vmem:[%s15881_s20 + $0x78] sm:$0xff] %vm17343_vm15, %v8793_v58  ;;  %v8791_v33 = vsel %vm8695_vm8, %v8647_v42, %v8743_v0  ;;  %v10831_v50 = vpop.f32.mrb[16].mxu1  ;;  %vm17350_vm15 = vmmov %vm17280_vm0 }
 0x823   : > { %8839 = vst.msk [vmem:[%s15881_s20 + $0x68] sm:$0xff] %vm17344_vm7, %v8791_v33  ;;  %v8652_v53 = vadd.f32 %v10831_v50, %v15873_v39  ;;  %v8452_v9 = vpop.f32.mrb[17].mxu1  ;;  %vm17351_vm7 = vmmov %vm17280_vm0 }
 0x824   : > { %v8650_v25 = vadd.f32 %v15873_v39, %v8452_v9  ;;  %v10832_v59 = vpop.f32.mrb[18].mxu1 }
 0x825   : > { %vm8700_vm3 = vcmp.ge.f32.partialorder %v8652_v53, 0.0  ;;  %v8748_v20 = vmul.f32 0.2, %v8652_v53  ;;  %v8653_v19 = vadd.f32 %v10832_v59, %v15873_v39  ;;  %v8455_v47 = vpop.f32.mrb[19].mxu1 }
 0x826   : > { %vm8698_vm12 = vcmp.ge.f32.partialorder %v8650_v25, 0.0  ;;  %v8746_v60 = vmul.f32 0.2, %v8650_v25  ;;  %v8651_v61 = vadd.f32 %v15873_v39, %v8455_v47 }
 0x827   : > { %v8796_v7 = vsel %vm8700_vm3, %v8652_v53, %v8748_v20  ;;  %vm8701_vm14 = vcmp.ge.f32.partialorder %v8653_v19, 0.0  ;;  %v8749_v63 = vmul.f32 0.2, %v8653_v19 }
 0x828   : > { %8844 = vst.msk [vmem:[%s15881_s20 + $0x90] sm:$0xff] %vm17345_vm5, %v8796_v7  ;;  %v8794_v28 = vsel %vm8698_vm12, %v8650_v25, %v8746_v60  ;;  %vm8699_vm2 = vcmp.ge.f32.partialorder %v8651_v61, 0.0  ;;  %v8747_v32 = vmul.f32 0.2, %v8651_v61  ;;  %vm17352_vm5 = vmmov %vm17280_vm0 }
 0x829   : > { %8842 = vst.msk [vmem:[%s15881_s20 + $0x80] sm:$0xff] %vm17346_vm13, %v8794_v28  ;;  %v8797_v23 = vsel %vm8701_vm14, %v8653_v19, %v8749_v63  ;;  %vm17353_vm13 = vmmov %vm17280_vm0 }
 0x82a   : > { %8845 = vst.msk [vmem:[%s15881_s20 + $0x98] sm:$0xff] %vm17347_vm6, %v8797_v23  ;;  %v8795_v4 = vsel %vm8699_vm2, %v8651_v61, %v8747_v32  ;;  %v10835_v1 = vpop.f32.mrb[20].mxu1  ;;  %vm17354_vm6 = vmmov %vm17280_vm0 }
 0x82b   : > { %8843 = vst.msk [vmem:[%s15881_s20 + $0x88] sm:$0xff] %vm17348_vm1, %v8795_v4  ;;  %v8656_v3 = vadd.f32 %v10835_v1, %v15873_v39  ;;  %v8468_v48 = vpop.f32.mrb[21].mxu1  ;;  %vm17355_vm1 = vmmov %vm17280_vm0 }
 0x82c   : > { %v8654_v40 = vadd.f32 %v15873_v39, %v8468_v48  ;;  %v10836_v30 = vpop.f32.mrb[22].mxu1 }
 0x82d   : > { %vm8704_vm9 = vcmp.ge.f32.partialorder %v8656_v3, 0.0  ;;  %v8752_v51 = vmul.f32 0.2, %v8656_v3  ;;  %v8657_v43 = vadd.f32 %v10836_v30, %v15873_v39  ;;  %v8471_v54 = vpop.f32.mrb[23].mxu1 }
 0x82e   : > { %vm8702_vm4 = vcmp.ge.f32.partialorder %v8654_v40, 0.0  ;;  %v8750_v21 = vmul.f32 0.2, %v8654_v40  ;;  %v8655_v62 = vadd.f32 %v15873_v39, %v8471_v54 }
 0x82f   : > { %v8800_v52 = vsel %vm8704_vm9, %v8656_v3, %v8752_v51  ;;  %vm8705_vm11 = vcmp.ge.f32.partialorder %v8657_v43, 0.0  ;;  %v8753_v15 = vmul.f32 0.2, %v8657_v43 }
 0x830   : > { %8848 = vst.msk [vmem:[%s15881_s20 + $0xb0] sm:$0xff] %vm17349_vm10, %v8800_v52  ;;  %v8798_v49 = vsel %vm8702_vm4, %v8654_v40, %v8750_v21  ;;  %vm8703_vm8 = vcmp.ge.f32.partialorder %v8655_v62, 0.0  ;;  %v8751_v26 = vmul.f32 0.2, %v8655_v62  ;;  %vm17356_vm10 = vmmov %vm17280_vm0 }
 0x831   : > { %8846 = vst.msk [vmem:[%s15881_s20 + $0xa0] sm:$0xff] %vm17280_vm0, %v8798_v49  ;;  %v8801_v36 = vsel %vm8705_vm11, %v8657_v43, %v8753_v15 }
 0x832   : > { %8849 = vst.msk [vmem:[%s15881_s20 + $0xb8] sm:$0xff] %vm17350_vm15, %v8801_v36  ;;  %v8799_v38 = vsel %vm8703_vm8, %v8655_v62, %v8751_v26  ;;  %v10839_v37 = vpop.f32.mrb[24].mxu1  ;;  %vm17357_vm15 = vmmov %vm17280_vm0 }
 0x833   : > { %8847 = vst.msk [vmem:[%s15881_s20 + $0xa8] sm:$0xff] %vm17351_vm7, %v8799_v38  ;;  %v8660_v14 = vadd.f32 %v10839_v37, %v15873_v39  ;;  %v8484_v2 = vpop.f32.mrb[25].mxu1  ;;  %vm17358_vm7 = vmmov %vm17280_vm0 }
 0x834   : > { %v8658_v35 = vadd.f32 %v15873_v39, %v8484_v2  ;;  %v10840_v27 = vpop.f32.mrb[26].mxu1 }
 0x835   : > { %vm8708_vm3 = vcmp.ge.f32.partialorder %v8660_v14, 0.0  ;;  %v8756_v44 = vmul.f32 0.2, %v8660_v14  ;;  %v8661_v16 = vadd.f32 %v10840_v27, %v15873_v39  ;;  %v8487_v6 = vpop.f32.mrb[27].mxu1 }
 0x836   : > { %vm8706_vm12 = vcmp.ge.f32.partialorder %v8658_v35, 0.0  ;;  %v8754_v22 = vmul.f32 0.2, %v8658_v35  ;;  %v8659_v11 = vadd.f32 %v15873_v39, %v8487_v6 }
 0x837   : > { %v8804_v31 = vsel %vm8708_vm3, %v8660_v14, %v8756_v44  ;;  %vm8709_vm14 = vcmp.ge.f32.partialorder %v8661_v16, 0.0  ;;  %v8757_v24 = vmul.f32 0.2, %v8661_v16 }
 0x838   : > { %8852 = vst.msk [vmem:[%s15881_s20 + $0xd0] sm:$0xff] %vm17352_vm5, %v8804_v31  ;;  %v8802_v34 = vsel %vm8706_vm12, %v8658_v35, %v8754_v22  ;;  %vm8707_vm2 = vcmp.ge.f32.partialorder %v8659_v11, 0.0  ;;  %v8755_v13 = vmul.f32 0.2, %v8659_v11  ;;  %vm17359_vm5 = vmmov %vm17280_vm0 }
 0x839   : > { %8850 = vst.msk [vmem:[%s15881_s20 + $0xc0] sm:$0xff] %vm17353_vm13, %v8802_v34  ;;  %v8805_v56 = vsel %vm8709_vm14, %v8661_v16, %v8757_v24  ;;  %vm17360_vm13 = vmmov %vm17280_vm0 }
 0x83a   : > { %8853 = vst.msk [vmem:[%s15881_s20 + $0xd8] sm:$0xff] %vm17354_vm6, %v8805_v56  ;;  %v8803_v57 = vsel %vm8707_vm2, %v8659_v11, %v8755_v13  ;;  %v10843_v12 = vpop.f32.mrb[28].mxu1  ;;  %vm17361_vm6 = vmmov %vm17280_vm0 }
 0x83b   : > { %8851 = vst.msk [vmem:[%s15881_s20 + $0xc8] sm:$0xff] %vm17355_vm1, %v8803_v57  ;;  %v8664_v55 = vadd.f32 %v10843_v12, %v15873_v39  ;;  %v8500_v8 = vpop.f32.mrb[29].mxu1  ;;  %vm17362_vm1 = vmmov %vm17280_vm0 }
 0x83c   : > { %v8662_v46 = vadd.f32 %v15873_v39, %v8500_v8  ;;  %v10844_v41 = vpop.f32.mrb[30].mxu1 }
 0x83d   : > { %vm8712_vm9 = vcmp.ge.f32.partialorder %v8664_v55, 0.0  ;;  %v8760_v10 = vmul.f32 0.2, %v8664_v55  ;;  %v8665_v18 = vadd.f32 %v10844_v41, %v15873_v39  ;;  %v8503_v5 = vpop.f32.mrb[31].mxu1 }
 0x83e   : > { %vm8710_vm4 = vcmp.ge.f32.partialorder %v8662_v46, 0.0  ;;  %v8758_v42 = vmul.f32 0.2, %v8662_v46  ;;  %v8663_v17 = vadd.f32 %v15873_v39, %v8503_v5 }
 0x83f   : > { %v8808_v29 = vsel %vm8712_vm9, %v8664_v55, %v8760_v10  ;;  %vm8713_vm11 = vcmp.ge.f32.partialorder %v8665_v18, 0.0  ;;  %v8761_v45 = vmul.f32 0.2, %v8665_v18 }
 0x840   : > { %8856 = vst.msk [vmem:[%s15881_s20 + $0xf0] sm:$0xff] %vm17356_vm10, %v8808_v29  ;;  %v8806_v0 = vsel %vm8710_vm4, %v8662_v46, %v8758_v42  ;;  %vm8711_vm8 = vcmp.ge.f32.partialorder %v8663_v17, 0.0  ;;  %v8759_v58 = vmul.f32 0.2, %v8663_v17  ;;  %vm17363_vm10 = vmmov %vm17280_vm0 }
 0x841   : > { %8854 = vst.msk [vmem:[%s15881_s20 + $0xe0] sm:$0xff] %vm17280_vm0, %v8806_v0  ;;  %v8809_v33 = vsel %vm8713_vm11, %v8665_v18, %v8761_v45 }
 0x842   : > { %8857 = vst.msk [vmem:[%s15881_s20 + $0xf8] sm:$0xff] %vm17357_vm15, %v8809_v33  ;;  %v8807_v50 = vsel %vm8711_vm8, %v8663_v17, %v8759_v58  ;;  %v10847_v53 = vpop.f32.mrb[32].mxu1  ;;  %vm17364_vm15 = vmmov %vm17280_vm0 }
 0x843   : > { %8855 = vst.msk [vmem:[%s15881_s20 + $0xe8] sm:$0xff] %vm17358_vm7, %v8807_v50  ;;  %v8668_v9 = vadd.f32 %v10847_v53, %v15873_v39  ;;  %v8516_v25 = vpop.f32.mrb[33].mxu1  ;;  %vm17365_vm7 = vmmov %vm17280_vm0 }
 0x844   : > { %v8666_v59 = vadd.f32 %v15873_v39, %v8516_v25  ;;  %v10848_v20 = vpop.f32.mrb[34].mxu1 }
 0x845   : > { %vm8716_vm3 = vcmp.ge.f32.partialorder %v8668_v9, 0.0  ;;  %v8764_v19 = vmul.f32 0.2, %v8668_v9  ;;  %v8669_v47 = vadd.f32 %v10848_v20, %v15873_v39  ;;  %v8519_v60 = vpop.f32.mrb[35].mxu1 }
 0x846   : > { %vm8714_vm12 = vcmp.ge.f32.partialorder %v8666_v59, 0.0  ;;  %v8762_v61 = vmul.f32 0.2, %v8666_v59  ;;  %v8667_v7 = vadd.f32 %v15873_v39, %v8519_v60 }
 0x847   : > { %v8812_v63 = vsel %vm8716_vm3, %v8668_v9, %v8764_v19  ;;  %vm8717_vm14 = vcmp.ge.f32.partialorder %v8669_v47, 0.0  ;;  %v8765_v28 = vmul.f32 0.2, %v8669_v47 }
 0x848   : > { %8860 = vst.msk [vmem:[%s15881_s20 + $0x110] sm:$0xff] %vm17359_vm5, %v8812_v63  ;;  %v8810_v32 = vsel %vm8714_vm12, %v8666_v59, %v8762_v61  ;;  %vm8715_vm2 = vcmp.ge.f32.partialorder %v8667_v7, 0.0  ;;  %v8763_v23 = vmul.f32 0.2, %v8667_v7  ;;  %vm17366_vm5 = vmmov %vm17280_vm0 }
 0x849   : > { %8858 = vst.msk [vmem:[%s15881_s20 + $0x100] sm:$0xff] %vm17360_vm13, %v8810_v32  ;;  %v8813_v4 = vsel %vm8717_vm14, %v8669_v47, %v8765_v28  ;;  %vm17367_vm13 = vmmov %vm17280_vm0 }
 0x84a   : > { %8861 = vst.msk [vmem:[%s15881_s20 + $0x118] sm:$0xff] %vm17361_vm6, %v8813_v4  ;;  %v8811_v1 = vsel %vm8715_vm2, %v8667_v7, %v8763_v23  ;;  %v10851_v3 = vpop.f32.mrb[36].mxu1  ;;  %vm17368_vm6 = vmmov %vm17280_vm0 }
 0x84b   : > { %8859 = vst.msk [vmem:[%s15881_s20 + $0x108] sm:$0xff] %vm17362_vm1, %v8811_v1  ;;  %v8672_v48 = vadd.f32 %v10851_v3, %v15873_v39  ;;  %v8532_v40 = vpop.f32.mrb[37].mxu1  ;;  %vm17369_vm1 = vmmov %vm17280_vm0 }
 0x84c   : > { %v8670_v30 = vadd.f32 %v15873_v39, %v8532_v40  ;;  %v10852_v51 = vpop.f32.mrb[38].mxu1 }
 0x84d   : > { %vm8720_vm9 = vcmp.ge.f32.partialorder %v8672_v48, 0.0  ;;  %v8768_v43 = vmul.f32 0.2, %v8672_v48  ;;  %v8673_v54 = vadd.f32 %v10852_v51, %v15873_v39  ;;  %v8535_v21 = vpop.f32.mrb[39].mxu1 }
 0x84e   : > { %vm8718_vm4 = vcmp.ge.f32.partialorder %v8670_v30, 0.0  ;;  %v8766_v62 = vmul.f32 0.2, %v8670_v30  ;;  %v8671_v52 = vadd.f32 %v15873_v39, %v8535_v21 }
 0x84f   : > { %v8816_v15 = vsel %vm8720_vm9, %v8672_v48, %v8768_v43  ;;  %vm8721_vm11 = vcmp.ge.f32.partialorder %v8673_v54, 0.0  ;;  %v8769_v49 = vmul.f32 0.2, %v8673_v54 }
 0x850   : > { %8864 = vst.msk [vmem:[%s15881_s20 + $0x130] sm:$0xff] %vm17363_vm10, %v8816_v15  ;;  %v8814_v26 = vsel %vm8718_vm4, %v8670_v30, %v8766_v62  ;;  %vm8719_vm8 = vcmp.ge.f32.partialorder %v8671_v52, 0.0  ;;  %v8767_v36 = vmul.f32 0.2, %v8671_v52  ;;  %vm17370_vm10 = vmmov %vm17280_vm0 }
 0x851   : > { %8862 = vst.msk [vmem:[%s15881_s20 + $0x120] sm:$0xff] %vm17280_vm0, %v8814_v26  ;;  %v8817_v38 = vsel %vm8721_vm11, %v8673_v54, %v8769_v49 }
 0x852   : > { %8865 = vst.msk [vmem:[%s15881_s20 + $0x138] sm:$0xff] %vm17364_vm15, %v8817_v38  ;;  %v8815_v37 = vsel %vm8719_vm8, %v8671_v52, %v8767_v36  ;;  %v10855_v14 = vpop.f32.mrb[40].mxu1  ;;  %vm17371_vm15 = vmmov %vm17280_vm0 }
 0x853   : > { %8863 = vst.msk [vmem:[%s15881_s20 + $0x128] sm:$0xff] %vm17365_vm7, %v8815_v37  ;;  %v8676_v2 = vadd.f32 %v10855_v14, %v15873_v39  ;;  %v8548_v35 = vpop.f32.mrb[41].mxu1  ;;  %vm17372_vm7 = vmmov %vm17280_vm0 }
 0x854   : > { %v8674_v27 = vadd.f32 %v15873_v39, %v8548_v35  ;;  %v10856_v44 = vpop.f32.mrb[42].mxu1 }
 0x855   : > { %vm8724_vm3 = vcmp.ge.f32.partialorder %v8676_v2, 0.0  ;;  %v8772_v16 = vmul.f32 0.2, %v8676_v2  ;;  %v8677_v6 = vadd.f32 %v10856_v44, %v15873_v39  ;;  %v8551_v22 = vpop.f32.mrb[43].mxu1 }
 0x856   : > { %vm8722_vm12 = vcmp.ge.f32.partialorder %v8674_v27, 0.0  ;;  %v8770_v11 = vmul.f32 0.2, %v8674_v27  ;;  %v8675_v31 = vadd.f32 %v15873_v39, %v8551_v22 }
 0x857   : > { %v8820_v24 = vsel %vm8724_vm3, %v8676_v2, %v8772_v16  ;;  %vm8725_vm14 = vcmp.ge.f32.partialorder %v8677_v6, 0.0  ;;  %v8773_v34 = vmul.f32 0.2, %v8677_v6 }
 0x858   : > { %8868 = vst.msk [vmem:[%s15881_s20 + $0x150] sm:$0xff] %vm17366_vm5, %v8820_v24  ;;  %v8818_v13 = vsel %vm8722_vm12, %v8674_v27, %v8770_v11  ;;  %vm8723_vm2 = vcmp.ge.f32.partialorder %v8675_v31, 0.0  ;;  %v8771_v56 = vmul.f32 0.2, %v8675_v31 }
 0x859   : > { %8866 = vst.msk [vmem:[%s15881_s20 + $0x140] sm:$0xff] %vm17367_vm13, %v8818_v13  ;;  %v8821_v57 = vsel %vm8725_vm14, %v8677_v6, %v8773_v34 }
 0x85a   : > { %8869 = vst.msk [vmem:[%s15881_s20 + $0x158] sm:$0xff] %vm17368_vm6, %v8821_v57  ;;  %v8819_v12 = vsel %vm8723_vm2, %v8675_v31, %v8771_v56  ;;  %v10859_v55 = vpop.f32.mrb[44].mxu1 }
 0x85b   : > { %8867 = vst.msk [vmem:[%s15881_s20 + $0x148] sm:$0xff] %vm17369_vm1, %v8819_v12  ;;  %v8680_v8 = vadd.f32 %v10859_v55, %v15873_v39  ;;  %v8564_v46 = vpop.f32.mrb[45].mxu1 }
 0x85c   : > { %v8678_v41 = vadd.f32 %v15873_v39, %v8564_v46  ;;  %v10860_v10 = vpop.f32.mrb[46].mxu1 }
 0x85d   : > { %vm8728_vm9 = vcmp.ge.f32.partialorder %v8680_v8, 0.0  ;;  %v8776_v18 = vmul.f32 0.2, %v8680_v8  ;;  %v8681_v5 = vadd.f32 %v10860_v10, %v15873_v39  ;;  %v8567_v42 = vpop.f32.mrb[47].mxu1 }
 0x85e   : > { %vm8726_vm4 = vcmp.ge.f32.partialorder %v8678_v41, 0.0  ;;  %v8774_v17 = vmul.f32 0.2, %v8678_v41  ;;  %v8679_v29 = vadd.f32 %v15873_v39, %v8567_v42 }
 0x85f   : > { %v8824_v45 = vsel %vm8728_vm9, %v8680_v8, %v8776_v18  ;;  %vm8729_vm11 = vcmp.ge.f32.partialorder %v8681_v5, 0.0  ;;  %v8777_v0 = vmul.f32 0.2, %v8681_v5 }
 0x860   : > { %8872 = vst.msk [vmem:[%s15881_s20 + $0x170] sm:$0xff] %vm17370_vm10, %v8824_v45  ;;  %v8822_v58 = vsel %vm8726_vm4, %v8678_v41, %v8774_v17  ;;  %vm8727_vm8 = vcmp.ge.f32.partialorder %v8679_v29, 0.0  ;;  %v8775_v33 = vmul.f32 0.2, %v8679_v29 }
 0x861   : > { %8870 = vst.msk [vmem:[%s15881_s20 + $0x160] sm:$0xff] %vm17280_vm0, %v8822_v58  ;;  %v8825_v50 = vsel %vm8729_vm11, %v8681_v5, %v8777_v0 }
 0x862   : > { %8873 = vst.msk [vmem:[%s15881_s20 + $0x178] sm:$0xff] %vm17371_vm15, %v8825_v50  ;;  %v8823_v53 = vsel %vm8727_vm8, %v8679_v29, %v8775_v33 }
 0x863   : > { %8871 = vst.msk [vmem:[%s15881_s20 + $0x168] sm:$0xff] %vm17372_vm7, %v8823_v53 }
 0x864 PF: > { %s15_s18 = sadd.s32 1, %s11839_s18  }
 0x865   : > { %p12_p4 = scmp.ge.s32.totalorder %s15_s18, 4  }
 0x867   :  { %14 = sbr.rel (!%p12_p4) target bundleno = 1 (0x1), region = 86 }

</bundles_post_ra>
